<compile_context>
chip_gen: v7x
topology: tpu7x:2x2x1
jax: 0.10.0
libtpu: 0.0.40
codegen_flags: <defaults>
</compile_context>

<pallas_src>
import functools
import math

import jax
import jax.numpy as jnp
from jax.experimental import pallas as pl
from jax.experimental.pallas import tpu as pltpu


# ----------------------------------------------------------------------------
# Small synthetic config consistent with MultiModalConfig (lane-dense dims)
# ----------------------------------------------------------------------------
CFG = dict(
    # vision tower (SigLIP-style)
    v_image_size=16, v_patch=8, v_channels=3,
    v_hidden=128, v_inter=256, v_heads=2, v_layers=2,
    # language model (Gemma-style)
    t_hidden=256, t_inter=512, t_heads=2, t_layers=2, t_vocab=512,
    # projector / merge
    projection_dim=256, hidden_size=256,
    image_token_index=511, pad_token_id=-1,
    rope_base=10000.0, eps=1e-6,
)
CFG["num_image_tokens"] = (CFG["v_image_size"] // CFG["v_patch"]) ** 2   # 4
CFG["v_head_dim"] = CFG["v_hidden"] // CFG["v_heads"]                    # 64
CFG["t_head_dim"] = CFG["t_hidden"] // CFG["t_heads"]                    # 128


# ----------------------------------------------------------------------------
# pallas_call helpers: per-layer kernels are gridded over the batch dim with
# "parallel" semantics (v7x megacore), weights are shared full-array blocks.
# ----------------------------------------------------------------------------
def _batch_spec(shape):
    nd = len(shape)
    return pl.BlockSpec((1,) + tuple(shape[1:]),
                        lambda b, _n=nd: (b,) + (0,) * (_n - 1))


def _shared_spec(shape):
    nd = len(shape)
    return pl.BlockSpec(tuple(shape), lambda b, _n=nd: (0,) * _n)


def _per_batch_call(kernel, out_shape, inputs, batched):
    # TODO(synk): mark the shared weight specs pipeline_mode=pl.Buffered(1) to
    # reclaim the idle double-buffer (matters most for v7x's 64 MiB VMEM).
    B = out_shape.shape[0]
    in_specs = [(_batch_spec if f else _shared_spec)(x.shape)
                for x, f in zip(inputs, batched)]
    return pl.pallas_call(
        kernel,
        out_shape=out_shape,
        grid=(B,),
        in_specs=in_specs,
        out_specs=_batch_spec(out_shape.shape),
        compiler_params=pltpu.CompilerParams(dimension_semantics=("parallel",)),
    )(*inputs)


# ----------------------------------------------------------------------------
# In-kernel math helpers (pure jnp, f32)
# ----------------------------------------------------------------------------
def _layernorm(x, w, b, eps):
    mu = jnp.mean(x, axis=-1, keepdims=True)
    var = jnp.mean((x - mu) * (x - mu), axis=-1, keepdims=True)
    return (x - mu) * jax.lax.rsqrt(var + eps) * w + b


def _rmsnorm(x, w, eps):
    var = jnp.mean(x * x, axis=-1, keepdims=True)
    return x * jax.lax.rsqrt(var + eps) * (1.0 + w)          # Gemma (1 + w)


def _softmax_rows(s):
    s = s - jnp.max(s, axis=-1, keepdims=True)
    p = jnp.exp(s)
    return p * pl.reciprocal(jnp.sum(p, axis=-1, keepdims=True), approx=True)


# ----------------------------------------------------------------------------
# Fused Pallas kernels (each kernel handles one batch element per grid step)
# ----------------------------------------------------------------------------
def _patch_embed_kernel(p_ref, w_ref, b_ref, pos_ref, o_ref):
    # im2col patches @ conv-weight + bias + positional embedding, fused.
    y = jnp.dot(p_ref[0], w_ref[...], preferred_element_type=jnp.float32)
    o_ref[0] = (y + b_ref[...] + pos_ref[...]).astype(o_ref.dtype)


def _vit_attn_kernel(x_ref, lnw_ref, lnb_ref, wqkv_ref, bqkv_ref, wo_ref, bo_ref,
                     o_ref, *, heads, head_dim, eps, scale):
    # LayerNorm + fused QKV + multi-head attention + fused out-proj + residual.
    x = x_ref[0].astype(jnp.float32)                                    # (Np, Dv)
    h = _layernorm(x, lnw_ref[...], lnb_ref[...], eps).astype(jnp.bfloat16)
    qkv = jnp.dot(h, wqkv_ref[...], preferred_element_type=jnp.float32) + bqkv_ref[...]
    hd = heads * head_dim
    outs = []
    for i in range(heads):                                              # small static loop
        q = qkv[:, i * head_dim:(i + 1) * head_dim]
        k = qkv[:, hd + i * head_dim: hd + (i + 1) * head_dim]
        v = qkv[:, 2 * hd + i * head_dim: 2 * hd + (i + 1) * head_dim]
        s = jax.lax.dot_general(q.astype(jnp.bfloat16), k.astype(jnp.bfloat16),
                                (((1,), (1,)), ((), ())),
                                preferred_element_type=jnp.float32) * scale
        p = _softmax_rows(s)
        outs.append(jnp.dot(p.astype(jnp.bfloat16), v.astype(jnp.bfloat16),
                            preferred_element_type=jnp.float32))
    o_cat = jnp.concatenate(outs, axis=-1).astype(jnp.bfloat16)         # (Np, H*Dh)
    attn = jnp.dot(o_cat, wo_ref[...], preferred_element_type=jnp.float32) + bo_ref[...]
    o_ref[0] = (x + attn).astype(o_ref.dtype)


def _vit_mlp_kernel(x_ref, lnw_ref, lnb_ref, w1_ref, b1_ref, w2_ref, b2_ref,
                    o_ref, *, eps):
    # LayerNorm + fc1 + gelu + fc2 + residual (one layer, one batch element).
    x = x_ref[0].astype(jnp.float32)
    h = _layernorm(x, lnw_ref[...], lnb_ref[...], eps).astype(jnp.bfloat16)
    g = jnp.dot(h, w1_ref[...], preferred_element_type=jnp.float32) + b1_ref[...]
    g = jax.nn.gelu(g, approximate=True).astype(jnp.bfloat16)
    y = jnp.dot(g, w2_ref[...], preferred_element_type=jnp.float32) + b2_ref[...]
    o_ref[0] = (x + y).astype(o_ref.dtype)


def _vit_head_kernel(x_ref, lnw_ref, lnb_ref, pw_ref, o_ref, *, eps):
    # post_layernorm + multimodal projector (Linear, no bias), fused.
    x = x_ref[0].astype(jnp.float32)
    h = _layernorm(x, lnw_ref[...], lnb_ref[...], eps).astype(jnp.bfloat16)
    o_ref[0] = jnp.dot(h, pw_ref[...],
                       preferred_element_type=jnp.float32).astype(o_ref.dtype)


def _gemma_attn_kernel(x_ref, lnw_ref, wqkv_ref, wo_ref, cos_ref, sins_ref, o_ref,
                       *, heads, head_dim, eps, scale):
    # RMSNorm + fused QKV + RoPE + multi-head attention + fused out-proj + residual.
    x = x_ref[0].astype(jnp.float32)                                    # (S, D)
    h = _rmsnorm(x, lnw_ref[...], eps).astype(jnp.bfloat16)
    qkv = jnp.dot(h, wqkv_ref[...], preferred_element_type=jnp.float32)
    cos = cos_ref[0]                                                    # (S, Dh)
    sins = sins_ref[0]                                                  # sign-folded sin
    half = head_dim // 2
    hd = heads * head_dim
    outs = []
    for i in range(heads):                                              # small static loop
        q = qkv[:, i * head_dim:(i + 1) * head_dim]
        k = qkv[:, hd + i * head_dim: hd + (i + 1) * head_dim]
        v = qkv[:, 2 * hd + i * head_dim: 2 * hd + (i + 1) * head_dim]
        # rotate_half(x)*sin == roll(x, half) * (sign*sin); roll is XLU (free slot)
        q = q * cos + pltpu.roll(q, half, 1) * sins
        k = k * cos + pltpu.roll(k, half, 1) * sins
        s = jax.lax.dot_general(q.astype(jnp.bfloat16), k.astype(jnp.bfloat16),
                                (((1,), (1,)), ((), ())),
                                preferred_element_type=jnp.float32) * scale
        # Prefill-only path: PaliGemma prefill attends over the full image +
        # prompt (zero additive mask), so no bias is applied.
        p = _softmax_rows(s)
        outs.append(jnp.dot(p.astype(jnp.bfloat16), v.astype(jnp.bfloat16),
                            preferred_element_type=jnp.float32))
    o_cat = jnp.concatenate(outs, axis=-1).astype(jnp.bfloat16)         # (S, H*Dh)
    attn = jnp.dot(o_cat, wo_ref[...], preferred_element_type=jnp.float32)
    o_ref[0] = (x + attn).astype(o_ref.dtype)


def _gemma_mlp_kernel(x_ref, lnw_ref, wg_ref, wu_ref, wd_ref, fln_ref, o_ref,
                      *, eps, final_norm):
    # RMSNorm + gate/up + gelu*up + down + residual, optional final-norm epilogue.
    # TODO(synk): at real Gemma sizes tile this over t_inter (arbitrary K axis,
    # VMEM f32 accumulator) so per-step weight tiles stay <= ~4-8 MiB (v7x 64 MiB VMEM).
    x = x_ref[0].astype(jnp.float32)
    h = _rmsnorm(x, lnw_ref[...], eps).astype(jnp.bfloat16)
    g = jnp.dot(h, wg_ref[...], preferred_element_type=jnp.float32)
    u = jnp.dot(h, wu_ref[...], preferred_element_type=jnp.float32)
    m = (jax.nn.gelu(g, approximate=True) * u).astype(jnp.bfloat16)
    y = x + jnp.dot(m, wd_ref[...], preferred_element_type=jnp.float32)
    if final_norm:
        # final-model RMSNorm folded into the last layer's epilogue so lm_head
        # becomes a pure matmul over pre-normalized bf16 hiddens.
        y = _rmsnorm(y, fln_ref[...], eps)
    o_ref[0] = y.astype(o_ref.dtype)


def _lm_head_kernel(x_ref, emb_ref, o_ref):
    # Tied lm_head: pre-normalized bf16 hiddens x bf16 embedding table read in
    # its natural (vocab, D) layout, contracted on D. Lane-dense f32 logits out.
    o_ref[...] = jax.lax.dot_general(x_ref[...], emb_ref[...],
                                     (((1,), (1,)), ((), ())),
                                     preferred_element_type=jnp.float32)


def pl_lm_head(x2d, embed, *, tile_v=2048):
    N, D = x2d.shape
    V = embed.shape[0]
    tile_v = min(tile_v, V)
    assert V % tile_v == 0
    return pl.pallas_call(
        _lm_head_kernel,
        out_shape=jax.ShapeDtypeStruct((N, V), jnp.float32),
        grid=(V // tile_v,),
        in_specs=[pl.BlockSpec((N, D), lambda j: (0, 0)),
                  pl.BlockSpec((tile_v, D), lambda j: (j, 0))],
        out_specs=pl.BlockSpec((N, tile_v), lambda j: (0, j)),
        compiler_params=pltpu.CompilerParams(dimension_semantics=("parallel",)),
    )(x2d, embed)


# ----------------------------------------------------------------------------
# Model glue (index bookkeeping / im2col / RoPE tables in plain JAX)
# ----------------------------------------------------------------------------
def vision_tower(p, cfg, pixel_values):
    # NCHW input; stride==kernel patch conv done as im2col + fused matmul.
    B, C, H, W = pixel_values.shape
    ps, Dv = cfg["v_patch"], cfg["v_hidden"]
    nh, nw = H // ps, W // ps
    Np = nh * nw

    patches = pixel_values.reshape(B, C, nh, ps, nw, ps)
    patches = patches.transpose(0, 2, 4, 1, 3, 5).reshape(B, Np, C * ps * ps)
    patches = patches.astype(jnp.bfloat16)

    x = _per_batch_call(
        _patch_embed_kernel,
        jax.ShapeDtypeStruct((B, Np, Dv), jnp.bfloat16),
        (patches, p["v_patch_w"], p["v_patch_b"], p["v_pos"]),
        (True, False, False, False))

    scale = cfg["v_head_dim"] ** -0.5
    for l in range(cfg["v_layers"]):
        pr = f"v{l}_"
        x = _per_batch_call(
            functools.partial(_vit_attn_kernel, heads=cfg["v_heads"],
                              head_dim=cfg["v_head_dim"], eps=cfg["eps"],
                              scale=scale),
            jax.ShapeDtypeStruct((B, Np, Dv), jnp.bfloat16),
            (x, p[pr + "ln1_w"], p[pr + "ln1_b"], p[pr + "qkv_w"],
             p[pr + "qkv_b"], p[pr + "o_w"], p[pr + "o_b"]),
            (True,) + (False,) * 6)
        x = _per_batch_call(
            functools.partial(_vit_mlp_kernel, eps=cfg["eps"]),
            jax.ShapeDtypeStruct((B, Np, Dv), jnp.bfloat16),
            (x, p[pr + "ln2_w"], p[pr + "ln2_b"], p[pr + "fc1_w"],
             p[pr + "fc1_b"], p[pr + "fc2_w"], p[pr + "fc2_b"]),
            (True,) + (False,) * 6)

    # post_layernorm + multimodal projector (Linear, bias=False), fused
    feats = _per_batch_call(
        functools.partial(_vit_head_kernel, eps=cfg["eps"]),
        jax.ShapeDtypeStruct((B, Np, cfg["projection_dim"]), jnp.bfloat16),
        (x, p["v_post_ln_w"], p["v_post_ln_b"], p["proj_w"]),
        (True, False, False, False))
    return feats


def gemma_forward(p, cfg, x, position_ids):
    B, S, D = x.shape
    Dh = cfg["t_head_dim"]
    half = Dh // 2

    # RoPE cos / sign-folded sin tables (glue; applied inside the fused kernel)
    inv_freq = 1.0 / (cfg["rope_base"] **
                      (jnp.arange(0, Dh, 2, dtype=jnp.float32) / Dh))
    freqs = position_ids.astype(jnp.float32)[:, :, None] * inv_freq[None, None, :]
    emb = jnp.concatenate([freqs, freqs], axis=-1)                      # (B, S, Dh)
    cos = jnp.cos(emb)
    sign = jnp.where(jnp.arange(Dh) < half, -1.0, 1.0).astype(jnp.float32)
    sin_signed = jnp.sin(emb) * sign                                    # sign folded in glue

    scale = Dh ** -0.5
    for l in range(cfg["t_layers"]):
        pr = f"t{l}_"
        x = _per_batch_call(
            functools.partial(_gemma_attn_kernel, heads=cfg["t_heads"],
                              head_dim=Dh, eps=cfg["eps"], scale=scale),
            jax.ShapeDtypeStruct((B, S, D), jnp.bfloat16),
            (x, p[pr + "in_ln"], p[pr + "qkv_w"], p[pr + "o_w"], cos, sin_signed),
            (True, False, False, False, True, True))
        last = (l == cfg["t_layers"] - 1)
        x = _per_batch_call(
            functools.partial(_gemma_mlp_kernel, eps=cfg["eps"], final_norm=last),
            jax.ShapeDtypeStruct((B, S, D), jnp.bfloat16),
            (x, p[pr + "post_ln"], p[pr + "gate_w"], p[pr + "up_w"],
             p[pr + "down_w"], p["t_final_ln"]),
            (True,) + (False,) * 5)

    # tied lm_head over pre-normalized bf16 hiddens, vocab-tiled, lane-dense
    logits = pl_lm_head(x.reshape(B * S, D), p["embed"])
    return logits.reshape(B, S, -1)


def paligemma_forward(params, cfg, input_ids, pixel_values, attention_mask):
    # TODO(synk): the reference asserts torch.all(attention_mask == 1); a host
    # bool() check would block jit - surface via checkify / pl.debug_check.
    B, S = input_ids.shape
    Np = cfg["num_image_tokens"]

    # 1. language_model.get_input_embedding()(input_ids)  (gather = glue)
    input_embds = jnp.take(params["embed"], input_ids, axis=0).astype(jnp.float32)

    # 2.+3. vision tower + multimodal projector (fused into the tower's head)
    image_features = vision_tower(params, cfg, pixel_values.astype(jnp.float32))

    # 4. merge input ids with image tokens (masked_scatter equivalent).
    #    Pure index bookkeeping on lane-width-1 token ids -> left to XLA glue
    #    (fuses into a single elementwise select), not a Pallas kernel.
    image_mask = input_ids == cfg["image_token_index"]
    pad_mask = input_ids == cfg["pad_token_id"]
    gather_idx = jnp.clip(jnp.cumsum(image_mask.astype(jnp.int32), axis=-1) - 1,
                          0, Np - 1)
    image_at_pos = jnp.take_along_axis(image_features, gather_idx[:, :, None], axis=1)
    scaled_img = image_at_pos.astype(jnp.float32) * (cfg["hidden_size"] ** -0.5)
    merged = jnp.where(image_mask[:, :, None], scaled_img, input_embds)
    merged = jnp.where(pad_mask[:, :, None], 0.0, merged)
    # Gemma scales its input embeddings by sqrt(text hidden size)
    final_embedding = (merged * math.sqrt(cfg["t_hidden"])).astype(jnp.bfloat16)

    # prefill position ids (1-indexed cumsum; padded positions -> 1)
    position_ids = jnp.where(attention_mask == 0, 1,
                             jnp.cumsum(attention_mask, axis=-1)).astype(jnp.int32)

    # 5. language model (prefill: full attention, zero additive mask)
    # TODO(synk): KVCache decode path (kv_cache.num_items() > 0) not implemented.
    return gemma_forward(params, cfg, final_embedding, position_ids)


# ----------------------------------------------------------------------------
# Deterministic parameter init (synthetic, kernel-ready bf16 layouts)
# ----------------------------------------------------------------------------
def init_params(key, cfg):
    keys = iter(jax.random.split(key, 128))

    def rnd(shape, scale=0.02, dtype=jnp.bfloat16):
        return (jax.random.normal(next(keys), shape, jnp.float32) * scale).astype(dtype)

    Dv, Dt = cfg["v_hidden"], cfg["t_hidden"]
    Hv, Dhv = cfg["v_heads"], cfg["v_head_dim"]
    Ht, Dht = cfg["t_heads"], cfg["t_head_dim"]
    C, ps = cfg["v_channels"], cfg["v_patch"]
    Np = cfg["num_image_tokens"]

    p = {}
    # tied token embedding / lm_head, natural (vocab, D) layout, bf16
    p["embed"] = rnd((cfg["t_vocab"], Dt))

    # vision tower
    p["v_patch_w"] = rnd((C * ps * ps, Dv))   # Conv2d weight flattened & transposed
    p["v_patch_b"] = jnp.zeros((1, Dv), jnp.float32)
    p["v_pos"] = rnd((Np, Dv), dtype=jnp.float32)
    for l in range(cfg["v_layers"]):
        pr = f"v{l}_"
        p[pr + "ln1_w"] = jnp.ones((1, Dv), jnp.float32)
        p[pr + "ln1_b"] = jnp.zeros((1, Dv), jnp.float32)
        p[pr + "ln2_w"] = jnp.ones((1, Dv), jnp.float32)
        p[pr + "ln2_b"] = jnp.zeros((1, Dv), jnp.float32)
        p[pr + "qkv_w"] = rnd((Dv, 3 * Hv * Dhv))       # fused [Q|K|V], head-major cols
        p[pr + "qkv_b"] = jnp.zeros((1, 3 * Hv * Dhv), jnp.float32)
        p[pr + "o_w"] = rnd((Hv * Dhv, Dv))             # fused out-proj
        p[pr + "o_b"] = jnp.zeros((1, Dv), jnp.float32)
        p[pr + "fc1_w"] = rnd((Dv, cfg["v_inter"]))
        p[pr + "fc1_b"] = jnp.zeros((1, cfg["v_inter"]), jnp.float32)
        p[pr + "fc2_w"] = rnd((cfg["v_inter"], Dv))
        p[pr + "fc2_b"] = jnp.zeros((1, Dv), jnp.float32)
    p["v_post_ln_w"] = jnp.ones((1, Dv), jnp.float32)
    p["v_post_ln_b"] = jnp.zeros((1, Dv), jnp.float32)

    # PaliGemmaMultiModalProjector: Linear(vision_hidden -> projection_dim, bias=False)
    p["proj_w"] = rnd((Dv, cfg["projection_dim"]))

    # language model (Gemma-style)
    for l in range(cfg["t_layers"]):
        pr = f"t{l}_"
        p[pr + "in_ln"] = jnp.zeros((1, Dt), jnp.float32)
        p[pr + "post_ln"] = jnp.zeros((1, Dt), jnp.float32)
        p[pr + "qkv_w"] = rnd((Dt, 3 * Ht * Dht))       # fused [Q|K|V], head-major cols
        p[pr + "o_w"] = rnd((Ht * Dht, Dt))             # fused out-proj
        p[pr + "gate_w"] = rnd((Dt, cfg["t_inter"]))
        p[pr + "up_w"] = rnd((Dt, cfg["t_inter"]))
        p[pr + "down_w"] = rnd((cfg["t_inter"], Dt))
    p["t_final_ln"] = jnp.zeros((1, Dt), jnp.float32)
    return p


# ----------------------------------------------------------------------------
if __name__ == "__main__":
    key = jax.random.PRNGKey(0)
    pkey, ikey, xkey = jax.random.split(key, 3)

    params = init_params(pkey, CFG)

    B = 2
    num_img = CFG["num_image_tokens"]          # 4
    num_txt = 4
    S = num_img + num_txt                      # 8

    # prompt format: image tokens first, then text tokens (no padding)
    text_ids = jax.random.randint(ikey, (B, num_txt), 1, 500).astype(jnp.int32)
    image_ids = jnp.full((B, num_img), CFG["image_token_index"], jnp.int32)
    input_ids = jnp.concatenate([image_ids, text_ids], axis=1)           # (2, 8)
    pixel_values = jax.random.normal(
        xkey, (B, CFG["v_channels"], CFG["v_image_size"], CFG["v_image_size"]),
        jnp.float32)                                                     # (2,3,16,16) NCHW
    attention_mask = jnp.ones((B, S), jnp.int32)

    fwd = jax.jit(functools.partial(paligemma_forward, params, CFG))
    logits = fwd(input_ids, pixel_values, attention_mask)
    logits = jax.block_until_ready(logits)

    assert logits.shape == (B, S, CFG["t_vocab"]), logits.shape
    assert bool(jnp.all(jnp.isfinite(logits)))
    print("KERNEL_OK")
</pallas_src>

<mosaic_0001>
module attributes {stable_mosaic.version = 11 : i64} {
  func.func @_vit_head_kernel(%arg0: i32, %arg1: memref<1x4x128xbf16, #tpu.memory_space<vmem>>, %arg2: memref<1x128xf32, #tpu.memory_space<vmem>>, %arg3: memref<1x128xf32, #tpu.memory_space<vmem>>, %arg4: memref<128x256xbf16, #tpu.memory_space<vmem>>, %arg5: memref<1x4x256xbf16, #tpu.memory_space<vmem>>) attributes {dimension_semantics = [#tpu.dimension_semantics<parallel>], iteration_bounds = array<i64: 2>, scalar_prefetch = 0 : i64, scratch_operands = 0 : i64, tpu.core_type = #tpu.core_type<tc>, window_params = [{transform_indices = @transform_0, window_bounds = array<i64: 1, 4, 128>}, {pipeline_mode = #tpu.pipeline_mode<synchronous>, transform_indices = @transform_1, window_bounds = array<i64: 1, 128>}, {pipeline_mode = #tpu.pipeline_mode<synchronous>, transform_indices = @transform_2, window_bounds = array<i64: 1, 128>}, {pipeline_mode = #tpu.pipeline_mode<synchronous>, transform_indices = @transform_3, window_bounds = array<i64: 128, 256>}, {transform_indices = @transform_4, window_bounds = array<i64: 1, 4, 256>}]} {
    %c0 = arith.constant 0 : index
    %c0_0 = arith.constant 0 : index
    %c0_1 = arith.constant 0 : index
    %0 = vector.load %arg1[%c0, %c0_0, %c0_1] : memref<1x4x128xbf16, #tpu.memory_space<vmem>>, vector<1x4x128xbf16>
    %1 = vector.shape_cast %0 : vector<1x4x128xbf16> to vector<4x128xbf16>
    %2 = arith.extf %1 : vector<4x128xbf16> to vector<4x128xf32>
    %c0_2 = arith.constant 0 : index
    %c0_3 = arith.constant 0 : index
    %3 = vector.load %arg2[%c0_2, %c0_3] : memref<1x128xf32, #tpu.memory_space<vmem>>, vector<1x128xf32>
    %c0_4 = arith.constant 0 : index
    %c0_5 = arith.constant 0 : index
    %4 = vector.load %arg3[%c0_4, %c0_5] : memref<1x128xf32, #tpu.memory_space<vmem>>, vector<1x128xf32>
    %cst = arith.constant dense<0.000000e+00> : vector<4xf32>
    %5 = vector.multi_reduction <add>, %2, %cst [1] : vector<4x128xf32> to vector<4xf32>
    %6 = vector.shape_cast %5 : vector<4xf32> to vector<4x1xf32>
    %cst_6 = arith.constant 1.280000e+02 : f32
    %7 = vector.broadcast %cst_6 : f32 to vector<4x1xf32>
    %8 = arith.divf %6, %7 : vector<4x1xf32>
    %9 = vector.broadcast %8 : vector<4x1xf32> to vector<4x128xf32>
    %10 = arith.subf %2, %9 : vector<4x128xf32>
    %11 = vector.broadcast %8 : vector<4x1xf32> to vector<4x128xf32>
    %12 = arith.subf %2, %11 : vector<4x128xf32>
    %13 = arith.mulf %10, %12 : vector<4x128xf32>
    %cst_7 = arith.constant dense<0.000000e+00> : vector<4xf32>
    %14 = vector.multi_reduction <add>, %13, %cst_7 [1] : vector<4x128xf32> to vector<4xf32>
    %15 = vector.shape_cast %14 : vector<4xf32> to vector<4x1xf32>
    %cst_8 = arith.constant 1.280000e+02 : f32
    %16 = vector.broadcast %cst_8 : f32 to vector<4x1xf32>
    %17 = arith.divf %15, %16 : vector<4x1xf32>
    %18 = vector.broadcast %8 : vector<4x1xf32> to vector<4x128xf32>
    %19 = arith.subf %2, %18 : vector<4x128xf32>
    %cst_9 = arith.constant 9.99999997E-7 : f32
    %20 = vector.broadcast %cst_9 : f32 to vector<4x1xf32>
    %21 = arith.addf %17, %20 : vector<4x1xf32>
    %22 = math.rsqrt %21 : vector<4x1xf32>
    %23 = vector.broadcast %22 : vector<4x1xf32> to vector<4x128xf32>
    %24 = arith.mulf %19, %23 : vector<4x128xf32>
    %25 = vector.broadcast %3 : vector<1x128xf32> to vector<4x128xf32>
    %26 = arith.mulf %24, %25 : vector<4x128xf32>
    %27 = vector.broadcast %4 : vector<1x128xf32> to vector<4x128xf32>
    %28 = arith.addf %26, %27 : vector<4x128xf32>
    %29 = arith.truncf %28 : vector<4x128xf32> to vector<4x128xbf16>
    %c0_10 = arith.constant 0 : index
    %c0_11 = arith.constant 0 : index
    %30 = vector.load %arg4[%c0_10, %c0_11] : memref<128x256xbf16, #tpu.memory_space<vmem>>, vector<128x256xbf16>
    %cst_12 = arith.constant dense<0.000000e+00> : vector<4x256xf32>
    %31 = tpu.matmul %29, %30, %cst_12 {dimension_numbers = #tpu.dot_dimension_numbers<[1], [0], [0], [1], [0, 0, 1, 1], [], []>} : vector<4x128xbf16>, vector<128x256xbf16>, vector<4x256xf32> -> vector<4x256xf32>
    %32 = arith.truncf %31 : vector<4x256xf32> to vector<4x256xbf16>
    %c0_13 = arith.constant 0 : index
    %c0_14 = arith.constant 0 : index
    %c0_15 = arith.constant 0 : index
    %33 = vector.load %arg5[%c0_13, %c0_14, %c0_15] : memref<1x4x256xbf16, #tpu.memory_space<vmem>>, vector<1x4x256xbf16>
    %34 = vector.shape_cast %33 : vector<1x4x256xbf16> to vector<4x256xbf16>
    %35 = vector.shape_cast %32 : vector<4x256xbf16> to vector<1x4x256xbf16>
    tpu.vector_store %arg5[%c0_13, %c0_14, %c0_15], %35 {strides = array<i32>} : memref<1x4x256xbf16, #tpu.memory_space<vmem>>, vector<1x4x256xbf16>,
    return
  }
  func.func @transform_0(%arg0: i32) -> (i32, i32, i32) {
    %c0_i32 = arith.constant 0 : i32
    %c0_i32_0 = arith.constant 0 : i32
    %c0_i32_1 = arith.constant 0 : i32
    return %arg0, %c0_i32, %c0_i32_0 : i32, i32, i32
  }
  func.func @transform_1(%arg0: i32) -> (i32, i32) {
    %c0_i32 = arith.constant 0 : i32
    %c0_i32_0 = arith.constant 0 : i32
    %c0_i32_1 = arith.constant 0 : i32
    return %c0_i32, %c0_i32_0 : i32, i32
  }
  func.func @transform_2(%arg0: i32) -> (i32, i32) {
    %c0_i32 = arith.constant 0 : i32
    %c0_i32_0 = arith.constant 0 : i32
    %c0_i32_1 = arith.constant 0 : i32
    return %c0_i32, %c0_i32_0 : i32, i32
  }
  func.func @transform_3(%arg0: i32) -> (i32, i32) {
    %c0_i32 = arith.constant 0 : i32
    %c0_i32_0 = arith.constant 0 : i32
    %c0_i32_1 = arith.constant 0 : i32
    return %c0_i32, %c0_i32_0 : i32, i32
  }
  func.func @transform_4(%arg0: i32) -> (i32, i32, i32) {
    %c0_i32 = arith.constant 0 : i32
    %c0_i32_0 = arith.constant 0 : i32
    %c0_i32_1 = arith.constant 0 : i32
    return %arg0, %c0_i32, %c0_i32_0 : i32, i32, i32
  }
}

module attributes {stable_mosaic.version = 11 : i64} {
  func.func @_vit_mlp_kernel(%arg0: i32, %arg1: memref<1x4x128xbf16, #tpu.memory_space<vmem>>, %arg2: memref<1x128xf32, #tpu.memory_space<vmem>>, %arg3: memref<1x128xf32, #tpu.memory_space<vmem>>, %arg4: memref<128x256xbf16, #tpu.memory_space<vmem>>, %arg5: memref<1x256xf32, #tpu.memory_space<vmem>>, %arg6: memref<256x128xbf16, #tpu.memory_space<vmem>>, %arg7: memref<1x128xf32, #tpu.memory_space<vmem>>, %arg8: memref<1x4x128xbf16, #tpu.memory_space<vmem>>) attributes {dimension_semantics = [#tpu.dimension_semantics<parallel>], iteration_bounds = array<i64: 2>, scalar_prefetch = 0 : i64, scratch_operands = 0 : i64, tpu.core_type = #tpu.core_type<tc>, window_params = [{transform_indices = @transform_0, window_bounds = array<i64: 1, 4, 128>}, {pipeline_mode = #tpu.pipeline_mode<synchronous>, transform_indices = @transform_1, window_bounds = array<i64: 1, 128>}, {pipeline_mode = #tpu.pipeline_mode<synchronous>, transform_indices = @transform_2, window_bounds = array<i64: 1, 128>}, {pipeline_mode = #tpu.pipeline_mode<synchronous>, transform_indices = @transform_3, window_bounds = array<i64: 128, 256>}, {pipeline_mode = #tpu.pipeline_mode<synchronous>, transform_indices = @transform_4, window_bounds = array<i64: 1, 256>}, {pipeline_mode = #tpu.pipeline_mode<synchronous>, transform_indices = @transform_5, window_bounds = array<i64: 256, 128>}, {pipeline_mode = #tpu.pipeline_mode<synchronous>, transform_indices = @transform_6, window_bounds = array<i64: 1, 128>}, {transform_indices = @transform_7, window_bounds = array<i64: 1, 4, 128>}]} {
    %c0 = arith.constant 0 : index
    %c0_0 = arith.constant 0 : index
    %c0_1 = arith.constant 0 : index
    %0 = vector.load %arg1[%c0, %c0_0, %c0_1] : memref<1x4x128xbf16, #tpu.memory_space<vmem>>, vector<1x4x128xbf16>
    %1 = vector.shape_cast %0 : vector<1x4x128xbf16> to vector<4x128xbf16>
    %2 = arith.extf %1 : vector<4x128xbf16> to vector<4x128xf32>
    %c0_2 = arith.constant 0 : index
    %c0_3 = arith.constant 0 : index
    %3 = vector.load %arg2[%c0_2, %c0_3] : memref<1x128xf32, #tpu.memory_space<vmem>>, vector<1x128xf32>
    %c0_4 = arith.constant 0 : index
    %c0_5 = arith.constant 0 : index
    %4 = vector.load %arg3[%c0_4, %c0_5] : memref<1x128xf32, #tpu.memory_space<vmem>>, vector<1x128xf32>
    %cst = arith.constant dense<0.000000e+00> : vector<4xf32>
    %5 = vector.multi_reduction <add>, %2, %cst [1] : vector<4x128xf32> to vector<4xf32>
    %6 = vector.shape_cast %5 : vector<4xf32> to vector<4x1xf32>
    %cst_6 = arith.constant 1.280000e+02 : f32
    %7 = vector.broadcast %cst_6 : f32 to vector<4x1xf32>
    %8 = arith.divf %6, %7 : vector<4x1xf32>
    %9 = vector.broadcast %8 : vector<4x1xf32> to vector<4x128xf32>
    %10 = arith.subf %2, %9 : vector<4x128xf32>
    %11 = vector.broadcast %8 : vector<4x1xf32> to vector<4x128xf32>
    %12 = arith.subf %2, %11 : vector<4x128xf32>
    %13 = arith.mulf %10, %12 : vector<4x128xf32>
    %cst_7 = arith.constant dense<0.000000e+00> : vector<4xf32>
    %14 = vector.multi_reduction <add>, %13, %cst_7 [1] : vector<4x128xf32> to vector<4xf32>
    %15 = vector.shape_cast %14 : vector<4xf32> to vector<4x1xf32>
    %cst_8 = arith.constant 1.280000e+02 : f32
    %16 = vector.broadcast %cst_8 : f32 to vector<4x1xf32>
    %17 = arith.divf %15, %16 : vector<4x1xf32>
    %18 = vector.broadcast %8 : vector<4x1xf32> to vector<4x128xf32>
    %19 = arith.subf %2, %18 : vector<4x128xf32>
    %cst_9 = arith.constant 9.99999997E-7 : f32
    %20 = vector.broadcast %cst_9 : f32 to vector<4x1xf32>
    %21 = arith.addf %17, %20 : vector<4x1xf32>
    %22 = math.rsqrt %21 : vector<4x1xf32>
    %23 = vector.broadcast %22 : vector<4x1xf32> to vector<4x128xf32>
    %24 = arith.mulf %19, %23 : vector<4x128xf32>
    %25 = vector.broadcast %3 : vector<1x128xf32> to vector<4x128xf32>
    %26 = arith.mulf %24, %25 : vector<4x128xf32>
    %27 = vector.broadcast %4 : vector<1x128xf32> to vector<4x128xf32>
    %28 = arith.addf %26, %27 : vector<4x128xf32>
    %29 = arith.truncf %28 : vector<4x128xf32> to vector<4x128xbf16>
    %c0_10 = arith.constant 0 : index
    %c0_11 = arith.constant 0 : index
    %30 = vector.load %arg4[%c0_10, %c0_11] : memref<128x256xbf16, #tpu.memory_space<vmem>>, vector<128x256xbf16>
    %cst_12 = arith.constant dense<0.000000e+00> : vector<4x256xf32>
    %31 = tpu.matmul %29, %30, %cst_12 {dimension_numbers = #tpu.dot_dimension_numbers<[1], [0], [0], [1], [0, 0, 1, 1], [], []>} : vector<4x128xbf16>, vector<128x256xbf16>, vector<4x256xf32> -> vector<4x256xf32>
    %c0_13 = arith.constant 0 : index
    %c0_14 = arith.constant 0 : index
    %32 = vector.load %arg5[%c0_13, %c0_14] : memref<1x256xf32, #tpu.memory_space<vmem>>, vector<1x256xf32>
    %33 = vector.broadcast %32 : vector<1x256xf32> to vector<4x256xf32>
    %34 = arith.addf %31, %33 : vector<4x256xf32>
    %35 = arith.mulf %34, %34 : vector<4x256xf32>
    %36 = arith.mulf %34, %35 : vector<4x256xf32>
    %cst_15 = arith.constant 4.471500e-02 : f32
    %37 = vector.broadcast %cst_15 : f32 to vector<4x256xf32>
    %38 = arith.mulf %37, %36 : vector<4x256xf32>
    %39 = arith.addf %34, %38 : vector<4x256xf32>
    %cst_16 = arith.constant 0.797884583 : f32
    %40 = vector.broadcast %cst_16 : f32 to vector<4x256xf32>
    %41 = arith.mulf %40, %39 : vector<4x256xf32>
    %42 = math.tanh %41 : vector<4x256xf32>
    %cst_17 = arith.constant 1.000000e+00 : f32
    %43 = vector.broadcast %cst_17 : f32 to vector<4x256xf32>
    %44 = arith.addf %43, %42 : vector<4x256xf32>
    %cst_18 = arith.constant 5.000000e-01 : f32
    %45 = vector.broadcast %cst_18 : f32 to vector<4x256xf32>
    %46 = arith.mulf %45, %44 : vector<4x256xf32>
    %47 = arith.mulf %34, %46 : vector<4x256xf32>
    %48 = arith.truncf %47 : vector<4x256xf32> to vector<4x256xbf16>
    %c0_19 = arith.constant 0 : index
    %c0_20 = arith.constant 0 : index
    %49 = vector.load %arg6[%c0_19, %c0_20] : memref<256x128xbf16, #tpu.memory_space<vmem>>, vector<256x128xbf16>
    %cst_21 = arith.constant dense<0.000000e+00> : vector<4x128xf32>
    %50 = tpu.matmul %48, %49, %cst_21 {dimension_numbers = #tpu.dot_dimension_numbers<[1], [0], [0], [1], [0, 0, 1, 1], [], []>} : vector<4x256xbf16>, vector<256x128xbf16>, vector<4x128xf32> -> vector<4x128xf32>
    %c0_22 = arith.constant 0 : index
    %c0_23 = arith.constant 0 : index
    %51 = vector.load %arg7[%c0_22, %c0_23] : memref<1x128xf32, #tpu.memory_space<vmem>>, vector<1x128xf32>
    %52 = vector.broadcast %51 : vector<1x128xf32> to vector<4x128xf32>
    %53 = arith.addf %50, %52 : vector<4x128xf32>
    %54 = arith.addf %2, %53 : vector<4x128xf32>
    %55 = arith.truncf %54 : vector<4x128xf32> to vector<4x128xbf16>
    %c0_24 = arith.constant 0 : index
    %c0_25 = arith.constant 0 : index
    %c0_26 = arith.constant 0 : index
    %56 = vector.load %arg8[%c0_24, %c0_25, %c0_26] : memref<1x4x128xbf16, #tpu.memory_space<vmem>>, vector<1x4x128xbf16>
    %57 = vector.shape_cast %56 : vector<1x4x128xbf16> to vector<4x128xbf16>
    %58 = vector.shape_cast %55 : vector<4x128xbf16> to vector<1x4x128xbf16>
    tpu.vector_store %arg8[%c0_24, %c0_25, %c0_26], %58 {strides = array<i32>} : memref<1x4x128xbf16, #tpu.memory_space<vmem>>, vector<1x4x128xbf16>,
    return
  }
  func.func @transform_0(%arg0: i32) -> (i32, i32, i32) {
    %c0_i32 = arith.constant 0 : i32
    %c0_i32_0 = arith.constant 0 : i32
    %c0_i32_1 = arith.constant 0 : i32
    return %arg0, %c0_i32, %c0_i32_0 : i32, i32, i32
  }
  func.func @transform_1(%arg0: i32) -> (i32, i32) {
    %c0_i32 = arith.constant 0 : i32
    %c0_i32_0 = arith.constant 0 : i32
    %c0_i32_1 = arith.constant 0 : i32
    return %c0_i32, %c0_i32_0 : i32, i32
  }
  func.func @transform_2(%arg0: i32) -> (i32, i32) {
    %c0_i32 = arith.constant 0 : i32
    %c0_i32_0 = arith.constant 0 : i32
    %c0_i32_1 = arith.constant 0 : i32
    return %c0_i32, %c0_i32_0 : i32, i32
  }
  func.func @transform_3(%arg0: i32) -> (i32, i32) {
    %c0_i32 = arith.constant 0 : i32
    %c0_i32_0 = arith.constant 0 : i32
    %c0_i32_1 = arith.constant 0 : i32
    return %c0_i32, %c0_i32_0 : i32, i32
  }
  func.func @transform_4(%arg0: i32) -> (i32, i32) {
    %c0_i32 = arith.constant 0 : i32
    %c0_i32_0 = arith.constant 0 : i32
    %c0_i32_1 = arith.constant 0 : i32
    return %c0_i32, %c0_i32_0 : i32, i32
  }
  func.func @transform_5(%arg0: i32) -> (i32, i32) {
    %c0_i32 = arith.constant 0 : i32
    %c0_i32_0 = arith.constant 0 : i32
    %c0_i32_1 = arith.constant 0 : i32
    return %c0_i32, %c0_i32_0 : i32, i32
  }
  func.func @transform_6(%arg0: i32) -> (i32, i32) {
    %c0_i32 = arith.constant 0 : i32
    %c0_i32_0 = arith.constant 0 : i32
    %c0_i32_1 = arith.constant 0 : i32
    return %c0_i32, %c0_i32_0 : i32, i32
  }
  func.func @transform_7(%arg0: i32) -> (i32, i32, i32) {
    %c0_i32 = arith.constant 0 : i32
    %c0_i32_0 = arith.constant 0 : i32
    %c0_i32_1 = arith.constant 0 : i32
    return %arg0, %c0_i32, %c0_i32_0 : i32, i32, i32
  }
}

module attributes {stable_mosaic.version = 11 : i64} {
  func.func @_vit_attn_kernel(%arg0: i32, %arg1: memref<1x4x128xbf16, #tpu.memory_space<vmem>>, %arg2: memref<1x128xf32, #tpu.memory_space<vmem>>, %arg3: memref<1x128xf32, #tpu.memory_space<vmem>>, %arg4: memref<128x384xbf16, #tpu.memory_space<vmem>>, %arg5: memref<1x384xf32, #tpu.memory_space<vmem>>, %arg6: memref<128x128xbf16, #tpu.memory_space<vmem>>, %arg7: memref<1x128xf32, #tpu.memory_space<vmem>>, %arg8: memref<1x4x128xbf16, #tpu.memory_space<vmem>>) attributes {dimension_semantics = [#tpu.dimension_semantics<parallel>], iteration_bounds = array<i64: 2>, scalar_prefetch = 0 : i64, scratch_operands = 0 : i64, tpu.core_type = #tpu.core_type<tc>, window_params = [{transform_indices = @transform_0, window_bounds = array<i64: 1, 4, 128>}, {pipeline_mode = #tpu.pipeline_mode<synchronous>, transform_indices = @transform_1, window_bounds = array<i64: 1, 128>}, {pipeline_mode = #tpu.pipeline_mode<synchronous>, transform_indices = @transform_2, window_bounds = array<i64: 1, 128>}, {pipeline_mode = #tpu.pipeline_mode<synchronous>, transform_indices = @transform_3, window_bounds = array<i64: 128, 384>}, {pipeline_mode = #tpu.pipeline_mode<synchronous>, transform_indices = @transform_4, window_bounds = array<i64: 1, 384>}, {pipeline_mode = #tpu.pipeline_mode<synchronous>, transform_indices = @transform_5, window_bounds = array<i64: 128, 128>}, {pipeline_mode = #tpu.pipeline_mode<synchronous>, transform_indices = @transform_6, window_bounds = array<i64: 1, 128>}, {transform_indices = @transform_7, window_bounds = array<i64: 1, 4, 128>}]} {
    %c0 = arith.constant 0 : index
    %c0_0 = arith.constant 0 : index
    %c0_1 = arith.constant 0 : index
    %0 = vector.load %arg1[%c0, %c0_0, %c0_1] : memref<1x4x128xbf16, #tpu.memory_space<vmem>>, vector<1x4x128xbf16>
    %1 = vector.shape_cast %0 : vector<1x4x128xbf16> to vector<4x128xbf16>
    %2 = arith.extf %1 : vector<4x128xbf16> to vector<4x128xf32>
    %c0_2 = arith.constant 0 : index
    %c0_3 = arith.constant 0 : index
    %3 = vector.load %arg2[%c0_2, %c0_3] : memref<1x128xf32, #tpu.memory_space<vmem>>, vector<1x128xf32>
    %c0_4 = arith.constant 0 : index
    %c0_5 = arith.constant 0 : index
    %4 = vector.load %arg3[%c0_4, %c0_5] : memref<1x128xf32, #tpu.memory_space<vmem>>, vector<1x128xf32>
    %cst = arith.constant dense<0.000000e+00> : vector<4xf32>
    %5 = vector.multi_reduction <add>, %2, %cst [1] : vector<4x128xf32> to vector<4xf32>
    %6 = vector.shape_cast %5 : vector<4xf32> to vector<4x1xf32>
    %cst_6 = arith.constant 1.280000e+02 : f32
    %7 = vector.broadcast %cst_6 : f32 to vector<4x1xf32>
    %8 = arith.divf %6, %7 : vector<4x1xf32>
    %9 = vector.broadcast %8 : vector<4x1xf32> to vector<4x128xf32>
    %10 = arith.subf %2, %9 : vector<4x128xf32>
    %11 = vector.broadcast %8 : vector<4x1xf32> to vector<4x128xf32>
    %12 = arith.subf %2, %11 : vector<4x128xf32>
    %13 = arith.mulf %10, %12 : vector<4x128xf32>
    %cst_7 = arith.constant dense<0.000000e+00> : vector<4xf32>
    %14 = vector.multi_reduction <add>, %13, %cst_7 [1] : vector<4x128xf32> to vector<4xf32>
    %15 = vector.shape_cast %14 : vector<4xf32> to vector<4x1xf32>
    %cst_8 = arith.constant 1.280000e+02 : f32
    %16 = vector.broadcast %cst_8 : f32 to vector<4x1xf32>
    %17 = arith.divf %15, %16 : vector<4x1xf32>
    %18 = vector.broadcast %8 : vector<4x1xf32> to vector<4x128xf32>
    %19 = arith.subf %2, %18 : vector<4x128xf32>
    %cst_9 = arith.constant 9.99999997E-7 : f32
    %20 = vector.broadcast %cst_9 : f32 to vector<4x1xf32>
    %21 = arith.addf %17, %20 : vector<4x1xf32>
    %22 = math.rsqrt %21 : vector<4x1xf32>
    %23 = vector.broadcast %22 : vector<4x1xf32> to vector<4x128xf32>
    %24 = arith.mulf %19, %23 : vector<4x128xf32>
    %25 = vector.broadcast %3 : vector<1x128xf32> to vector<4x128xf32>
    %26 = arith.mulf %24, %25 : vector<4x128xf32>
    %27 = vector.broadcast %4 : vector<1x128xf32> to vector<4x128xf32>
    %28 = arith.addf %26, %27 : vector<4x128xf32>
    %29 = arith.truncf %28 : vector<4x128xf32> to vector<4x128xbf16>
    %c0_10 = arith.constant 0 : index
    %c0_11 = arith.constant 0 : index
    %30 = vector.load %arg4[%c0_10, %c0_11] : memref<128x384xbf16, #tpu.memory_space<vmem>>, vector<128x384xbf16>
    %cst_12 = arith.constant dense<0.000000e+00> : vector<4x384xf32>
    %31 = tpu.matmul %29, %30, %cst_12 {dimension_numbers = #tpu.dot_dimension_numbers<[1], [0], [0], [1], [0, 0, 1, 1], [], []>} : vector<4x128xbf16>, vector<128x384xbf16>, vector<4x384xf32> -> vector<4x384xf32>
    %c0_13 = arith.constant 0 : index
    %c0_14 = arith.constant 0 : index
    %32 = vector.load %arg5[%c0_13, %c0_14] : memref<1x384xf32, #tpu.memory_space<vmem>>, vector<1x384xf32>
    %33 = vector.broadcast %32 : vector<1x384xf32> to vector<4x384xf32>
    %34 = arith.addf %31, %33 : vector<4x384xf32>
    %35 = vector.extract_strided_slice %34 {offsets = [0, 0], sizes = [4, 64], strides = [1, 1]} : vector<4x384xf32> to vector<4x64xf32>
    %36 = vector.extract_strided_slice %34 {offsets = [0, 128], sizes = [4, 64], strides = [1, 1]} : vector<4x384xf32> to vector<4x64xf32>
    %37 = vector.extract_strided_slice %34 {offsets = [0, 256], sizes = [4, 64], strides = [1, 1]} : vector<4x384xf32> to vector<4x64xf32>
    %38 = arith.truncf %35 : vector<4x64xf32> to vector<4x64xbf16>
    %39 = arith.truncf %36 : vector<4x64xf32> to vector<4x64xbf16>
    %cst_15 = arith.constant dense<0.000000e+00> : vector<4x4xf32>
    %40 = tpu.matmul %38, %39, %cst_15 {dimension_numbers = #tpu.dot_dimension_numbers<[1], [1], [0], [0], [0, 0, 1, 0], [], []>} : vector<4x64xbf16>, vector<4x64xbf16>, vector<4x4xf32> -> vector<4x4xf32>
    %cst_16 = arith.constant 1.250000e-01 : f32
    %41 = vector.broadcast %cst_16 : f32 to vector<4x4xf32>
    %42 = arith.mulf %40, %41 : vector<4x4xf32>
    %cst_17 = arith.constant dense<0xFF800000> : vector<4xf32>
    %43 = vector.multi_reduction <maximumf>, %42, %cst_17 [1] : vector<4x4xf32> to vector<4xf32>
    %44 = vector.shape_cast %43 : vector<4xf32> to vector<4x1xf32>
    %45 = vector.broadcast %44 : vector<4x1xf32> to vector<4x4xf32>
    %46 = arith.subf %42, %45 : vector<4x4xf32>
    %47 = math.exp %46 : vector<4x4xf32>
    %cst_18 = arith.constant dense<0.000000e+00> : vector<4xf32>
    %48 = vector.multi_reduction <add>, %47, %cst_18 [1] : vector<4x4xf32> to vector<4xf32>
    %49 = vector.shape_cast %48 : vector<4xf32> to vector<4x1xf32>
    %50 = tpu.reciprocal %49 {approx = true} : vector<4x1xf32> -> vector<4x1xf32>
    %51 = vector.broadcast %50 : vector<4x1xf32> to vector<4x4xf32>
    %52 = arith.mulf %47, %51 : vector<4x4xf32>
    %53 = arith.truncf %52 : vector<4x4xf32> to vector<4x4xbf16>
    %54 = arith.truncf %37 : vector<4x64xf32> to vector<4x64xbf16>
    %cst_19 = arith.constant dense<0.000000e+00> : vector<4x64xf32>
    %55 = tpu.matmul %53, %54, %cst_19 {dimension_numbers = #tpu.dot_dimension_numbers<[1], [0], [0], [1], [0, 0, 1, 1], [], []>} : vector<4x4xbf16>, vector<4x64xbf16>, vector<4x64xf32> -> vector<4x64xf32>
    %56 = vector.extract_strided_slice %34 {offsets = [0, 64], sizes = [4, 64], strides = [1, 1]} : vector<4x384xf32> to vector<4x64xf32>
    %57 = vector.extract_strided_slice %34 {offsets = [0, 192], sizes = [4, 64], strides = [1, 1]} : vector<4x384xf32> to vector<4x64xf32>
    %58 = vector.extract_strided_slice %34 {offsets = [0, 320], sizes = [4, 64], strides = [1, 1]} : vector<4x384xf32> to vector<4x64xf32>
    %59 = arith.truncf %56 : vector<4x64xf32> to vector<4x64xbf16>
    %60 = arith.truncf %57 : vector<4x64xf32> to vector<4x64xbf16>
    %cst_20 = arith.constant dense<0.000000e+00> : vector<4x4xf32>
    %61 = tpu.matmul %59, %60, %cst_20 {dimension_numbers = #tpu.dot_dimension_numbers<[1], [1], [0], [0], [0, 0, 1, 0], [], []>} : vector<4x64xbf16>, vector<4x64xbf16>, vector<4x4xf32> -> vector<4x4xf32>
    %cst_21 = arith.constant 1.250000e-01 : f32
    %62 = vector.broadcast %cst_21 : f32 to vector<4x4xf32>
    %63 = arith.mulf %61, %62 : vector<4x4xf32>
    %cst_22 = arith.constant dense<0xFF800000> : vector<4xf32>
    %64 = vector.multi_reduction <maximumf>, %63, %cst_22 [1] : vector<4x4xf32> to vector<4xf32>
    %65 = vector.shape_cast %64 : vector<4xf32> to vector<4x1xf32>
    %66 = vector.broadcast %65 : vector<4x1xf32> to vector<4x4xf32>
    %67 = arith.subf %63, %66 : vector<4x4xf32>
    %68 = math.exp %67 : vector<4x4xf32>
    %cst_23 = arith.constant dense<0.000000e+00> : vector<4xf32>
    %69 = vector.multi_reduction <add>, %68, %cst_23 [1] : vector<4x4xf32> to vector<4xf32>
    %70 = vector.shape_cast %69 : vector<4xf32> to vector<4x1xf32>
    %71 = tpu.reciprocal %70 {approx = true} : vector<4x1xf32> -> vector<4x1xf32>
    %72 = vector.broadcast %71 : vector<4x1xf32> to vector<4x4xf32>
    %73 = arith.mulf %68, %72 : vector<4x4xf32>
    %74 = arith.truncf %73 : vector<4x4xf32> to vector<4x4xbf16>
    %75 = arith.truncf %58 : vector<4x64xf32> to vector<4x64xbf16>
    %cst_24 = arith.constant dense<0.000000e+00> : vector<4x64xf32>
    %76 = tpu.matmul %74, %75, %cst_24 {dimension_numbers = #tpu.dot_dimension_numbers<[1], [0], [0], [1], [0, 0, 1, 1], [], []>} : vector<4x4xbf16>, vector<4x64xbf16>, vector<4x64xf32> -> vector<4x64xf32>
    %77 = tpu.concatenate %55, %76 in 1 : vector<4x64xf32>, vector<4x64xf32> -> vector<4x128xf32>
    %78 = arith.truncf %77 : vector<4x128xf32> to vector<4x128xbf16>
    %c0_25 = arith.constant 0 : index
    %c0_26 = arith.constant 0 : index
    %79 = vector.load %arg6[%c0_25, %c0_26] : memref<128x128xbf16, #tpu.memory_space<vmem>>, vector<128x128xbf16>
    %cst_27 = arith.constant dense<0.000000e+00> : vector<4x128xf32>
    %80 = tpu.matmul %78, %79, %cst_27 {dimension_numbers = #tpu.dot_dimension_numbers<[1], [0], [0], [1], [0, 0, 1, 1], [], []>} : vector<4x128xbf16>, vector<128x128xbf16>, vector<4x128xf32> -> vector<4x128xf32>
    %c0_28 = arith.constant 0 : index
    %c0_29 = arith.constant 0 : index
    %81 = vector.load %arg7[%c0_28, %c0_29] : memref<1x128xf32, #tpu.memory_space<vmem>>, vector<1x128xf32>
    %82 = vector.broadcast %81 : vector<1x128xf32> to vector<4x128xf32>
    %83 = arith.addf %80, %82 : vector<4x128xf32>
    %84 = arith.addf %2, %83 : vector<4x128xf32>
    %85 = arith.truncf %84 : vector<4x128xf32> to vector<4x128xbf16>
    %c0_30 = arith.constant 0 : index
    %c0_31 = arith.constant 0 : index
    %c0_32 = arith.constant 0 : index
    %86 = vector.load %arg8[%c0_30, %c0_31, %c0_32] : memref<1x4x128xbf16, #tpu.memory_space<vmem>>, vector<1x4x128xbf16>
    %87 = vector.shape_cast %86 : vector<1x4x128xbf16> to vector<4x128xbf16>
    %88 = vector.shape_cast %85 : vector<4x128xbf16> to vector<1x4x128xbf16>
    tpu.vector_store %arg8[%c0_30, %c0_31, %c0_32], %88 {strides = array<i32>} : memref<1x4x128xbf16, #tpu.memory_space<vmem>>, vector<1x4x128xbf16>,
    return
  }
  func.func @transform_0(%arg0: i32) -> (i32, i32, i32) {
    %c0_i32 = arith.constant 0 : i32
    %c0_i32_0 = arith.constant 0 : i32
    %c0_i32_1 = arith.constant 0 : i32
    return %arg0, %c0_i32, %c0_i32_0 : i32, i32, i32
  }
  func.func @transform_1(%arg0: i32) -> (i32, i32) {
    %c0_i32 = arith.constant 0 : i32
    %c0_i32_0 = arith.constant 0 : i32
    %c0_i32_1 = arith.constant 0 : i32
    return %c0_i32, %c0_i32_0 : i32, i32
  }
  func.func @transform_2(%arg0: i32) -> (i32, i32) {
    %c0_i32 = arith.constant 0 : i32
    %c0_i32_0 = arith.constant 0 : i32
    %c0_i32_1 = arith.constant 0 : i32
    return %c0_i32, %c0_i32_0 : i32, i32
  }
  func.func @transform_3(%arg0: i32) -> (i32, i32) {
    %c0_i32 = arith.constant 0 : i32
    %c0_i32_0 = arith.constant 0 : i32
    %c0_i32_1 = arith.constant 0 : i32
    return %c0_i32, %c0_i32_0 : i32, i32
  }
  func.func @transform_4(%arg0: i32) -> (i32, i32) {
    %c0_i32 = arith.constant 0 : i32
    %c0_i32_0 = arith.constant 0 : i32
    %c0_i32_1 = arith.constant 0 : i32
    return %c0_i32, %c0_i32_0 : i32, i32
  }
  func.func @transform_5(%arg0: i32) -> (i32, i32) {
    %c0_i32 = arith.constant 0 : i32
    %c0_i32_0 = arith.constant 0 : i32
    %c0_i32_1 = arith.constant 0 : i32
    return %c0_i32, %c0_i32_0 : i32, i32
  }
  func.func @transform_6(%arg0: i32) -> (i32, i32) {
    %c0_i32 = arith.constant 0 : i32
    %c0_i32_0 = arith.constant 0 : i32
    %c0_i32_1 = arith.constant 0 : i32
    return %c0_i32, %c0_i32_0 : i32, i32
  }
  func.func @transform_7(%arg0: i32) -> (i32, i32, i32) {
    %c0_i32 = arith.constant 0 : i32
    %c0_i32_0 = arith.constant 0 : i32
    %c0_i32_1 = arith.constant 0 : i32
    return %arg0, %c0_i32, %c0_i32_0 : i32, i32, i32
  }
}

module attributes {stable_mosaic.version = 11 : i64} {
  func.func @_patch_embed_kernel(%arg0: i32, %arg1: memref<1x4x192xbf16, #tpu.memory_space<vmem>>, %arg2: memref<192x128xbf16, #tpu.memory_space<vmem>>, %arg3: memref<1x128xf32, #tpu.memory_space<vmem>>, %arg4: memref<4x128xf32, #tpu.memory_space<vmem>>, %arg5: memref<1x4x128xbf16, #tpu.memory_space<vmem>>) attributes {dimension_semantics = [#tpu.dimension_semantics<parallel>], iteration_bounds = array<i64: 2>, scalar_prefetch = 0 : i64, scratch_operands = 0 : i64, tpu.core_type = #tpu.core_type<tc>, window_params = [{transform_indices = @transform_0, window_bounds = array<i64: 1, 4, 192>}, {pipeline_mode = #tpu.pipeline_mode<synchronous>, transform_indices = @transform_1, window_bounds = array<i64: 192, 128>}, {pipeline_mode = #tpu.pipeline_mode<synchronous>, transform_indices = @transform_2, window_bounds = array<i64: 1, 128>}, {pipeline_mode = #tpu.pipeline_mode<synchronous>, transform_indices = @transform_3, window_bounds = array<i64: 4, 128>}, {transform_indices = @transform_4, window_bounds = array<i64: 1, 4, 128>}]} {
    %c0 = arith.constant 0 : index
    %c0_0 = arith.constant 0 : index
    %c0_1 = arith.constant 0 : index
    %0 = vector.load %arg1[%c0, %c0_0, %c0_1] : memref<1x4x192xbf16, #tpu.memory_space<vmem>>, vector<1x4x192xbf16>
    %1 = vector.shape_cast %0 : vector<1x4x192xbf16> to vector<4x192xbf16>
    %c0_2 = arith.constant 0 : index
    %c0_3 = arith.constant 0 : index
    %2 = vector.load %arg2[%c0_2, %c0_3] : memref<192x128xbf16, #tpu.memory_space<vmem>>, vector<192x128xbf16>
    %cst = arith.constant dense<0.000000e+00> : vector<4x128xf32>
    %3 = tpu.matmul %1, %2, %cst {dimension_numbers = #tpu.dot_dimension_numbers<[1], [0], [0], [1], [0, 0, 1, 1], [], []>} : vector<4x192xbf16>, vector<192x128xbf16>, vector<4x128xf32> -> vector<4x128xf32>
    %c0_4 = arith.constant 0 : index
    %c0_5 = arith.constant 0 : index
    %4 = vector.load %arg3[%c0_4, %c0_5] : memref<1x128xf32, #tpu.memory_space<vmem>>, vector<1x128xf32>
    %5 = vector.broadcast %4 : vector<1x128xf32> to vector<4x128xf32>
    %6 = arith.addf %3, %5 : vector<4x128xf32>
    %c0_6 = arith.constant 0 : index
    %c0_7 = arith.constant 0 : index
    %7 = vector.load %arg4[%c0_6, %c0_7] : memref<4x128xf32, #tpu.memory_space<vmem>>, vector<4x128xf32>
    %8 = arith.addf %6, %7 : vector<4x128xf32>
    %9 = arith.truncf %8 : vector<4x128xf32> to vector<4x128xbf16>
    %c0_8 = arith.constant 0 : index
    %c0_9 = arith.constant 0 : index
    %c0_10 = arith.constant 0 : index
    %10 = vector.load %arg5[%c0_8, %c0_9, %c0_10] : memref<1x4x128xbf16, #tpu.memory_space<vmem>>, vector<1x4x128xbf16>
    %11 = vector.shape_cast %10 : vector<1x4x128xbf16> to vector<4x128xbf16>
    %12 = vector.shape_cast %9 : vector<4x128xbf16> to vector<1x4x128xbf16>
    tpu.vector_store %arg5[%c0_8, %c0_9, %c0_10], %12 {strides = array<i32>} : memref<1x4x128xbf16, #tpu.memory_space<vmem>>, vector<1x4x128xbf16>,
    return
  }
  func.func @transform_0(%arg0: i32) -> (i32, i32, i32) {
    %c0_i32 = arith.constant 0 : i32
    %c0_i32_0 = arith.constant 0 : i32
    %c0_i32_1 = arith.constant 0 : i32
    return %arg0, %c0_i32, %c0_i32_0 : i32, i32, i32
  }
  func.func @transform_1(%arg0: i32) -> (i32, i32) {
    %c0_i32 = arith.constant 0 : i32
    %c0_i32_0 = arith.constant 0 : i32
    %c0_i32_1 = arith.constant 0 : i32
    return %c0_i32, %c0_i32_0 : i32, i32
  }
  func.func @transform_2(%arg0: i32) -> (i32, i32) {
    %c0_i32 = arith.constant 0 : i32
    %c0_i32_0 = arith.constant 0 : i32
    %c0_i32_1 = arith.constant 0 : i32
    return %c0_i32, %c0_i32_0 : i32, i32
  }
  func.func @transform_3(%arg0: i32) -> (i32, i32) {
    %c0_i32 = arith.constant 0 : i32
    %c0_i32_0 = arith.constant 0 : i32
    %c0_i32_1 = arith.constant 0 : i32
    return %c0_i32, %c0_i32_0 : i32, i32
  }
  func.func @transform_4(%arg0: i32) -> (i32, i32, i32) {
    %c0_i32 = arith.constant 0 : i32
    %c0_i32_0 = arith.constant 0 : i32
    %c0_i32_1 = arith.constant 0 : i32
    return %arg0, %c0_i32, %c0_i32_0 : i32, i32, i32
  }
}

module attributes {stable_mosaic.version = 11 : i64} {
  func.func @_gemma_attn_kernel(%arg0: i32, %arg1: memref<1x8x256xbf16, #tpu.memory_space<vmem>>, %arg2: memref<1x256xf32, #tpu.memory_space<vmem>>, %arg3: memref<256x768xbf16, #tpu.memory_space<vmem>>, %arg4: memref<256x256xbf16, #tpu.memory_space<vmem>>, %arg5: memref<1x8x128xf32, #tpu.memory_space<vmem>>, %arg6: memref<1x8x128xf32, #tpu.memory_space<vmem>>, %arg7: memref<1x8x256xbf16, #tpu.memory_space<vmem>>) attributes {dimension_semantics = [#tpu.dimension_semantics<parallel>], iteration_bounds = array<i64: 2>, scalar_prefetch = 0 : i64, scratch_operands = 0 : i64, tpu.core_type = #tpu.core_type<tc>, window_params = [{transform_indices = @transform_0, window_bounds = array<i64: 1, 8, 256>}, {pipeline_mode = #tpu.pipeline_mode<synchronous>, transform_indices = @transform_1, window_bounds = array<i64: 1, 256>}, {pipeline_mode = #tpu.pipeline_mode<synchronous>, transform_indices = @transform_2, window_bounds = array<i64: 256, 768>}, {pipeline_mode = #tpu.pipeline_mode<synchronous>, transform_indices = @transform_3, window_bounds = array<i64: 256, 256>}, {transform_indices = @transform_4, window_bounds = array<i64: 1, 8, 128>}, {transform_indices = @transform_5, window_bounds = array<i64: 1, 8, 128>}, {transform_indices = @transform_6, window_bounds = array<i64: 1, 8, 256>}]} {
    %c0 = arith.constant 0 : index
    %c0_0 = arith.constant 0 : index
    %c0_1 = arith.constant 0 : index
    %0 = vector.load %arg1[%c0, %c0_0, %c0_1] : memref<1x8x256xbf16, #tpu.memory_space<vmem>>, vector<1x8x256xbf16>
    %1 = vector.shape_cast %0 : vector<1x8x256xbf16> to vector<8x256xbf16>
    %2 = arith.extf %1 : vector<8x256xbf16> to vector<8x256xf32>
    %c0_2 = arith.constant 0 : index
    %c0_3 = arith.constant 0 : index
    %3 = vector.load %arg2[%c0_2, %c0_3] : memref<1x256xf32, #tpu.memory_space<vmem>>, vector<1x256xf32>
    %4 = arith.mulf %2, %2 : vector<8x256xf32>
    %cst = arith.constant dense<0.000000e+00> : vector<8xf32>
    %5 = vector.multi_reduction <add>, %4, %cst [1] : vector<8x256xf32> to vector<8xf32>
    %6 = vector.shape_cast %5 : vector<8xf32> to vector<8x1xf32>
    %cst_4 = arith.constant 2.560000e+02 : f32
    %7 = vector.broadcast %cst_4 : f32 to vector<8x1xf32>
    %8 = arith.divf %6, %7 : vector<8x1xf32>
    %cst_5 = arith.constant 9.99999997E-7 : f32
    %9 = vector.broadcast %cst_5 : f32 to vector<8x1xf32>
    %10 = arith.addf %8, %9 : vector<8x1xf32>
    %11 = math.rsqrt %10 : vector<8x1xf32>
    %12 = vector.broadcast %11 : vector<8x1xf32> to vector<8x256xf32>
    %13 = arith.mulf %2, %12 : vector<8x256xf32>
    %cst_6 = arith.constant 1.000000e+00 : f32
    %14 = vector.broadcast %cst_6 : f32 to vector<1x256xf32>
    %15 = arith.addf %14, %3 : vector<1x256xf32>
    %16 = vector.broadcast %15 : vector<1x256xf32> to vector<8x256xf32>
    %17 = arith.mulf %13, %16 : vector<8x256xf32>
    %18 = arith.truncf %17 : vector<8x256xf32> to vector<8x256xbf16>
    %c0_7 = arith.constant 0 : index
    %c0_8 = arith.constant 0 : index
    %19 = vector.load %arg3[%c0_7, %c0_8] : memref<256x768xbf16, #tpu.memory_space<vmem>>, vector<256x768xbf16>
    %cst_9 = arith.constant dense<0.000000e+00> : vector<8x768xf32>
    %20 = tpu.matmul %18, %19, %cst_9 {dimension_numbers = #tpu.dot_dimension_numbers<[1], [0], [0], [1], [0, 0, 1, 1], [], []>} : vector<8x256xbf16>, vector<256x768xbf16>, vector<8x768xf32> -> vector<8x768xf32>
    %c0_10 = arith.constant 0 : index
    %c0_11 = arith.constant 0 : index
    %c0_12 = arith.constant 0 : index
    %21 = vector.load %arg5[%c0_10, %c0_11, %c0_12] : memref<1x8x128xf32, #tpu.memory_space<vmem>>, vector<1x8x128xf32>
    %22 = vector.shape_cast %21 : vector<1x8x128xf32> to vector<8x128xf32>
    %c0_13 = arith.constant 0 : index
    %c0_14 = arith.constant 0 : index
    %c0_15 = arith.constant 0 : index
    %23 = vector.load %arg6[%c0_13, %c0_14, %c0_15] : memref<1x8x128xf32, #tpu.memory_space<vmem>>, vector<1x8x128xf32>
    %24 = vector.shape_cast %23 : vector<1x8x128xf32> to vector<8x128xf32>
    %25 = vector.extract_strided_slice %20 {offsets = [0, 0], sizes = [8, 128], strides = [1, 1]} : vector<8x768xf32> to vector<8x128xf32>
    %26 = vector.extract_strided_slice %20 {offsets = [0, 256], sizes = [8, 128], strides = [1, 1]} : vector<8x768xf32> to vector<8x128xf32>
    %27 = vector.extract_strided_slice %20 {offsets = [0, 512], sizes = [8, 128], strides = [1, 1]} : vector<8x768xf32> to vector<8x128xf32>
    %28 = arith.mulf %25, %22 : vector<8x128xf32>
    %c64_i32 = arith.constant 64 : i32
    %29 = tpu.dynamic_rotate %25 by %c64_i32 dim 1 : vector<8x128xf32>, i32 -> vector<8x128xf32>
    %30 = arith.mulf %29, %24 : vector<8x128xf32>
    %31 = arith.addf %28, %30 : vector<8x128xf32>
    %32 = arith.mulf %26, %22 : vector<8x128xf32>
    %c64_i32_16 = arith.constant 64 : i32
    %33 = tpu.dynamic_rotate %26 by %c64_i32_16 dim 1 : vector<8x128xf32>, i32 -> vector<8x128xf32>
    %34 = arith.mulf %33, %24 : vector<8x128xf32>
    %35 = arith.addf %32, %34 : vector<8x128xf32>
    %36 = arith.truncf %31 : vector<8x128xf32> to vector<8x128xbf16>
    %37 = arith.truncf %35 : vector<8x128xf32> to vector<8x128xbf16>
    %cst_17 = arith.constant dense<0.000000e+00> : vector<8x8xf32>
    %38 = tpu.matmul %36, %37, %cst_17 {dimension_numbers = #tpu.dot_dimension_numbers<[1], [1], [0], [0], [0, 0, 1, 0], [], []>} : vector<8x128xbf16>, vector<8x128xbf16>, vector<8x8xf32> -> vector<8x8xf32>
    %cst_18 = arith.constant 0.0883883461 : f32
    %39 = vector.broadcast %cst_18 : f32 to vector<8x8xf32>
    %40 = arith.mulf %38, %39 : vector<8x8xf32>
    %cst_19 = arith.constant dense<0xFF800000> : vector<8xf32>
    %41 = vector.multi_reduction <maximumf>, %40, %cst_19 [1] : vector<8x8xf32> to vector<8xf32>
    %42 = vector.shape_cast %41 : vector<8xf32> to vector<8x1xf32>
    %43 = vector.broadcast %42 : vector<8x1xf32> to vector<8x8xf32>
    %44 = arith.subf %40, %43 : vector<8x8xf32>
    %45 = math.exp %44 : vector<8x8xf32>
    %cst_20 = arith.constant dense<0.000000e+00> : vector<8xf32>
    %46 = vector.multi_reduction <add>, %45, %cst_20 [1] : vector<8x8xf32> to vector<8xf32>
    %47 = vector.shape_cast %46 : vector<8xf32> to vector<8x1xf32>
    %48 = tpu.reciprocal %47 {approx = true} : vector<8x1xf32> -> vector<8x1xf32>
    %49 = vector.broadcast %48 : vector<8x1xf32> to vector<8x8xf32>
    %50 = arith.mulf %45, %49 : vector<8x8xf32>
    %51 = arith.truncf %50 : vector<8x8xf32> to vector<8x8xbf16>
    %52 = arith.truncf %27 : vector<8x128xf32> to vector<8x128xbf16>
    %cst_21 = arith.constant dense<0.000000e+00> : vector<8x128xf32>
    %53 = tpu.matmul %51, %52, %cst_21 {dimension_numbers = #tpu.dot_dimension_numbers<[1], [0], [0], [1], [0, 0, 1, 1], [], []>} : vector<8x8xbf16>, vector<8x128xbf16>, vector<8x128xf32> -> vector<8x128xf32>
    %54 = vector.extract_strided_slice %20 {offsets = [0, 128], sizes = [8, 128], strides = [1, 1]} : vector<8x768xf32> to vector<8x128xf32>
    %55 = vector.extract_strided_slice %20 {offsets = [0, 384], sizes = [8, 128], strides = [1, 1]} : vector<8x768xf32> to vector<8x128xf32>
    %56 = vector.extract_strided_slice %20 {offsets = [0, 640], sizes = [8, 128], strides = [1, 1]} : vector<8x768xf32> to vector<8x128xf32>
    %57 = arith.mulf %54, %22 : vector<8x128xf32>
    %c64_i32_22 = arith.constant 64 : i32
    %58 = tpu.dynamic_rotate %54 by %c64_i32_22 dim 1 : vector<8x128xf32>, i32 -> vector<8x128xf32>
    %59 = arith.mulf %58, %24 : vector<8x128xf32>
    %60 = arith.addf %57, %59 : vector<8x128xf32>
    %61 = arith.mulf %55, %22 : vector<8x128xf32>
    %c64_i32_23 = arith.constant 64 : i32
    %62 = tpu.dynamic_rotate %55 by %c64_i32_23 dim 1 : vector<8x128xf32>, i32 -> vector<8x128xf32>
    %63 = arith.mulf %62, %24 : vector<8x128xf32>
    %64 = arith.addf %61, %63 : vector<8x128xf32>
    %65 = arith.truncf %60 : vector<8x128xf32> to vector<8x128xbf16>
    %66 = arith.truncf %64 : vector<8x128xf32> to vector<8x128xbf16>
    %cst_24 = arith.constant dense<0.000000e+00> : vector<8x8xf32>
    %67 = tpu.matmul %65, %66, %cst_24 {dimension_numbers = #tpu.dot_dimension_numbers<[1], [1], [0], [0], [0, 0, 1, 0], [], []>} : vector<8x128xbf16>, vector<8x128xbf16>, vector<8x8xf32> -> vector<8x8xf32>
    %cst_25 = arith.constant 0.0883883461 : f32
    %68 = vector.broadcast %cst_25 : f32 to vector<8x8xf32>
    %69 = arith.mulf %67, %68 : vector<8x8xf32>
    %cst_26 = arith.constant dense<0xFF800000> : vector<8xf32>
    %70 = vector.multi_reduction <maximumf>, %69, %cst_26 [1] : vector<8x8xf32> to vector<8xf32>
    %71 = vector.shape_cast %70 : vector<8xf32> to vector<8x1xf32>
    %72 = vector.broadcast %71 : vector<8x1xf32> to vector<8x8xf32>
    %73 = arith.subf %69, %72 : vector<8x8xf32>
    %74 = math.exp %73 : vector<8x8xf32>
    %cst_27 = arith.constant dense<0.000000e+00> : vector<8xf32>
    %75 = vector.multi_reduction <add>, %74, %cst_27 [1] : vector<8x8xf32> to vector<8xf32>
    %76 = vector.shape_cast %75 : vector<8xf32> to vector<8x1xf32>
    %77 = tpu.reciprocal %76 {approx = true} : vector<8x1xf32> -> vector<8x1xf32>
    %78 = vector.broadcast %77 : vector<8x1xf32> to vector<8x8xf32>
    %79 = arith.mulf %74, %78 : vector<8x8xf32>
    %80 = arith.truncf %79 : vector<8x8xf32> to vector<8x8xbf16>
    %81 = arith.truncf %56 : vector<8x128xf32> to vector<8x128xbf16>
    %cst_28 = arith.constant dense<0.000000e+00> : vector<8x128xf32>
    %82 = tpu.matmul %80, %81, %cst_28 {dimension_numbers = #tpu.dot_dimension_numbers<[1], [0], [0], [1], [0, 0, 1, 1], [], []>} : vector<8x8xbf16>, vector<8x128xbf16>, vector<8x128xf32> -> vector<8x128xf32>
    %83 = tpu.concatenate %53, %82 in 1 : vector<8x128xf32>, vector<8x128xf32> -> vector<8x256xf32>
    %84 = arith.truncf %83 : vector<8x256xf32> to vector<8x256xbf16>
    %c0_29 = arith.constant 0 : index
    %c0_30 = arith.constant 0 : index
    %85 = vector.load %arg4[%c0_29, %c0_30] : memref<256x256xbf16, #tpu.memory_space<vmem>>, vector<256x256xbf16>
    %cst_31 = arith.constant dense<0.000000e+00> : vector<8x256xf32>
    %86 = tpu.matmul %84, %85, %cst_31 {dimension_numbers = #tpu.dot_dimension_numbers<[1], [0], [0], [1], [0, 0, 1, 1], [], []>} : vector<8x256xbf16>, vector<256x256xbf16>, vector<8x256xf32> -> vector<8x256xf32>
    %87 = arith.addf %2, %86 : vector<8x256xf32>
    %88 = arith.truncf %87 : vector<8x256xf32> to vector<8x256xbf16>
    %c0_32 = arith.constant 0 : index
    %c0_33 = arith.constant 0 : index
    %c0_34 = arith.constant 0 : index
    %89 = vector.load %arg7[%c0_32, %c0_33, %c0_34] : memref<1x8x256xbf16, #tpu.memory_space<vmem>>, vector<1x8x256xbf16>
    %90 = vector.shape_cast %89 : vector<1x8x256xbf16> to vector<8x256xbf16>
    %91 = vector.shape_cast %88 : vector<8x256xbf16> to vector<1x8x256xbf16>
    tpu.vector_store %arg7[%c0_32, %c0_33, %c0_34], %91 {strides = array<i32>} : memref<1x8x256xbf16, #tpu.memory_space<vmem>>, vector<1x8x256xbf16>,
    return
  }
  func.func @transform_0(%arg0: i32) -> (i32, i32, i32) {
    %c0_i32 = arith.constant 0 : i32
    %c0_i32_0 = arith.constant 0 : i32
    %c0_i32_1 = arith.constant 0 : i32
    return %arg0, %c0_i32, %c0_i32_0 : i32, i32, i32
  }
  func.func @transform_1(%arg0: i32) -> (i32, i32) {
    %c0_i32 = arith.constant 0 : i32
    %c0_i32_0 = arith.constant 0 : i32
    %c0_i32_1 = arith.constant 0 : i32
    return %c0_i32, %c0_i32_0 : i32, i32
  }
  func.func @transform_2(%arg0: i32) -> (i32, i32) {
    %c0_i32 = arith.constant 0 : i32
    %c0_i32_0 = arith.constant 0 : i32
    %c0_i32_1 = arith.constant 0 : i32
    return %c0_i32, %c0_i32_0 : i32, i32
  }
  func.func @transform_3(%arg0: i32) -> (i32, i32) {
    %c0_i32 = arith.constant 0 : i32
    %c0_i32_0 = arith.constant 0 : i32
    %c0_i32_1 = arith.constant 0 : i32
    return %c0_i32, %c0_i32_0 : i32, i32
  }
  func.func @transform_4(%arg0: i32) -> (i32, i32, i32) {
    %c0_i32 = arith.constant 0 : i32
    %c0_i32_0 = arith.constant 0 : i32
    %c0_i32_1 = arith.constant 0 : i32
    return %arg0, %c0_i32, %c0_i32_0 : i32, i32, i32
  }
  func.func @transform_5(%arg0: i32) -> (i32, i32, i32) {
    %c0_i32 = arith.constant 0 : i32
    %c0_i32_0 = arith.constant 0 : i32
    %c0_i32_1 = arith.constant 0 : i32
    return %arg0, %c0_i32, %c0_i32_0 : i32, i32, i32
  }
  func.func @transform_6(%arg0: i32) -> (i32, i32, i32) {
    %c0_i32 = arith.constant 0 : i32
    %c0_i32_0 = arith.constant 0 : i32
    %c0_i32_1 = arith.constant 0 : i32
    return %arg0, %c0_i32, %c0_i32_0 : i32, i32, i32
  }
}

module attributes {stable_mosaic.version = 11 : i64} {
  func.func @_gemma_mlp_kernel(%arg0: i32, %arg1: memref<1x8x256xbf16, #tpu.memory_space<vmem>>, %arg2: memref<1x256xf32, #tpu.memory_space<vmem>>, %arg3: memref<256x512xbf16, #tpu.memory_space<vmem>>, %arg4: memref<256x512xbf16, #tpu.memory_space<vmem>>, %arg5: memref<512x256xbf16, #tpu.memory_space<vmem>>, %arg6: memref<1x256xf32, #tpu.memory_space<vmem>>, %arg7: memref<1x8x256xbf16, #tpu.memory_space<vmem>>) attributes {dimension_semantics = [#tpu.dimension_semantics<parallel>], iteration_bounds = array<i64: 2>, scalar_prefetch = 0 : i64, scratch_operands = 0 : i64, tpu.core_type = #tpu.core_type<tc>, window_params = [{transform_indices = @transform_0, window_bounds = array<i64: 1, 8, 256>}, {pipeline_mode = #tpu.pipeline_mode<synchronous>, transform_indices = @transform_1, window_bounds = array<i64: 1, 256>}, {pipeline_mode = #tpu.pipeline_mode<synchronous>, transform_indices = @transform_2, window_bounds = array<i64: 256, 512>}, {pipeline_mode = #tpu.pipeline_mode<synchronous>, transform_indices = @transform_3, window_bounds = array<i64: 256, 512>}, {pipeline_mode = #tpu.pipeline_mode<synchronous>, transform_indices = @transform_4, window_bounds = array<i64: 512, 256>}, {pipeline_mode = #tpu.pipeline_mode<synchronous>, transform_indices = @transform_5, window_bounds = array<i64: 1, 256>}, {transform_indices = @transform_6, window_bounds = array<i64: 1, 8, 256>}]} {
    %c0 = arith.constant 0 : index
    %c0_0 = arith.constant 0 : index
    %c0_1 = arith.constant 0 : index
    %0 = vector.load %arg1[%c0, %c0_0, %c0_1] : memref<1x8x256xbf16, #tpu.memory_space<vmem>>, vector<1x8x256xbf16>
    %1 = vector.shape_cast %0 : vector<1x8x256xbf16> to vector<8x256xbf16>
    %2 = arith.extf %1 : vector<8x256xbf16> to vector<8x256xf32>
    %c0_2 = arith.constant 0 : index
    %c0_3 = arith.constant 0 : index
    %3 = vector.load %arg2[%c0_2, %c0_3] : memref<1x256xf32, #tpu.memory_space<vmem>>, vector<1x256xf32>
    %4 = arith.mulf %2, %2 : vector<8x256xf32>
    %cst = arith.constant dense<0.000000e+00> : vector<8xf32>
    %5 = vector.multi_reduction <add>, %4, %cst [1] : vector<8x256xf32> to vector<8xf32>
    %6 = vector.shape_cast %5 : vector<8xf32> to vector<8x1xf32>
    %cst_4 = arith.constant 2.560000e+02 : f32
    %7 = vector.broadcast %cst_4 : f32 to vector<8x1xf32>
    %8 = arith.divf %6, %7 : vector<8x1xf32>
    %cst_5 = arith.constant 9.99999997E-7 : f32
    %9 = vector.broadcast %cst_5 : f32 to vector<8x1xf32>
    %10 = arith.addf %8, %9 : vector<8x1xf32>
    %11 = math.rsqrt %10 : vector<8x1xf32>
    %12 = vector.broadcast %11 : vector<8x1xf32> to vector<8x256xf32>
    %13 = arith.mulf %2, %12 : vector<8x256xf32>
    %cst_6 = arith.constant 1.000000e+00 : f32
    %14 = vector.broadcast %cst_6 : f32 to vector<1x256xf32>
    %15 = arith.addf %14, %3 : vector<1x256xf32>
    %16 = vector.broadcast %15 : vector<1x256xf32> to vector<8x256xf32>
    %17 = arith.mulf %13, %16 : vector<8x256xf32>
    %18 = arith.truncf %17 : vector<8x256xf32> to vector<8x256xbf16>
    %c0_7 = arith.constant 0 : index
    %c0_8 = arith.constant 0 : index
    %19 = vector.load %arg3[%c0_7, %c0_8] : memref<256x512xbf16, #tpu.memory_space<vmem>>, vector<256x512xbf16>
    %cst_9 = arith.constant dense<0.000000e+00> : vector<8x512xf32>
    %20 = tpu.matmul %18, %19, %cst_9 {dimension_numbers = #tpu.dot_dimension_numbers<[1], [0], [0], [1], [0, 0, 1, 1], [], []>} : vector<8x256xbf16>, vector<256x512xbf16>, vector<8x512xf32> -> vector<8x512xf32>
    %c0_10 = arith.constant 0 : index
    %c0_11 = arith.constant 0 : index
    %21 = vector.load %arg4[%c0_10, %c0_11] : memref<256x512xbf16, #tpu.memory_space<vmem>>, vector<256x512xbf16>
    %cst_12 = arith.constant dense<0.000000e+00> : vector<8x512xf32>
    %22 = tpu.matmul %18, %21, %cst_12 {dimension_numbers = #tpu.dot_dimension_numbers<[1], [0], [0], [1], [0, 0, 1, 1], [], []>} : vector<8x256xbf16>, vector<256x512xbf16>, vector<8x512xf32> -> vector<8x512xf32>
    %23 = arith.mulf %20, %20 : vector<8x512xf32>
    %24 = arith.mulf %20, %23 : vector<8x512xf32>
    %cst_13 = arith.constant 4.471500e-02 : f32
    %25 = vector.broadcast %cst_13 : f32 to vector<8x512xf32>
    %26 = arith.mulf %25, %24 : vector<8x512xf32>
    %27 = arith.addf %20, %26 : vector<8x512xf32>
    %cst_14 = arith.constant 0.797884583 : f32
    %28 = vector.broadcast %cst_14 : f32 to vector<8x512xf32>
    %29 = arith.mulf %28, %27 : vector<8x512xf32>
    %30 = math.tanh %29 : vector<8x512xf32>
    %cst_15 = arith.constant 1.000000e+00 : f32
    %31 = vector.broadcast %cst_15 : f32 to vector<8x512xf32>
    %32 = arith.addf %31, %30 : vector<8x512xf32>
    %cst_16 = arith.constant 5.000000e-01 : f32
    %33 = vector.broadcast %cst_16 : f32 to vector<8x512xf32>
    %34 = arith.mulf %33, %32 : vector<8x512xf32>
    %35 = arith.mulf %20, %34 : vector<8x512xf32>
    %36 = arith.mulf %35, %22 : vector<8x512xf32>
    %37 = arith.truncf %36 : vector<8x512xf32> to vector<8x512xbf16>
    %c0_17 = arith.constant 0 : index
    %c0_18 = arith.constant 0 : index
    %38 = vector.load %arg5[%c0_17, %c0_18] : memref<512x256xbf16, #tpu.memory_space<vmem>>, vector<512x256xbf16>
    %cst_19 = arith.constant dense<0.000000e+00> : vector<8x256xf32>
    %39 = tpu.matmul %37, %38, %cst_19 {dimension_numbers = #tpu.dot_dimension_numbers<[1], [0], [0], [1], [0, 0, 1, 1], [], []>} : vector<8x512xbf16>, vector<512x256xbf16>, vector<8x256xf32> -> vector<8x256xf32>
    %40 = arith.addf %2, %39 : vector<8x256xf32>
    %41 = arith.truncf %40 : vector<8x256xf32> to vector<8x256xbf16>
    %c0_20 = arith.constant 0 : index
    %c0_21 = arith.constant 0 : index
    %c0_22 = arith.constant 0 : index
    %42 = vector.load %arg7[%c0_20, %c0_21, %c0_22] : memref<1x8x256xbf16, #tpu.memory_space<vmem>>, vector<1x8x256xbf16>
    %43 = vector.shape_cast %42 : vector<1x8x256xbf16> to vector<8x256xbf16>
    %44 = vector.shape_cast %41 : vector<8x256xbf16> to vector<1x8x256xbf16>
    tpu.vector_store %arg7[%c0_20, %c0_21, %c0_22], %44 {strides = array<i32>} : memref<1x8x256xbf16, #tpu.memory_space<vmem>>, vector<1x8x256xbf16>,
    return
  }
  func.func @transform_0(%arg0: i32) -> (i32, i32, i32) {
    %c0_i32 = arith.constant 0 : i32
    %c0_i32_0 = arith.constant 0 : i32
    %c0_i32_1 = arith.constant 0 : i32
    return %arg0, %c0_i32, %c0_i32_0 : i32, i32, i32
  }
  func.func @transform_1(%arg0: i32) -> (i32, i32) {
    %c0_i32 = arith.constant 0 : i32
    %c0_i32_0 = arith.constant 0 : i32
    %c0_i32_1 = arith.constant 0 : i32
    return %c0_i32, %c0_i32_0 : i32, i32
  }
  func.func @transform_2(%arg0: i32) -> (i32, i32) {
    %c0_i32 = arith.constant 0 : i32
    %c0_i32_0 = arith.constant 0 : i32
    %c0_i32_1 = arith.constant 0 : i32
    return %c0_i32, %c0_i32_0 : i32, i32
  }
  func.func @transform_3(%arg0: i32) -> (i32, i32) {
    %c0_i32 = arith.constant 0 : i32
    %c0_i32_0 = arith.constant 0 : i32
    %c0_i32_1 = arith.constant 0 : i32
    return %c0_i32, %c0_i32_0 : i32, i32
  }
  func.func @transform_4(%arg0: i32) -> (i32, i32) {
    %c0_i32 = arith.constant 0 : i32
    %c0_i32_0 = arith.constant 0 : i32
    %c0_i32_1 = arith.constant 0 : i32
    return %c0_i32, %c0_i32_0 : i32, i32
  }
  func.func @transform_5(%arg0: i32) -> (i32, i32) {
    %c0_i32 = arith.constant 0 : i32
    %c0_i32_0 = arith.constant 0 : i32
    %c0_i32_1 = arith.constant 0 : i32
    return %c0_i32, %c0_i32_0 : i32, i32
  }
  func.func @transform_6(%arg0: i32) -> (i32, i32, i32) {
    %c0_i32 = arith.constant 0 : i32
    %c0_i32_0 = arith.constant 0 : i32
    %c0_i32_1 = arith.constant 0 : i32
    return %arg0, %c0_i32, %c0_i32_0 : i32, i32, i32
  }
}

module attributes {stable_mosaic.version = 11 : i64} {
  func.func @_gemma_mlp_kernel(%arg0: i32, %arg1: memref<1x8x256xbf16, #tpu.memory_space<vmem>>, %arg2: memref<1x256xf32, #tpu.memory_space<vmem>>, %arg3: memref<256x512xbf16, #tpu.memory_space<vmem>>, %arg4: memref<256x512xbf16, #tpu.memory_space<vmem>>, %arg5: memref<512x256xbf16, #tpu.memory_space<vmem>>, %arg6: memref<1x256xf32, #tpu.memory_space<vmem>>, %arg7: memref<1x8x256xbf16, #tpu.memory_space<vmem>>) attributes {dimension_semantics = [#tpu.dimension_semantics<parallel>], iteration_bounds = array<i64: 2>, scalar_prefetch = 0 : i64, scratch_operands = 0 : i64, tpu.core_type = #tpu.core_type<tc>, window_params = [{transform_indices = @transform_0, window_bounds = array<i64: 1, 8, 256>}, {pipeline_mode = #tpu.pipeline_mode<synchronous>, transform_indices = @transform_1, window_bounds = array<i64: 1, 256>}, {pipeline_mode = #tpu.pipeline_mode<synchronous>, transform_indices = @transform_2, window_bounds = array<i64: 256, 512>}, {pipeline_mode = #tpu.pipeline_mode<synchronous>, transform_indices = @transform_3, window_bounds = array<i64: 256, 512>}, {pipeline_mode = #tpu.pipeline_mode<synchronous>, transform_indices = @transform_4, window_bounds = array<i64: 512, 256>}, {pipeline_mode = #tpu.pipeline_mode<synchronous>, transform_indices = @transform_5, window_bounds = array<i64: 1, 256>}, {transform_indices = @transform_6, window_bounds = array<i64: 1, 8, 256>}]} {
    %c0 = arith.constant 0 : index
    %c0_0 = arith.constant 0 : index
    %c0_1 = arith.constant 0 : index
    %0 = vector.load %arg1[%c0, %c0_0, %c0_1] : memref<1x8x256xbf16, #tpu.memory_space<vmem>>, vector<1x8x256xbf16>
    %1 = vector.shape_cast %0 : vector<1x8x256xbf16> to vector<8x256xbf16>
    %2 = arith.extf %1 : vector<8x256xbf16> to vector<8x256xf32>
    %c0_2 = arith.constant 0 : index
    %c0_3 = arith.constant 0 : index
    %3 = vector.load %arg2[%c0_2, %c0_3] : memref<1x256xf32, #tpu.memory_space<vmem>>, vector<1x256xf32>
    %4 = arith.mulf %2, %2 : vector<8x256xf32>
    %cst = arith.constant dense<0.000000e+00> : vector<8xf32>
    %5 = vector.multi_reduction <add>, %4, %cst [1] : vector<8x256xf32> to vector<8xf32>
    %6 = vector.shape_cast %5 : vector<8xf32> to vector<8x1xf32>
    %cst_4 = arith.constant 2.560000e+02 : f32
    %7 = vector.broadcast %cst_4 : f32 to vector<8x1xf32>
    %8 = arith.divf %6, %7 : vector<8x1xf32>
    %cst_5 = arith.constant 9.99999997E-7 : f32
    %9 = vector.broadcast %cst_5 : f32 to vector<8x1xf32>
    %10 = arith.addf %8, %9 : vector<8x1xf32>
    %11 = math.rsqrt %10 : vector<8x1xf32>
    %12 = vector.broadcast %11 : vector<8x1xf32> to vector<8x256xf32>
    %13 = arith.mulf %2, %12 : vector<8x256xf32>
    %cst_6 = arith.constant 1.000000e+00 : f32
    %14 = vector.broadcast %cst_6 : f32 to vector<1x256xf32>
    %15 = arith.addf %14, %3 : vector<1x256xf32>
    %16 = vector.broadcast %15 : vector<1x256xf32> to vector<8x256xf32>
    %17 = arith.mulf %13, %16 : vector<8x256xf32>
    %18 = arith.truncf %17 : vector<8x256xf32> to vector<8x256xbf16>
    %c0_7 = arith.constant 0 : index
    %c0_8 = arith.constant 0 : index
    %19 = vector.load %arg3[%c0_7, %c0_8] : memref<256x512xbf16, #tpu.memory_space<vmem>>, vector<256x512xbf16>
    %cst_9 = arith.constant dense<0.000000e+00> : vector<8x512xf32>
    %20 = tpu.matmul %18, %19, %cst_9 {dimension_numbers = #tpu.dot_dimension_numbers<[1], [0], [0], [1], [0, 0, 1, 1], [], []>} : vector<8x256xbf16>, vector<256x512xbf16>, vector<8x512xf32> -> vector<8x512xf32>
    %c0_10 = arith.constant 0 : index
    %c0_11 = arith.constant 0 : index
    %21 = vector.load %arg4[%c0_10, %c0_11] : memref<256x512xbf16, #tpu.memory_space<vmem>>, vector<256x512xbf16>
    %cst_12 = arith.constant dense<0.000000e+00> : vector<8x512xf32>
    %22 = tpu.matmul %18, %21, %cst_12 {dimension_numbers = #tpu.dot_dimension_numbers<[1], [0], [0], [1], [0, 0, 1, 1], [], []>} : vector<8x256xbf16>, vector<256x512xbf16>, vector<8x512xf32> -> vector<8x512xf32>
    %23 = arith.mulf %20, %20 : vector<8x512xf32>
    %24 = arith.mulf %20, %23 : vector<8x512xf32>
    %cst_13 = arith.constant 4.471500e-02 : f32
    %25 = vector.broadcast %cst_13 : f32 to vector<8x512xf32>
    %26 = arith.mulf %25, %24 : vector<8x512xf32>
    %27 = arith.addf %20, %26 : vector<8x512xf32>
    %cst_14 = arith.constant 0.797884583 : f32
    %28 = vector.broadcast %cst_14 : f32 to vector<8x512xf32>
    %29 = arith.mulf %28, %27 : vector<8x512xf32>
    %30 = math.tanh %29 : vector<8x512xf32>
    %cst_15 = arith.constant 1.000000e+00 : f32
    %31 = vector.broadcast %cst_15 : f32 to vector<8x512xf32>
    %32 = arith.addf %31, %30 : vector<8x512xf32>
    %cst_16 = arith.constant 5.000000e-01 : f32
    %33 = vector.broadcast %cst_16 : f32 to vector<8x512xf32>
    %34 = arith.mulf %33, %32 : vector<8x512xf32>
    %35 = arith.mulf %20, %34 : vector<8x512xf32>
    %36 = arith.mulf %35, %22 : vector<8x512xf32>
    %37 = arith.truncf %36 : vector<8x512xf32> to vector<8x512xbf16>
    %c0_17 = arith.constant 0 : index
    %c0_18 = arith.constant 0 : index
    %38 = vector.load %arg5[%c0_17, %c0_18] : memref<512x256xbf16, #tpu.memory_space<vmem>>, vector<512x256xbf16>
    %cst_19 = arith.constant dense<0.000000e+00> : vector<8x256xf32>
    %39 = tpu.matmul %37, %38, %cst_19 {dimension_numbers = #tpu.dot_dimension_numbers<[1], [0], [0], [1], [0, 0, 1, 1], [], []>} : vector<8x512xbf16>, vector<512x256xbf16>, vector<8x256xf32> -> vector<8x256xf32>
    %40 = arith.addf %2, %39 : vector<8x256xf32>
    %c0_20 = arith.constant 0 : index
    %c0_21 = arith.constant 0 : index
    %41 = vector.load %arg6[%c0_20, %c0_21] : memref<1x256xf32, #tpu.memory_space<vmem>>, vector<1x256xf32>
    %42 = arith.mulf %40, %40 : vector<8x256xf32>
    %cst_22 = arith.constant dense<0.000000e+00> : vector<8xf32>
    %43 = vector.multi_reduction <add>, %42, %cst_22 [1] : vector<8x256xf32> to vector<8xf32>
    %44 = vector.shape_cast %43 : vector<8xf32> to vector<8x1xf32>
    %cst_23 = arith.constant 2.560000e+02 : f32
    %45 = vector.broadcast %cst_23 : f32 to vector<8x1xf32>
    %46 = arith.divf %44, %45 : vector<8x1xf32>
    %cst_24 = arith.constant 9.99999997E-7 : f32
    %47 = vector.broadcast %cst_24 : f32 to vector<8x1xf32>
    %48 = arith.addf %46, %47 : vector<8x1xf32>
    %49 = math.rsqrt %48 : vector<8x1xf32>
    %50 = vector.broadcast %49 : vector<8x1xf32> to vector<8x256xf32>
    %51 = arith.mulf %40, %50 : vector<8x256xf32>
    %cst_25 = arith.constant 1.000000e+00 : f32
    %52 = vector.broadcast %cst_25 : f32 to vector<1x256xf32>
    %53 = arith.addf %52, %41 : vector<1x256xf32>
    %54 = vector.broadcast %53 : vector<1x256xf32> to vector<8x256xf32>
    %55 = arith.mulf %51, %54 : vector<8x256xf32>
    %56 = arith.truncf %55 : vector<8x256xf32> to vector<8x256xbf16>
    %c0_26 = arith.constant 0 : index
    %c0_27 = arith.constant 0 : index
    %c0_28 = arith.constant 0 : index
    %57 = vector.load %arg7[%c0_26, %c0_27, %c0_28] : memref<1x8x256xbf16, #tpu.memory_space<vmem>>, vector<1x8x256xbf16>
    %58 = vector.shape_cast %57 : vector<1x8x256xbf16> to vector<8x256xbf16>
    %59 = vector.shape_cast %56 : vector<8x256xbf16> to vector<1x8x256xbf16>
    tpu.vector_store %arg7[%c0_26, %c0_27, %c0_28], %59 {strides = array<i32>} : memref<1x8x256xbf16, #tpu.memory_space<vmem>>, vector<1x8x256xbf16>,
    return
  }
  func.func @transform_0(%arg0: i32) -> (i32, i32, i32) {
    %c0_i32 = arith.constant 0 : i32
    %c0_i32_0 = arith.constant 0 : i32
    %c0_i32_1 = arith.constant 0 : i32
    return %arg0, %c0_i32, %c0_i32_0 : i32, i32, i32
  }
  func.func @transform_1(%arg0: i32) -> (i32, i32) {
    %c0_i32 = arith.constant 0 : i32
    %c0_i32_0 = arith.constant 0 : i32
    %c0_i32_1 = arith.constant 0 : i32
    return %c0_i32, %c0_i32_0 : i32, i32
  }
  func.func @transform_2(%arg0: i32) -> (i32, i32) {
    %c0_i32 = arith.constant 0 : i32
    %c0_i32_0 = arith.constant 0 : i32
    %c0_i32_1 = arith.constant 0 : i32
    return %c0_i32, %c0_i32_0 : i32, i32
  }
  func.func @transform_3(%arg0: i32) -> (i32, i32) {
    %c0_i32 = arith.constant 0 : i32
    %c0_i32_0 = arith.constant 0 : i32
    %c0_i32_1 = arith.constant 0 : i32
    return %c0_i32, %c0_i32_0 : i32, i32
  }
  func.func @transform_4(%arg0: i32) -> (i32, i32) {
    %c0_i32 = arith.constant 0 : i32
    %c0_i32_0 = arith.constant 0 : i32
    %c0_i32_1 = arith.constant 0 : i32
    return %c0_i32, %c0_i32_0 : i32, i32
  }
  func.func @transform_5(%arg0: i32) -> (i32, i32) {
    %c0_i32 = arith.constant 0 : i32
    %c0_i32_0 = arith.constant 0 : i32
    %c0_i32_1 = arith.constant 0 : i32
    return %c0_i32, %c0_i32_0 : i32, i32
  }
  func.func @transform_6(%arg0: i32) -> (i32, i32, i32) {
    %c0_i32 = arith.constant 0 : i32
    %c0_i32_0 = arith.constant 0 : i32
    %c0_i32_1 = arith.constant 0 : i32
    return %arg0, %c0_i32, %c0_i32_0 : i32, i32, i32
  }
}

module attributes {stable_mosaic.version = 11 : i64} {
  func.func @_lm_head_kernel(%arg0: i32, %arg1: memref<16x256xbf16, #tpu.memory_space<vmem>>, %arg2: memref<512x256xbf16, #tpu.memory_space<vmem>>, %arg3: memref<16x512xf32, #tpu.memory_space<vmem>>) attributes {dimension_semantics = [#tpu.dimension_semantics<parallel>], iteration_bounds = array<i64: 1>, scalar_prefetch = 0 : i64, scratch_operands = 0 : i64, tpu.core_type = #tpu.core_type<tc>, window_params = [{pipeline_mode = #tpu.pipeline_mode<synchronous>, transform_indices = @transform_0, window_bounds = array<i64: 16, 256>}, {transform_indices = @transform_1, window_bounds = array<i64: 512, 256>}, {transform_indices = @transform_2, window_bounds = array<i64: 16, 512>}]} {
    %c0 = arith.constant 0 : index
    %c0_0 = arith.constant 0 : index
    %0 = vector.load %arg1[%c0, %c0_0] : memref<16x256xbf16, #tpu.memory_space<vmem>>, vector<16x256xbf16>
    %c0_1 = arith.constant 0 : index
    %c0_2 = arith.constant 0 : index
    %1 = vector.load %arg2[%c0_1, %c0_2] : memref<512x256xbf16, #tpu.memory_space<vmem>>, vector<512x256xbf16>
    %cst = arith.constant dense<0.000000e+00> : vector<16x512xf32>
    %2 = tpu.matmul %0, %1, %cst {dimension_numbers = #tpu.dot_dimension_numbers<[1], [1], [0], [0], [0, 0, 1, 0], [], []>} : vector<16x256xbf16>, vector<512x256xbf16>, vector<16x512xf32> -> vector<16x512xf32>
    %c0_3 = arith.constant 0 : index
    %c0_4 = arith.constant 0 : index
    %3 = vector.load %arg3[%c0_3, %c0_4] : memref<16x512xf32, #tpu.memory_space<vmem>>, vector<16x512xf32>
    tpu.vector_store %arg3[%c0_3, %c0_4], %2 {strides = array<i32>} : memref<16x512xf32, #tpu.memory_space<vmem>>, vector<16x512xf32>,
    return
  }
  func.func @transform_0(%arg0: i32) -> (i32, i32) {
    %c0_i32 = arith.constant 0 : i32
    %c0_i32_0 = arith.constant 0 : i32
    %c0_i32_1 = arith.constant 0 : i32
    return %c0_i32, %c0_i32_0 : i32, i32
  }
  func.func @transform_1(%arg0: i32) -> (i32, i32) {
    %c0_i32 = arith.constant 0 : i32
    %c0_i32_0 = arith.constant 0 : i32
    return %arg0, %c0_i32 : i32, i32
  }
  func.func @transform_2(%arg0: i32) -> (i32, i32) {
    %c0_i32 = arith.constant 0 : i32
    %c0_i32_0 = arith.constant 0 : i32
    return %c0_i32, %arg0 : i32, i32
  }
}

</mosaic_0001>

<bundles_post_ra>
// kernel: paligemma_forward.16
= control target key start
LH: loop header
LB: loop body
LE: loop exit
PB: predicated region body
PF: predicated region fallthrough
CT: control target
= control target key end

     0   :  { %s536_s15 = smov 0   ;;  %s613_s0 = inlined_call_operand.vmem [shape: bf16[2,4,128], index: 0, kind: input, shape index: {}]   ;;  %s614_s1 = inlined_call_operand.vmem [shape: f32[1,128], index: 1, kind: input, shape index: {}]   ;;  %s615_s2 = inlined_call_operand.vmem [shape: f32[1,128], index: 2, kind: input, shape index: {}]   ;;  %s616_s3 = inlined_call_operand.vmem [shape: bf16[128,256], index: 3, kind: input, shape index: {}]   ;;  %s617_s4 = inlined_call_operand.vmem [shape: bf16[2,4,256], index: 4, kind: output, shape index: {}]  }
   0x1 LB: > { %s436_s16 = sadd.s32 4294967295, %s508_s15   ;;  %p440_p0 = scmp.ge.s32.totalorder %s508_s15, 1  ;;  %s508_s15 = sphi %s536_s15, %s14_s15  }
   0x2   : > { %p161_p1 = scmp.lt.s32.totalorder %s508_s15, 3 }
   0x4   : > { %p162_p2 = pnand %p440_p0, %p161_p1 }
   0x5   : > { %p186_p3 = scmp.lt.s32.totalorder (!%p162_p2), %s436_s16, 1  ;;  %vm200_vm0 = vcmask (!%p162_p2), 1043456   ;;  %v476_v3 = vld [vmem:[%s616_s3 + $0x4] ss:$8 sps:$4 sm:$0xff] (!%p162_p2)   ;;  %v478_v4 = vld [vmem:[%s616_s3] ss:$8 sps:$4 sm:$0xff] (!%p162_p2)  }
   0x6   : > { %165 = sbr.rel (%p162_p2) target bundleno = 550 (0x226), region = 36  ;;  %v479_v5 = vld [vmem:[%s616_s3 + $0x14] ss:$8 sps:$4 sm:$0xff] (!%p162_p2)   ;;  %326 = vmatprep.subr.bf16.mxu0 (!%p162_p2), %v476_v3  ;;  %v481_v6 = vld [vmem:[%s616_s3 + $0x10] ss:$8 sps:$4 sm:$0xff] (!%p162_p2)   ;;  %v510_v19 = vmov (!%p162_p2), 0  }
   0x7   : > { %327 = vmatpush1.bf16.msra.mxu0 (!%p162_p2), %v478_v4  ;;  %v482_v7 = vld [vmem:[%s616_s3 + $0x24] ss:$8 sps:$4 sm:$0xff] (!%p162_p2)   ;;  %v484_v13 = vld [vmem:[%s616_s3 + $0x20] ss:$8 sps:$4 sm:$0xff] (!%p162_p2)   ;;  %v485_v14 = vld [vmem:[%s616_s3 + $0x34] ss:$8 sps:$4 sm:$0xff] (!%p162_p2)   ;;  %358 = vmatprep.mubr.bf16.mxu0 (!%p162_p2), %v510_v19 }
   0x8   : > { %328 = vmatprep.subr.bf16.mxu0 (!%p162_p2), %v479_v5  ;;  %v487_v15 = vld [vmem:[%s616_s3 + $0x30] ss:$8 sps:$4 sm:$0xff] (!%p162_p2)   ;;  %v488_v16 = vld [vmem:[%s616_s3 + $0x44] ss:$8 sps:$4 sm:$0xff] (!%p162_p2)   ;;  %v490_v17 = vld [vmem:[%s616_s3 + $0x40] ss:$8 sps:$4 sm:$0xff] (!%p162_p2)  }
   0x9   : > { %v491_v18 = vld [vmem:[%s616_s3 + $0x54] ss:$8 sps:$4 sm:$0xff] (!%p162_p2)   ;;  %v493_v20 = vld [vmem:[%s616_s3 + $0x50] ss:$8 sps:$4 sm:$0xff] (!%p162_p2)   ;;  %v494_v21 = vld [vmem:[%s616_s3 + $0x64] ss:$8 sps:$4 sm:$0xff] (!%p162_p2)  }
   0xa   : > { %v496_v22 = vld [vmem:[%s616_s3 + $0x60] ss:$8 sps:$4 sm:$0xff] (!%p162_p2)   ;;  %v497_v23 = vld [vmem:[%s616_s3 + $0x74] ss:$8 sps:$4 sm:$0xff] (!%p162_p2)   ;;  %v499_v24 = vld [vmem:[%s616_s3 + $0x70] ss:$8 sps:$4 sm:$0xff] (!%p162_p2)  }
   0xb   : > { %329 = vmatpush1.bf16.msra.mxu0 (!%p162_p2), %v481_v6  ;;  %v444_v29 = vld [vmem:[%s614_s1] ss:$0 sm:$0xff] (!%p162_p2) }
   0xc   : > { %330 = vmatprep.subr.bf16.mxu0 (!%p162_p2), %v482_v7  ;;  %v445_v31 = vld [vmem:[%s615_s2] ss:$0 sm:$0xff] (!%p162_p2) }
   0xd   : > { %s619_s16 = smov (!%p186_p3, %s436_s16), 1 }
   0xe   : > { %s441_s17 = sshll.u32 %s619_s16, 1  ;;  %s466_s7 = sshll.u32 %s619_s16, 2 }
   0xf   : > { %s189_s20 = scalar_lea.vmem %s613_s0, %s441_s17  ;;  %331 = vmatpush1.bf16.msra.mxu0 %v484_v13  ;;  %s194_s10 = scalar_lea.vmem %s617_s4, %s466_s7 }
  0x10   : > { %v196_v0 = vld [vmem:[%s189_s20] sm:$0x3]  ;;  %332 = vmatprep.subr.bf16.mxu0 %v485_v14 }
  0x11   : > { %v197_v1 = vunpack.c.l.bf16 %v196_v0 }
  0x13   : > { %v201_v2 = vsel %vm200_vm0, %v197_v1, 0.0  ;;  %333 = vmatpush1.bf16.msra.mxu0 %v487_v15 }
  0x14   : > { %202 = vadd.xlane.f32.xlu0 %v201_v2  ;;  %334 = vmatprep.subr.bf16.mxu0 %v488_v16 }
  0x17   : > { %335 = vmatpush1.bf16.msra.mxu0 %v490_v17 }
  0x18   : > { %336 = vmatprep.subr.bf16.mxu0 %v491_v18 }
  0x1b   : > { %337 = vmatpush1.bf16.msra.mxu0 %v493_v20 }
  0x1c   : > { %338 = vmatprep.subr.bf16.mxu0 %v494_v21 }
  0x1f   : > { %339 = vmatpush1.bf16.msra.mxu0 %v496_v22 }
  0x20   : > { %340 = vmatprep.subr.bf16.mxu0 %v497_v23 }
  0x23   : > { %341 = vmatpush1.bf16.msra.mxu0 %v499_v24 }
  0xa1   : > { %v203_v8 = vpop.xlane.xlu0 %202 }
  0xa2   : > { %v205_v9 = vmul.f32 0.0078125, %v203_v8 }
  0xa4   : > { %v206_v10 = vsub.f32 %v197_v1, %v205_v9 }
  0xa6   : > { %v207_v11 = vmul.f32 %v206_v10, %v206_v10 }
  0xa8   : > { %v208_v12 = vsel %vm200_vm0, %v207_v11, 0.0 }
  0xa9   : > { %209 = vadd.xlane.f32.xlu0 %v208_v12 }
 0x136   : > { %v210_v25 = vpop.xlane.xlu0 %209 }
 0x137   : > { %v211_v26 = vmul.f32 0.0078125, %v210_v25 }
 0x139   : > { %v212_v27 = vadd.f32 1e-06, %v211_v26 }
 0x13b   : > { %500 = vrsqrt.f32 %v212_v27 }
 0x145   : > { %v501_v28 = vpop.eup %500 }
 0x146   : > { %v214_v30 = vmul.f32 %v501_v28, %v206_v10 }
 0x148   : > { %v221_v32 = vmul.f32 %v444_v29, %v214_v30 }
 0x14a   : > { %v228_v33 = vadd.f32 %v445_v31, %v221_v32 }
 0x14c   : > { %v229_v34 = vpack.c.bf16 %v228_v33, %v228_v33 }
 0x14e   : > { %359 = vmatmul.mubr.bf16.vlgmr.msra.gmra.mrb[0].mxu0 %v229_v34 }
 0x221   : > { %v360_v35 = vpop.f32.mrb[0].mxu0 }
 0x222   : > { %v362_v36 = vpop.f32.mrb[1].mxu0 }
 0x223   : > { %v462_v37 = vpack.c.bf16 %v362_v36, %v360_v35  ;;  %v364_v38 = vpop.f32.mrb[2].mxu0 }
 0x224   : > { %v365_v39 = vpop.f32.mrb[3].mxu0 }
 0x225   : > { %463 = vst.sshfl [vmem:[%s194_s10] sm:$0x33 pattern:$0x76325410] %v462_v37 }
 0x226 PF: > { %s14_s15 = sadd.s32 1, %s508_s15  }
 0x227   : > { %p11_p4 = scmp.ge.s32.totalorder %s14_s15, 4  }
 0x229   :  { %13 = sbr.rel (!%p11_p4) target bundleno = 1 (0x1), region = 66 }

// kernel: paligemma_forward.11
= control target key start
LH: loop header
LB: loop body
LE: loop exit
PB: predicated region body
PF: predicated region fallthrough
CT: control target
= control target key end

     0   :  { %s493_s15 = smov 0   ;;  %s556_s0 = inlined_call_operand.vmem [shape: bf16[2,4,192], index: 0, kind: input, shape index: {}]   ;;  %s557_s1 = inlined_call_operand.vmem [shape: bf16[192,128], index: 1, kind: input, shape index: {}]   ;;  %s558_s2 = inlined_call_operand.vmem [shape: f32[1,128], index: 2, kind: input, shape index: {}]   ;;  %s559_s3 = inlined_call_operand.vmem [shape: f32[4,128], index: 3, kind: input, shape index: {}]   ;;  %s560_s4 = inlined_call_operand.vmem [shape: bf16[2,4,128], index: 4, kind: output, shape index: {}]  }
   0x1 LB: > { %s412_s16 = sadd.s32 4294967295, %s465_s15   ;;  %p416_p0 = scmp.ge.s32.totalorder %s465_s15, 1  ;;  %s465_s15 = sphi %s493_s15, %s14_s15  }
   0x2   : > { %p162_p1 = scmp.lt.s32.totalorder %s465_s15, 3 }
   0x4   : > { %p163_p2 = pnand %p416_p0, %p162_p1 }
   0x5   : > { %v447_v0 = vld [vmem:[%s557_s1] sm:$0xff] (!%p163_p2)   ;;  %v467_v1 = vmov (!%p163_p2), 0   ;;  %p187_p3 = scmp.lt.s32.totalorder (!%p163_p2), %s412_s16, 1  ;;  %v448_v2 = vld [vmem:[%s557_s1 + $0x8] sm:$0xff] (!%p163_p2)   ;;  %v449_v3 = vld [vmem:[%s557_s1 + $0x10] sm:$0xff] (!%p163_p2)   ;;  %vm311_vm0 = vcmask (!%p163_p2), 523264  }
   0x6   : > { %166 = sbr.rel (%p163_p2) target bundleno = 273 (0x111), region = 36  ;;  %315 = vmatprep.subr.bf16.mxu0 (!%p163_p2), %v467_v1  ;;  %v450_v4 = vld [vmem:[%s557_s1 + $0x18] sm:$0xff] (!%p163_p2)   ;;  %v451_v7 = vld [vmem:[%s557_s1 + $0x20] sm:$0xff] (!%p163_p2)   ;;  %v452_v8 = vld [vmem:[%s557_s1 + $0x28] sm:$0xff] (!%p163_p2)  }
   0x7   : > { %316 = vmatpush1.bf16.msra.mxu0 (!%p163_p2), %v447_v0  ;;  %v453_v9 = vld [vmem:[%s557_s1 + $0x30] sm:$0xff] (!%p163_p2)   ;;  %v454_v10 = vld [vmem:[%s557_s1 + $0x38] sm:$0xff] (!%p163_p2)   ;;  %v455_v11 = vld [vmem:[%s557_s1 + $0x40] sm:$0xff] (!%p163_p2)  }
   0x8   : > { %317 = vmatprep.subr.bf16.mxu0 (!%p163_p2), %v467_v1  ;;  %v456_v12 = vld [vmem:[%s557_s1 + $0x48] sm:$0xff] (!%p163_p2)   ;;  %v457_v13 = vld [vmem:[%s557_s1 + $0x50] sm:$0xff] (!%p163_p2)   ;;  %v458_v14 = vld [vmem:[%s557_s1 + $0x58] sm:$0xff] (!%p163_p2)  }
   0x9   : > { %v420_v15 = vld [vmem:[%s558_s2] ss:$0 sm:$0xff] (!%p163_p2) }
   0xa   : > { %v355_v17 = vld [vmem:[%s559_s3] sm:$0xf] (!%p163_p2) }
   0xb   : > { %318 = vmatpush1.bf16.msra.mxu0 (!%p163_p2), %v448_v2 }
   0xc   : > { %319 = vmatprep.subr.bf16.mxu0 (!%p163_p2), %v467_v1 }
   0xd   : > { %s562_s16 = smov (!%p187_p3, %s412_s16), 1 }
   0xe   : > { %s437_s23 = sshll.u32 %s562_s16, 2  ;;  %s419_s25 = sshll.u32 %s562_s16, 1 }
   0xf   : > { %s191_s26 = scalar_lea.vmem %s556_s0, %s437_s23  ;;  %320 = vmatpush1.bf16.msra.mxu0 %v449_v3  ;;  %s195_s28 = scalar_lea.vmem %s560_s4, %s419_s25 }
  0x10   : > { %321 = vmatprep.subr.bf16.mxu0 %v467_v1  ;;  %v421_v5 = vld.sshfl [vmem:[%s191_s26] sm:$0x33 pattern:$0x76325410] }
  0x11   : > { %v237_v6 = vcombine.high %v421_v5, %v421_v5 }
  0x13   : > { %322 = vmatpush1.bf16.msra.mxu0 %v450_v4  ;;  %434 = vmatprep.mubr.msk.bf16.mxu0 %vm311_vm0, %v237_v6 }
  0x14   : > { %323 = vmatprep.subr.bf16.mxu0 %v467_v1 }
  0x17   : > { %324 = vmatpush1.bf16.msra.mxu0 %v451_v7 }
  0x18   : > { %325 = vmatprep.subr.bf16.mxu0 %v467_v1 }
  0x1b   : > { %326 = vmatpush1.bf16.msra.mxu0 %v452_v8 }
  0x1c   : > { %327 = vmatprep.subr.bf16.mxu0 %v467_v1 }
  0x1f   : > { %328 = vmatpush1.bf16.msra.mxu0 %v453_v9 }
  0x20   : > { %329 = vmatprep.subr.bf16.mxu0 %v467_v1 }
  0x23   : > { %330 = vmatpush1.bf16.msra.mxu0 %v454_v10 }
  0x24   : > { %331 = vmatprep.subr.bf16.mxu0 %v467_v1 }
  0x27   : > { %332 = vmatpush1.bf16.msra.mxu0 %v455_v11 }
  0x28   : > { %333 = vmatprep.subr.bf16.mxu0 %v467_v1 }
  0x2b   : > { %334 = vmatpush1.bf16.msra.mxu0 %v456_v12 }
  0x2c   : > { %335 = vmatprep.subr.bf16.mxu0 %v467_v1 }
  0x2f   : > { %336 = vmatpush1.bf16.msra.mxu0 %v457_v13 }
  0x30   : > { %337 = vmatprep.subr.bf16.mxu0 %v467_v1 }
  0x33   : > { %338 = vmatpush1.bf16.msra.mxu0 %v458_v14 }
  0x36   : > { %348 = vmatmul.mubr.bf16.vlgmr.msra.gmra.mrb[0].mxu0 %v421_v5 }
 0x109   : > { %v349_v16 = vpop.f32.mrb[0].mxu0 }
 0x10a   : > { %v350_v18 = vadd.f32 %v420_v15, %v349_v16  ;;  %v351_v19 = vpop.f32.mrb[1].mxu0 }
 0x10b   : > { %v352_v20 = vpop.f32.mrb[2].mxu0 }
 0x10c   : > { %v356_v21 = vadd.f32 %v355_v17, %v350_v18  ;;  %v353_v22 = vpop.f32.mrb[3].mxu0 }
 0x10e   : > { %v357_v23 = vpack.c.bf16 %v356_v21, %v356_v21 }
 0x110   : > { %358 = vst [vmem:[%s195_s28] sm:$0x3] %v357_v23 }
 0x111 PF: > { %s14_s15 = sadd.s32 1, %s465_s15  }
 0x112   : > { %p11_p4 = scmp.ge.s32.totalorder %s14_s15, 4  }
 0x114   :  { %13 = sbr.rel (!%p11_p4) target bundleno = 1 (0x1), region = 66 }

// kernel: paligemma_forward.13
= control target key start
LH: loop header
LB: loop body
LE: loop exit
PB: predicated region body
PF: predicated region fallthrough
CT: control target
= control target key end

     0   :  { %s879_s24 = smov 0   ;;  %s1018_s0 = inlined_call_operand.vmem [shape: bf16[2,4,128], index: 0, kind: input, shape index: {}]   ;;  %s1019_s1 = inlined_call_operand.vmem [shape: f32[1,128], index: 1, kind: input, shape index: {}]   ;;  %s1020_s2 = inlined_call_operand.vmem [shape: f32[1,128], index: 2, kind: input, shape index: {}, may-alias: {2,6}]   ;;  %s1021_s3 = inlined_call_operand.vmem [shape: bf16[128,256], index: 3, kind: input, shape index: {}]   ;;  %s1022_s4 = inlined_call_operand.vmem [shape: f32[1,256], index: 4, kind: input, shape index: {}]   ;;  %s1023_s5 = inlined_call_operand.vmem [shape: bf16[256,128], index: 5, kind: input, shape index: {}]   ;;  %s1024_s6 = inlined_call_operand.vmem [shape: f32[1,128], index: 6, kind: input, shape index: {}, may-alias: {2,6}]   ;;  %s1025_s7 = inlined_call_operand.vmem [shape: bf16[2,4,128], index: 7, kind: output, shape index: {}]  }
   0x1 LB: > { %s709_s25 = sadd.s32 4294967295, %s836_s24   ;;  %p713_p0 = scmp.ge.s32.totalorder %s836_s24, 1  ;;  %s836_s24 = sphi %s879_s24, %s17_s24  }
   0x2   : > { %p236_p1 = scmp.lt.s32.totalorder %s836_s24, 3 }
   0x4   : > { %p237_p2 = pnand %p713_p0, %p236_p1 }
   0x5   : > { %p266_p3 = scmp.lt.s32.totalorder (!%p237_p2), %s709_s25, 1  ;;  %vm279_vm0 = vcmask (!%p237_p2), 1043456   ;;  %v784_v3 = vld [vmem:[%s1021_s3 + $0x4] ss:$8 sps:$4 sm:$0xff] (!%p237_p2)   ;;  %v786_v4 = vld [vmem:[%s1021_s3] ss:$8 sps:$4 sm:$0xff] (!%p237_p2)   ;;  %v327_v51 = vlaneseq (!%p237_p2) }
   0x6   : > { %240 = sbr.rel (%p237_p2) target bundleno = 801 (0x321), region = 48  ;;  %v787_v5 = vld [vmem:[%s1021_s3 + $0x14] ss:$8 sps:$4 sm:$0xff] (!%p237_p2)   ;;  %417 = vmatprep.subr.bf16.mxu0 (!%p237_p2), %v784_v3  ;;  %v789_v6 = vld [vmem:[%s1021_s3 + $0x10] ss:$8 sps:$4 sm:$0xff] (!%p237_p2)   ;;  %v838_v19 = vmov (!%p237_p2), 0  }
   0x7   : > { %418 = vmatpush1.bf16.msra.mxu0 (!%p237_p2), %v786_v4  ;;  %v790_v7 = vld [vmem:[%s1021_s3 + $0x24] ss:$8 sps:$4 sm:$0xff] (!%p237_p2)   ;;  %v792_v13 = vld [vmem:[%s1021_s3 + $0x20] ss:$8 sps:$4 sm:$0xff] (!%p237_p2)   ;;  %v793_v14 = vld [vmem:[%s1021_s3 + $0x34] ss:$8 sps:$4 sm:$0xff] (!%p237_p2)   ;;  %449 = vmatprep.mubr.bf16.mxu0 (!%p237_p2), %v838_v19 }
   0x8   : > { %419 = vmatprep.subr.bf16.mxu0 (!%p237_p2), %v787_v5  ;;  %v795_v15 = vld [vmem:[%s1021_s3 + $0x30] ss:$8 sps:$4 sm:$0xff] (!%p237_p2)   ;;  %v796_v16 = vld [vmem:[%s1021_s3 + $0x44] ss:$8 sps:$4 sm:$0xff] (!%p237_p2)   ;;  %v798_v17 = vld [vmem:[%s1021_s3 + $0x40] ss:$8 sps:$4 sm:$0xff] (!%p237_p2)  }
   0x9   : > { %v799_v18 = vld [vmem:[%s1021_s3 + $0x54] ss:$8 sps:$4 sm:$0xff] (!%p237_p2)   ;;  %v801_v20 = vld [vmem:[%s1021_s3 + $0x50] ss:$8 sps:$4 sm:$0xff] (!%p237_p2)   ;;  %v802_v21 = vld [vmem:[%s1021_s3 + $0x64] ss:$8 sps:$4 sm:$0xff] (!%p237_p2)  }
   0xa   : > { %v804_v22 = vld [vmem:[%s1021_s3 + $0x60] ss:$8 sps:$4 sm:$0xff] (!%p237_p2)   ;;  %v805_v23 = vld [vmem:[%s1021_s3 + $0x74] ss:$8 sps:$4 sm:$0xff] (!%p237_p2)   ;;  %v807_v24 = vld [vmem:[%s1021_s3 + $0x70] ss:$8 sps:$4 sm:$0xff] (!%p237_p2)  }
   0xb   : > { %420 = vmatpush1.bf16.msra.mxu0 (!%p237_p2), %v789_v6  ;;  %v716_v29 = vld [vmem:[%s1019_s1] ss:$0 sm:$0xff] (!%p237_p2)  ;;  %v810_v37 = vld [vmem:[%s1023_s5 + $0x48] sm:$0xff] (!%p237_p2)   ;;  %v812_v39 = vld [vmem:[%s1023_s5 + $0x50] sm:$0xff] (!%p237_p2)   ;;  %v328_v52 = vshrl.u32 (!%p237_p2), %v327_v51, 7 }
   0xc   : > { %421 = vmatprep.subr.bf16.mxu0 (!%p237_p2), %v790_v7  ;;  %v717_v31 = vld [vmem:[%s1020_s2] ss:$0 sm:$0xff] (!%p237_p2)  ;;  %v811_v38 = vld [vmem:[%s1023_s5 + $0x8] sm:$0xff] (!%p237_p2)   ;;  %v813_v40 = vld [vmem:[%s1023_s5 + $0x10] sm:$0xff] (!%p237_p2)  }
   0xd   : > { %s1027_s25 = smov (!%p266_p3, %s709_s25), 1  ;;  %v808_v35 = vld [vmem:[%s1023_s5 + $0x40] sm:$0xff]   ;;  %v814_v41 = vld [vmem:[%s1023_s5 + $0x58] sm:$0xff]   ;;  %v818_v45 = vld [vmem:[%s1023_s5 + $0x68] sm:$0xff]   ;;  %v329_v53 = vsub.s32 0, %v328_v52  ;;  %v333_v55 = vsub.s32 1, %v328_v52 }
   0xe   : > { %s714_s26 = sshll.u32 %s1027_s25, 1  ;;  %v809_v36 = vld [vmem:[%s1023_s5] sm:$0xff]   ;;  %753 = vmatprep.subr.bf16.mxu1 %v808_v35  ;;  %v815_v42 = vld [vmem:[%s1023_s5 + $0x18] sm:$0xff]   ;;  %v819_v46 = vld [vmem:[%s1023_s5 + $0x28] sm:$0xff]  }
   0xf   : > { %s269_s29 = scalar_lea.vmem %s1018_s0, %s714_s26  ;;  %422 = vmatpush1.bf16.msra.mxu0 %v792_v13  ;;  %754 = vmatpush3.bf16.msra.mxu1 %v809_v36  ;;  %v816_v43 = vld [vmem:[%s1023_s5 + $0x60] sm:$0xff]   ;;  %v820_v47 = vld [vmem:[%s1023_s5 + $0x70] sm:$0xff]   ;;  %v822_v49 = vld [vmem:[%s1023_s5 + $0x78] sm:$0xff]   ;;  %s273_s21 = scalar_lea.vmem %s1025_s7, %s714_s26 }
  0x10   : > { %v275_v0 = vld [vmem:[%s269_s29] sm:$0x3]  ;;  %423 = vmatprep.subr.bf16.mxu0 %v793_v14  ;;  %755 = vmatprep.subr.bf16.mxu1 %v810_v37  ;;  %v821_v48 = vld [vmem:[%s1023_s5 + $0x30] sm:$0xff]   ;;  %v823_v50 = vld [vmem:[%s1023_s5 + $0x38] sm:$0xff]  }
  0x11   : > { %v895_v1 = vunpack.c.l.bf16 %v275_v0  ;;  %v817_v44 = vld [vmem:[%s1023_s5 + $0x20] sm:$0xff]  }
  0x12   : > { %v325_v54 = vld [vmem:[%s1022_s4] sm:$0x3] }
  0x13   : > { %v280_v2 = vsel %vm279_vm0, %v895_v1, 0.0  ;;  %424 = vmatpush1.bf16.msra.mxu0 %v795_v15  ;;  %756 = vmatpush3.bf16.msra.mxu1 %v811_v38  ;;  %v330_v56 = vrot.slane %v325_v54, %v329_v53  ;;  %v334_v57 = vrot.slane %v325_v54, %v333_v55 }
  0x14   : > { %281 = vadd.xlane.f32.xlu0 %v280_v2  ;;  %425 = vmatprep.subr.bf16.mxu0 %v796_v16 }
  0x15   : > { %757 = vmatprep.subr.bf16.mxu1 %v812_v39 }
  0x17   : > { %426 = vmatpush1.bf16.msra.mxu0 %v798_v17  ;;  %758 = vmatpush3.bf16.msra.mxu1 %v813_v40 }
  0x18   : > { %427 = vmatprep.subr.bf16.mxu0 %v799_v18  ;;  %759 = vmatprep.subr.bf16.mxu1 %v814_v41 }
  0x1b   : > { %428 = vmatpush1.bf16.msra.mxu0 %v801_v20  ;;  %760 = vmatpush3.bf16.msra.mxu1 %v815_v42 }
  0x1c   : > { %429 = vmatprep.subr.bf16.mxu0 %v802_v21  ;;  %761 = vmatprep.subr.bf16.mxu1 %v816_v43 }
  0x1f   : > { %430 = vmatpush1.bf16.msra.mxu0 %v804_v22  ;;  %762 = vmatpush3.bf16.msra.mxu1 %v817_v44  ;;  %v734_v22 = vld [vmem:[%s1024_s6] ss:$0 sm:$0xff] }
  0x20   : > { %431 = vmatprep.subr.bf16.mxu0 %v805_v23  ;;  %763 = vmatprep.subr.bf16.mxu1 %v818_v45 }
  0x23   : > { %432 = vmatpush1.bf16.msra.mxu0 %v807_v24  ;;  %764 = vmatpush3.bf16.msra.mxu1 %v819_v46 }
  0x24   : > { %765 = vmatprep.subr.bf16.mxu1 %v820_v47 }
  0x27   : > { %766 = vmatpush3.bf16.msra.mxu1 %v821_v48 }
  0x28   : > { %767 = vmatprep.subr.bf16.mxu1 %v822_v49 }
  0x2b   : > { %768 = vmatpush3.bf16.msra.mxu1 %v823_v50 }
  0xa1   : > { %v282_v8 = vpop.xlane.xlu0 %281 }
  0xa2   : > { %v284_v9 = vmul.f32 0.0078125, %v282_v8 }
  0xa4   : > { %v285_v10 = vsub.f32 %v895_v1, %v284_v9 }
  0xa6   : > { %v286_v11 = vmul.f32 %v285_v10, %v285_v10 }
  0xa8   : > { %v287_v12 = vsel %vm279_vm0, %v286_v11, 0.0 }
  0xa9   : > { %288 = vadd.xlane.f32.xlu0 %v287_v12 }
 0x136   : > { %v289_v25 = vpop.xlane.xlu0 %288 }
 0x137   : > { %v290_v26 = vmul.f32 0.0078125, %v289_v25 }
 0x139   : > { %v291_v27 = vadd.f32 1e-06, %v290_v26 }
 0x13b   : > { %824 = vrsqrt.f32 %v291_v27 }
 0x145   : > { %v825_v28 = vpop.eup %824 }
 0x146   : > { %v293_v30 = vmul.f32 %v825_v28, %v285_v10 }
 0x148   : > { %v300_v32 = vmul.f32 %v716_v29, %v293_v30 }
 0x14a   : > { %v307_v33 = vadd.f32 %v717_v31, %v300_v32 }
 0x14c   : > { %v308_v34 = vpack.c.bf16 %v307_v33, %v307_v33 }
 0x14e   : > { %450 = vmatmul.mubr.bf16.vlgmr.msra.gmra.mrb[0].mxu0 %v308_v34 }
 0x221   : > { %v451_v58 = vpop.f32.mrb[0].mxu0 }
 0x222   : > { %v452_v59 = vadd.f32 %v451_v58, %v330_v56  ;;  %v453_v60 = vpop.f32.mrb[1].mxu0 }
 0x223   : > { %v454_v61 = vadd.f32 %v453_v60, %v334_v57  ;;  %v455_v62 = vpop.f32.mrb[2].mxu0 }
 0x224   : > { %v458_v63 = vmul.f32 %v452_v59, %v452_v59  ;;  %v456_v0 = vpop.f32.mrb[3].mxu0 }
 0x225   : > { %v459_v2 = vmul.f32 %v454_v61, %v454_v61 }
 0x226   : > { %v460_v3 = vmul.f32 %v458_v63, %v452_v59 }
 0x227   : > { %v461_v4 = vmul.f32 %v459_v2, %v454_v61 }
 0x228   : > { %v462_v5 = vmul.f32 0.044715, %v460_v3 }
 0x229   : > { %v463_v6 = vmul.f32 0.044715, %v461_v4 }
 0x22a   : > { %v464_v7 = vadd.f32 %v462_v5, %v452_v59 }
 0x22b   : > { %v465_v8 = vadd.f32 %v463_v6, %v454_v61 }
 0x22c   : > { %v466_v9 = vmul.f32 0.7978846, %v464_v7 }
 0x22d   : > { %v467_v10 = vmul.f32 0.7978846, %v465_v8 }
 0x22e   : > { %826 = vtanh.f32 %v466_v9 }
 0x22f   : > { %828 = vtanh.f32 %v467_v10 }
 0x238   : > { %v827_v11 = vpop.eup %826 }
 0x239   : > { %v829_v12 = vpop.eup %828  ;;  %v470_v13 = vadd.f32 1.0, %v827_v11 }
 0x23a   : > { %v471_v14 = vadd.f32 1.0, %v829_v12 }
 0x23b   : > { %v472_v15 = vmul.f32 0.5, %v470_v13 }
 0x23c   : > { %v473_v16 = vmul.f32 0.5, %v471_v14 }
 0x23d   : > { %v474_v17 = vmul.f32 %v472_v15, %v452_v59 }
 0x23e   : > { %v475_v18 = vmul.f32 %v473_v16, %v454_v61 }
 0x23f   : > { %v476_v20 = vpack.c.bf16 %v474_v17, %v474_v17 }
 0x240   : > { %v477_v19 = vpack.c.bf16 %v475_v18, %v475_v18 }
 0x242   : > { %645 = vmatprep.mubr.bf16.mxu1 %v477_v19 }
 0x243   : > { %646 = vmatmul.mubr.bf16.vlgmr.msra.gmra.mrb[0].mxu1 %v476_v20 }
 0x316   : > { %v769_v21 = vpop.f32.mrb[0].mxu1 }
 0x317   : > { %v770_v23 = vpop.f32.mrb[1].mxu1 }
 0x318   : > { %v771_v24 = vadd.f32 %v770_v23, %v769_v21  ;;  %v772_v25 = vpop.f32.mrb[2].mxu1 }
 0x319   : > { %v773_v26 = vpop.f32.mrb[3].mxu1 }
 0x31a   : > { %v648_v27 = vadd.f32 %v771_v24, %v734_v22 }
 0x31c   : > { %v653_v28 = vadd.f32 %v648_v27, %v895_v1 }
 0x31e   : > { %v654_v29 = vpack.c.bf16 %v653_v28, %v653_v28 }
 0x320   : > { %655 = vst [vmem:[%s273_s21] sm:$0x3] %v654_v29 }
 0x321 PF: > { %s17_s24 = sadd.s32 1, %s836_s24  }
 0x322   : > { %p14_p4 = scmp.ge.s32.totalorder %s17_s24, 4  }
 0x324   :  { %16 = sbr.rel (!%p14_p4) target bundleno = 1 (0x1), region = 78 }

// kernel: paligemma_forward.12
= control target key start
LH: loop header
LB: loop body
LE: loop exit
PB: predicated region body
PF: predicated region fallthrough
CT: control target
= control target key end

     0   :  { %s1218_s24 = smov 0   ;;  %s1406_s0 = inlined_call_operand.vmem [shape: bf16[2,4,128], index: 0, kind: input, shape index: {}]   ;;  %s1407_s1 = inlined_call_operand.vmem [shape: f32[1,128], index: 1, kind: input, shape index: {}]   ;;  %s1408_s2 = inlined_call_operand.vmem [shape: f32[1,128], index: 2, kind: input, shape index: {}, may-alias: {2,6}]   ;;  %s1409_s3 = inlined_call_operand.vmem [shape: bf16[128,384], index: 3, kind: input, shape index: {}]   ;;  %s1410_s4 = inlined_call_operand.vmem [shape: f32[1,384], index: 4, kind: input, shape index: {}]   ;;  %s1411_s5 = inlined_call_operand.vmem [shape: bf16[128,128], index: 5, kind: input, shape index: {}]   ;;  %s1412_s6 = inlined_call_operand.vmem [shape: f32[1,128], index: 6, kind: input, shape index: {}, may-alias: {2,6}]   ;;  %s1413_s7 = inlined_call_operand.vmem [shape: bf16[2,4,128], index: 7, kind: output, shape index: {}]  }
   0x1 LB: > { %s966_s25 = sadd.s32 4294967295, %s1172_s24   ;;  %p970_p0 = scmp.ge.s32.totalorder %s1172_s24, 1  ;;  %s1172_s24 = sphi %s1218_s24, %s17_s24  }
   0x2   : > { %p236_p1 = scmp.lt.s32.totalorder %s1172_s24, 3 }
   0x4   : > { %p237_p2 = pnand %p970_p0, %p236_p1 }
   0x5   : > { %p266_p3 = scmp.lt.s32.totalorder (!%p237_p2), %s966_s25, 1  ;;  %vm279_vm0 = vcmask (!%p237_p2), 1043456   ;;  %v1116_v3 = vld [vmem:[%s1409_s3 + $0x4] ss:$12 sps:$4 sm:$0xff] (!%p237_p2)   ;;  %v1118_v4 = vld [vmem:[%s1409_s3] ss:$12 sps:$4 sm:$0xff] (!%p237_p2)   ;;  %v343_v44 = vlaneseq (!%p237_p2) }
   0x6   : > { %240 = sbr.rel (%p237_p2) target bundleno = 2176 (0x880), region = 48  ;;  %v1174_v5 = vmov (!%p237_p2), 0.0   ;;  %v1119_v6 = vld [vmem:[%s1409_s3 + $0x8] ss:$12 sps:$4 sm:$0xff] (!%p237_p2)   ;;  %486 = vmatprep.subr.bf16.mxu0 (!%p237_p2), %v1116_v3  ;;  %v1122_v8 = vld [vmem:[%s1409_s3 + $0x18] ss:$12 sps:$4 sm:$0xff] (!%p237_p2)  }
   0x7   : > { %1040 = vmatprep.subr.bf16.mxu1 (!%p237_p2), %v1174_v5  ;;  %v1120_v7 = vld [vmem:[%s1409_s3 + $0x1c] ss:$12 sps:$4 sm:$0xff] (!%p237_p2)   ;;  %487 = vmatpush1.bf16.msra.mxu0 (!%p237_p2), %v1118_v4  ;;  %v1123_v9 = vld [vmem:[%s1409_s3 + $0x20] ss:$12 sps:$4 sm:$0xff] (!%p237_p2)   ;;  %v1127_v17 = vld [vmem:[%s1409_s3 + $0x38] ss:$12 sps:$4 sm:$0xff] (!%p237_p2)  }
   0x8   : > { %1041 = vmatpush3.bf16.msra.mxu1 (!%p237_p2), %v1119_v6  ;;  %488 = vmatprep.subr.bf16.mxu0 (!%p237_p2), %v1120_v7  ;;  %v1124_v10 = vld [vmem:[%s1409_s3 + $0x34] ss:$12 sps:$4 sm:$0xff] (!%p237_p2)   ;;  %v1126_v16 = vld [vmem:[%s1409_s3 + $0x30] ss:$12 sps:$4 sm:$0xff] (!%p237_p2)   ;;  %v1128_v18 = vld [vmem:[%s1409_s3 + $0x4c] ss:$12 sps:$4 sm:$0xff] (!%p237_p2)  }
   0x9   : > { %1042 = vmatprep.subr.bf16.mxu1 (!%p237_p2), %v1174_v5  ;;  %v1130_v19 = vld [vmem:[%s1409_s3 + $0x48] ss:$12 sps:$4 sm:$0xff] (!%p237_p2)   ;;  %v1131_v20 = vld [vmem:[%s1409_s3 + $0x50] ss:$12 sps:$4 sm:$0xff] (!%p237_p2)   ;;  %v1134_v22 = vld [vmem:[%s1409_s3 + $0x60] ss:$12 sps:$4 sm:$0xff] (!%p237_p2)  }
   0xa   : > { %v1132_v21 = vld [vmem:[%s1409_s3 + $0x64] ss:$12 sps:$4 sm:$0xff] (!%p237_p2)   ;;  %v1135_v23 = vld [vmem:[%s1409_s3 + $0x68] ss:$12 sps:$4 sm:$0xff] (!%p237_p2)   ;;  %v1139_v26 = vld [vmem:[%s1409_s3 + $0x80] ss:$12 sps:$4 sm:$0xff] (!%p237_p2)  }
   0xb   : > { %489 = vmatpush1.bf16.msra.mxu0 (!%p237_p2), %v1122_v8  ;;  %v1136_v24 = vld [vmem:[%s1409_s3 + $0x7c] ss:$12 sps:$4 sm:$0xff] (!%p237_p2)   ;;  %v1138_v25 = vld [vmem:[%s1409_s3 + $0x78] ss:$12 sps:$4 sm:$0xff] (!%p237_p2)   ;;  %v1140_v27 = vld [vmem:[%s1409_s3 + $0x94] ss:$12 sps:$4 sm:$0xff] (!%p237_p2)  }
   0xc   : > { %1043 = vmatpush3.bf16.msra.mxu1 (!%p237_p2), %v1123_v9  ;;  %490 = vmatprep.subr.bf16.mxu0 (!%p237_p2), %v1124_v10  ;;  %v1175_v28 = vmov (!%p237_p2), 0   ;;  %vm1176_vm1 = vmmov (!%p237_p2), 0   ;;  %v1142_v29 = vld [vmem:[%s1409_s3 + $0x90] ss:$12 sps:$4 sm:$0xff] (!%p237_p2)   ;;  %v1143_v30 = vld [vmem:[%s1409_s3 + $0x98] ss:$12 sps:$4 sm:$0xff] (!%p237_p2)  }
   0xd   : > { %s1415_s25 = smov (!%p266_p3, %s966_s25), 1  ;;  %1044 = vmatprep.subr.bf16.mxu1 %v1174_v5  ;;  %518 = vmatprep.mubr.bf16.mxu0 %v1175_v28  ;;  %v1144_v31 = vld [vmem:[%s1409_s3 + $0xac] ss:$12 sps:$4 sm:$0xff]   ;;  %v1146_v32 = vld [vmem:[%s1409_s3 + $0xa8] ss:$12 sps:$4 sm:$0xff]   ;;  %v344_v45 = vshrl.u32 %v343_v44, 7 }
   0xe   : > { %s971_s26 = sshll.u32 %s1415_s25, 1  ;;  %1056 = vmatprep.mubr.msk.bf16.mxu1 %vm1176_vm1, %v1174_v5  ;;  %v1147_v33 = vld [vmem:[%s1409_s3 + $0xb0] ss:$12 sps:$4 sm:$0xff]   ;;  %v973_v38 = vld [vmem:[%s1407_s1] ss:$0 sm:$0xff]  ;;  %vm569_vm2 = vcmask 523264  }
   0xf   : > { %s269_s29 = scalar_lea.vmem %s1406_s0, %s971_s26  ;;  %491 = vmatpush1.bf16.msra.mxu0 %v1126_v16  ;;  %v974_v40 = vld [vmem:[%s1408_s2] ss:$0 sm:$0xff]  ;;  %v349_v46 = vsub.s32 1, %v344_v45  ;;  %v353_v48 = vsub.s32 2, %v344_v45  ;;  %v345_v50 = vsub.s32 0, %v344_v45  ;;  %s1177_s21 = smov 64  }
  0x10   : > { %v275_v0 = vld [vmem:[%s269_s29] sm:$0x3]  ;;  %1045 = vmatpush3.bf16.msra.mxu1 %v1127_v17  ;;  %492 = vmatprep.subr.bf16.mxu0 %v1128_v18  ;;  %vm635_vm3 = vcmask 1041408   ;;  %vm617_vm4 = vcmask 27648   ;;  %vm631_vm5 = vcmask 31744   ;;  %s273_s22 = scalar_lea.vmem %s1413_s7, %s971_s26 }
  0x11   : > { %v1234_v1 = vunpack.c.l.bf16 %v275_v0  ;;  %1046 = vmatprep.subr.bf16.mxu1 %v1174_v5  ;;  %v341_v47 = vld [vmem:[%s1410_s4] sm:$0x7] }
  0x12   : > { %v350_v49 = vrot.slane %v341_v47, %v349_v46  ;;  %v354_v55 = vrot.slane %v341_v47, %v353_v48  ;;  %v346_v61 = vrot.slane %v341_v47, %v345_v50  ;;  %v1148_v46 = vld [vmem:[%s1411_s5] sm:$0xff]   ;;  %v1149_v47 = vld [vmem:[%s1411_s5 + $0x8] sm:$0xff]   ;;  %v1150_v48 = vld [vmem:[%s1411_s5 + $0x10] sm:$0xff]  }
  0x13   : > { %v280_v2 = vsel %vm279_vm0, %v1234_v1, 0.0  ;;  %493 = vmatpush1.bf16.msra.mxu0 %v1130_v19  ;;  %v1152_v50 = vld [vmem:[%s1411_s5 + $0x20] sm:$0xff]  }
  0x14   : > { %281 = vadd.xlane.f32.xlu0 %v280_v2  ;;  %1047 = vmatpush3.bf16.msra.mxu1 %v1131_v20 }
  0x15   : > { %1048 = vmatprep.subr.bf16.mxu1 %v1174_v5  ;;  %494 = vmatprep.subr.bf16.mxu0 %v1132_v21 }
  0x17   : > { %495 = vmatpush1.bf16.msra.mxu0 %v1134_v22 }
  0x18   : > { %1049 = vmatpush3.bf16.msra.mxu1 %v1135_v23  ;;  %496 = vmatprep.subr.bf16.mxu0 %v1136_v24 }
  0x19   : > { %1050 = vmatprep.subr.bf16.mxu1 %v1174_v5 }
  0x1b   : > { %497 = vmatpush1.bf16.msra.mxu0 %v1138_v25 }
  0x1c   : > { %1051 = vmatpush3.bf16.msra.mxu1 %v1139_v26  ;;  %498 = vmatprep.subr.bf16.mxu0 %v1140_v27 }
  0x1d   : > { %1052 = vmatprep.subr.bf16.mxu1 %v1174_v5 }
  0x1f   : > { %499 = vmatpush1.bf16.msra.mxu0 %v1142_v29 }
  0x20   : > { %1053 = vmatpush3.bf16.msra.mxu1 %v1143_v30  ;;  %500 = vmatprep.subr.bf16.mxu0 %v1144_v31 }
  0x21   : > { %1054 = vmatprep.subr.bf16.mxu1 %v1174_v5 }
  0x23   : > { %501 = vmatpush1.bf16.msra.mxu0 %v1146_v32 }
  0x24   : > { %1055 = vmatpush3.bf16.msra.mxu1 %v1147_v33  ;;  %1084 = vmatprep.subr.bf16.mxu0 %v1174_v5 }
  0x25   : > { %1060 = vmatprep.subr.bf16.mxu1 %v1174_v5 }
  0xa1   : > { %v282_v11 = vpop.xlane.xlu0 %281 }
  0xa2   : > { %v284_v12 = vmul.f32 0.0078125, %v282_v11 }
  0xa4   : > { %v285_v13 = vsub.f32 %v1234_v1, %v284_v12 }
  0xa6   : > { %v286_v14 = vmul.f32 %v285_v13, %v285_v13 }
  0xa8   : > { %v287_v15 = vsel %vm279_vm0, %v286_v14, 0.0 }
  0xa9   : > { %288 = vadd.xlane.f32.xlu0 %v287_v15 }
 0x136   : > { %v289_v34 = vpop.xlane.xlu0 %288 }
 0x137   : > { %v290_v35 = vmul.f32 0.0078125, %v289_v34 }
 0x139   : > { %v291_v36 = vadd.f32 1e-06, %v290_v35 }
 0x13b   : > { %1156 = vrsqrt.f32 %v291_v36 }
 0x145   : > { %v1157_v37 = vpop.eup %1156 }
 0x146   : > { %v293_v39 = vmul.f32 %v1157_v37, %v285_v13 }
 0x148   : > { %v300_v41 = vmul.f32 %v973_v38, %v293_v39 }
 0x14a   : > { %v307_v42 = vadd.f32 %v974_v40, %v300_v41 }
 0x14c   : > { %v308_v43 = vpack.c.bf16 %v307_v42, %v307_v42 }
 0x14e   : > { %519 = vmatmul.mubr.bf16.vlgmr.msra.gmra.mrb[0].mxu0 %v308_v43  ;;  %1057 = vmatmul.mubr.bf16.vlgmr.msra.gmra.mrb[0].mxu1 %v308_v43 }
 0x14f   : > { %1062 = vmatprep.mubr.msk.bf16.mxu1 %vm1176_vm1, %v1174_v5  ;;  %1100 = vmatprep.mubr.msk.bf16.mxu0 %vm1176_vm1, %v1174_v5 }
 0x150   : > { %1085 = vmatpush3.bf16.msra.mxu0 %v1148_v46 }
 0x151   : > { %1086 = vmatprep.subr.bf16.mxu0 %v1174_v5 }
 0x154   : > { %1087 = vmatpush3.bf16.msra.mxu0 %v1149_v47 }
 0x155   : > { %1088 = vmatprep.subr.bf16.mxu0 %v1174_v5 }
 0x158   : > { %1089 = vmatpush3.bf16.msra.mxu0 %v1150_v48 }
 0x159   : > { %1090 = vmatprep.subr.bf16.mxu0 %v1174_v5 }
 0x221   : > { %v520_v51 = vpop.f32.mrb[0].mxu0  ;;  %v561_v52 = vpop.f32.mrb[0].mxu1 }
 0x222   : > { %v522_v53 = vpop.f32.mrb[1].mxu0  ;;  %v1058_v54 = vpop.f32.mrb[1].mxu1  ;;  %v562_v63 = vadd.f32 %v561_v52, %v354_v55  ;;  %v521_v2 = vadd.f32 %v520_v51, %v346_v61  ;;  %v1153_v51 = vld [vmem:[%s1411_s5 + $0x28] sm:$0xff]   ;;  %v1154_v52 = vld [vmem:[%s1411_s5 + $0x30] sm:$0xff]  }
 0x223   : > { %v523_v56 = vadd.f32 %v522_v53, %v350_v49  ;;  %v524_v57 = vpop.f32.mrb[2].mxu0  ;;  %v564_v58 = vpop.f32.mrb[2].mxu1  ;;  %v1151_v49 = vld [vmem:[%s1411_s5 + $0x18] sm:$0xff]  }
 0x224   : > { %v525_v59 = vpop.f32.mrb[3].mxu0  ;;  %v1059_v60 = vpop.f32.mrb[3].mxu1  ;;  %v630_v3 = vpack.c.bf16 %v562_v63, %v562_v63  ;;  %v567_v4 = vpack.c.bf16 %v521_v2, %v521_v2  ;;  %1091 = vmatpush3.bf16.msra.mxu0 %v1151_v49  ;;  %v1155_v53 = vld [vmem:[%s1411_s5 + $0x38] sm:$0xff]  }
 0x225   : > { %v568_v62 = vpack.c.bf16 %v523_v56, %v523_v56  ;;  %1092 = vmatprep.subr.bf16.mxu0 %v1174_v5 }
 0x226   : > { %v637_v6 = vsel %vm635_vm3, %v630_v3, 0 }
 0x227   : > { %v574_v0 = vsel %vm569_vm2, %v568_v62, 0  ;;  %683 = vrot.lane.b32.xlu0 %v568_v62, %s1177_s21 }
 0x228   : > { %1061 = vmatpush3.bf16.xpose.msra.mxu1 %v574_v0  ;;  %1093 = vmatpush3.bf16.msra.mxu0 %v1152_v50 }
 0x229   : > { %1066 = vmatprep.subr.bf16.mxu1 %v1174_v5  ;;  %1094 = vmatprep.subr.bf16.mxu0 %v1174_v5 }
 0x22c   : > { %1095 = vmatpush3.bf16.msra.mxu0 %v1153_v51 }
 0x22d   : > { %1096 = vmatprep.subr.bf16.mxu0 %v1174_v5 }
 0x22f   : > { %1063 = vmatmul.mubr.msk.bf16.vlgmr.msra.gmra.mrb[4].mxu1 %vm569_vm2, %v567_v4 }
 0x230   : > { %1067 = vmatpush3.bf16.msra.mxu1 %v637_v6  ;;  %1068 = vmatprep.mubr.msk.bf16.mxu1 %vm1176_vm1, %v1174_v5 }
 0x231   : > { %1072 = vmatprep.subr.bf16.mxu1 %v1174_v5  ;;  %1097 = vmatpush3.bf16.msra.mxu0 %v1154_v52 }
 0x232   : > { %1098 = vmatprep.subr.bf16.mxu0 %v1174_v5 }
 0x235   : > { %1099 = vmatpush3.bf16.msra.mxu0 %v1155_v53 }
 0x299   : > { %v684_v21 = vpop.permute.xlu0 %683 }
 0x29a   : > { %v689_v23 = vsel %vm569_vm2, %v684_v21, 0 }
 0x302   : > { %v610_v7 = vpop.f32.mrb[4].mxu1 }
 0x303   : > { %v616_v8 = vmul.f32 0.125, %v610_v7  ;;  %v1064_v9 = vpop.f32.mrb[5].mxu1 }
 0x304   : > { %v613_v10 = vpop.f32.mrb[6].mxu1 }
 0x305   : > { %v1065_v11 = vpop.f32.mrb[7].mxu1  ;;  %v618_v12 = vsel %vm617_vm4, %v616_v8, -inf }
 0x306   : > { %619 = vmax.xlane.f32.xlu1 %v618_v12 }
 0x393   : > { %v620_v13 = vpop.xlane.xlu1 %619 }
 0x394   : > { %v621_v14 = vsub.f32 %v616_v8, %v620_v13 }
 0x396   : > { %v622_v15 = vmul.f32 1.442695, %v621_v14 }
 0x398   : > { %1158 = vpow2.f32 %v622_v15 }
 0x3a2   : > { %v1159_v16 = vpop.eup %1158 }
 0x3a3   : > { %v624_v17 = vsel %vm617_vm4, %v1159_v16, 0.0 }
 0x3a4   : > { %625 = vadd.xlane.f32.xlu1 %v624_v17 }
 0x3b5   : > { %680 = vrot.lane.b32.xlu1 %v567_v4, %s1177_s21 }
 0x431   : > { %v626_v18 = vpop.xlane.xlu1 %625 }
 0x432   : > { %1160 = vrcp.f32 %v626_v18 }
 0x435   : > { %v681_v24 = vpop.permute.xlu1 %680 }
 0x43c   : > { %v1161_v19 = vpop.eup %1160 }
 0x43d   : > { %v628_v20 = vmul.f32 %v1161_v19, %v1159_v16 }
 0x43f   : > { %v629_v22 = vpack.c.bf16 %v628_v20, %v628_v20 }
 0x441   : > { %1069 = vmatmul.mubr.msk.bf16.vlgmr.msra.gmra.mrb[8].mxu1 %vm631_vm5, %v629_v22 }
 0x442   : > { %1073 = vmatpush3.bf16.xpose.msra.mxu1 %v689_v23  ;;  %1074 = vmatprep.mubr.msk.bf16.mxu1 %vm1176_vm1, %v1174_v5 }
 0x443   : > { %1078 = vmatprep.subr.bf16.mxu1 %v1174_v5 }
 0x449   : > { %1075 = vmatmul.mubr.msk.bf16.vlgmr.msra.gmra.mrb[12].mxu1 %vm569_vm2, %v681_v24 }
 0x44a   : > { %1080 = vmatprep.mubr.msk.bf16.mxu1 %vm1176_vm1, %v1174_v5  ;;  %v1003_v5 = vld [vmem:[%s1412_s6] ss:$0 sm:$0xff] }
 0x514   : > { %v673_v25 = vpop.f32.mrb[8].mxu1 }
 0x515   : > { %v1070_v26 = vpop.f32.mrb[9].mxu1 }
 0x516   : > { %v676_v27 = vpop.f32.mrb[10].mxu1 }
 0x517   : > { %v1071_v28 = vpop.f32.mrb[11].mxu1 }
 0x51c   : > { %v725_v29 = vpop.f32.mrb[12].mxu1 }
 0x51d   : > { %v731_v30 = vmul.f32 0.125, %v725_v29  ;;  %v1076_v31 = vpop.f32.mrb[13].mxu1 }
 0x51e   : > { %v728_v32 = vpop.f32.mrb[14].mxu1 }
 0x51f   : > { %v1077_v33 = vpop.f32.mrb[15].mxu1  ;;  %v732_v34 = vsel %vm617_vm4, %v731_v30, -inf }
 0x520   : > { %733 = vmax.xlane.f32.xlu1 %v732_v34 }
 0x5ad   : > { %v734_v35 = vpop.xlane.xlu1 %733 }
 0x5ae   : > { %v735_v36 = vsub.f32 %v731_v30, %v734_v35 }
 0x5b0   : > { %v736_v37 = vmul.f32 1.442695, %v735_v36 }
 0x5b2   : > { %1162 = vpow2.f32 %v736_v37 }
 0x5bc   : > { %v1163_v38 = vpop.eup %1162 }
 0x5bd   : > { %v738_v39 = vsel %vm617_vm4, %v1163_v38, 0.0 }
 0x5be   : > { %739 = vadd.xlane.f32.xlu0 %v738_v39 }
 0x5d4   : > { %745 = vrot.lane.b32.xlu0 %v630_v3, %s1177_s21 }
 0x64b   : > { %v740_v40 = vpop.xlane.xlu0 %739 }
 0x64c   : > { %1164 = vrcp.f32 %v740_v40 }
 0x64f   : > { %v746_v41 = vpop.permute.xlu0 %745 }
 0x650   : > { %v751_v42 = vsel %vm635_vm3, %v746_v41, 0 }
 0x651   : > { %1079 = vmatpush3.bf16.msra.mxu1 %v751_v42 }
 0x656   : > { %v1165_v43 = vpop.eup %1164 }
 0x657   : > { %v742_v44 = vmul.f32 %v1165_v43, %v1163_v38 }
 0x659   : > { %v743_v45 = vpack.c.bf16 %v742_v44, %v742_v44 }
 0x65b   : > { %1081 = vmatmul.mubr.msk.bf16.vlgmr.msra.gmra.mrb[16].mxu1 %vm631_vm5, %v743_v45 }
 0x72e   : > { %v787_v54 = vpop.f32.mrb[16].mxu1 }
 0x72f   : > { %794 = vrot.lane.b32.xlu1 %v787_v54, %s1177_s21  ;;  %v1082_v55 = vpop.f32.mrb[17].mxu1 }
 0x730   : > { %v790_v56 = vpop.f32.mrb[18].mxu1 }
 0x731   : > { %v1083_v57 = vpop.f32.mrb[19].mxu1 }
 0x7a1   : > { %v795_v58 = vpop.permute.xlu1 %794 }
 0x7a2   : > { %v797_v59 = vsel %vm569_vm2, %v673_v25, %v795_v58 }
 0x7a3   : > { %v798_v60 = vpack.c.bf16 %v797_v59, %v797_v59 }
 0x7a5   : > { %1101 = vmatmul.mubr.bf16.vlgmr.msra.gmra.mrb[4].mxu0 %v798_v60 }
 0x878   : > { %v904_v61 = vpop.f32.mrb[4].mxu0 }
 0x879   : > { %v905_v62 = vadd.f32 %v1003_v5, %v904_v61  ;;  %v1102_v63 = vpop.f32.mrb[5].mxu0 }
 0x87a   : > { %v907_v0 = vpop.f32.mrb[6].mxu0 }
 0x87b   : > { %v910_v2 = vadd.f32 %v905_v62, %v1234_v1  ;;  %v1103_v3 = vpop.f32.mrb[7].mxu0 }
 0x87d   : > { %v911_v4 = vpack.c.bf16 %v910_v2, %v910_v2 }
 0x87f   : > { %912 = vst [vmem:[%s273_s22] sm:$0x3] %v911_v4 }
 0x880 PF: > { %s17_s24 = sadd.s32 1, %s1172_s24  }
 0x881   : > { %p14_p4 = scmp.ge.s32.totalorder %s17_s24, 4  }
 0x883   :  { %16 = sbr.rel (!%p14_p4) target bundleno = 1 (0x1), region = 78 }

// kernel: paligemma_forward.21
= control target key start
LH: loop header
LB: loop body
LE: loop exit
PB: predicated region body
PF: predicated region fallthrough
CT: control target
= control target key end

     0   :  { %s938_s0 = inlined_call_operand.vmem [shape: bf16[16,256], index: 0, kind: input, shape index: {}]   ;;  %s939_s1 = inlined_call_operand.vmem [shape: bf16[512,256], index: 1, kind: input, shape index: {}]   ;;  %s940_s2 = inlined_call_operand.hbm [shape: f32[16,512], index: 2, kind: output, shape index: {}]  }
   0x1   :  { %v587_v0 = vld [vmem:[%s939_s1 + $0x4] ss:$8 sps:$4 sm:$0xff]   ;;  %v591_v2 = vld [vmem:[%s939_s1] ss:$8 sps:$4 sm:$0xff]   ;;  %v593_v4 = vld [vmem:[%s939_s1 + $0x14] ss:$8 sps:$4 sm:$0xff]  }
   0x2   :  { %v589_v1 = vld [vmem:[%s939_s1 + $0x104] ss:$8 sps:$4 sm:$0xff]   ;;  %408 = vmatprep.subr.bf16.mxu0 %v587_v0  ;;  %v592_v3 = vld [vmem:[%s939_s1 + $0x100] ss:$8 sps:$4 sm:$0xff]   ;;  %v595_v5 = vld [vmem:[%s939_s1 + $0x114] ss:$8 sps:$4 sm:$0xff]  }
   0x3   :  { %451 = vmatprep.subr.bf16.mxu1 %v589_v1  ;;  %409 = vmatpush1.bf16.xpose.msra.mxu0 %v591_v2  ;;  %v597_v6 = vld [vmem:[%s939_s1 + $0x10] ss:$8 sps:$4 sm:$0xff]   ;;  %v599_v8 = vld [vmem:[%s939_s1 + $0x24] ss:$8 sps:$4 sm:$0xff]   ;;  %v603_v10 = vld [vmem:[%s939_s1 + $0x20] ss:$8 sps:$4 sm:$0xff]  }
   0x4   :  { %452 = vmatpush1.bf16.xpose.msra.mxu1 %v592_v3  ;;  %410 = vmatprep.subr.bf16.mxu0 %v593_v4  ;;  %v598_v7 = vld [vmem:[%s939_s1 + $0x110] ss:$8 sps:$4 sm:$0xff]   ;;  %v601_v9 = vld [vmem:[%s939_s1 + $0x124] ss:$8 sps:$4 sm:$0xff]   ;;  %v604_v11 = vld [vmem:[%s939_s1 + $0x120] ss:$8 sps:$4 sm:$0xff]  }
   0x5   :  { %453 = vmatprep.subr.bf16.mxu1 %v595_v5  ;;  %v605_v12 = vld [vmem:[%s939_s1 + $0x34] ss:$8 sps:$4 sm:$0xff]   ;;  %v609_v14 = vld [vmem:[%s939_s1 + $0x30] ss:$8 sps:$4 sm:$0xff]   ;;  %v611_v16 = vld [vmem:[%s939_s1 + $0x44] ss:$8 sps:$4 sm:$0xff]  }
   0x6   :  { %v607_v13 = vld [vmem:[%s939_s1 + $0x134] ss:$8 sps:$4 sm:$0xff]   ;;  %v610_v15 = vld [vmem:[%s939_s1 + $0x130] ss:$8 sps:$4 sm:$0xff]   ;;  %v613_v17 = vld [vmem:[%s939_s1 + $0x144] ss:$8 sps:$4 sm:$0xff]  }
   0x7   :  { %v615_v18 = vld [vmem:[%s939_s1 + $0x40] ss:$8 sps:$4 sm:$0xff]   ;;  %v617_v20 = vld [vmem:[%s939_s1 + $0x54] ss:$8 sps:$4 sm:$0xff]   ;;  %v621_v22 = vld [vmem:[%s939_s1 + $0x50] ss:$8 sps:$4 sm:$0xff]  }
   0x8   :  { %v616_v19 = vld [vmem:[%s939_s1 + $0x140] ss:$8 sps:$4 sm:$0xff]   ;;  %v619_v21 = vld [vmem:[%s939_s1 + $0x154] ss:$8 sps:$4 sm:$0xff]   ;;  %v622_v23 = vld [vmem:[%s939_s1 + $0x150] ss:$8 sps:$4 sm:$0xff]  }
   0x9   :  { %v623_v24 = vld [vmem:[%s939_s1 + $0x64] ss:$8 sps:$4 sm:$0xff]  }
   0xa   :  { %v625_v25 = vld [vmem:[%s939_s1 + $0x164] ss:$8 sps:$4 sm:$0xff]  }
   0xb   :  { %411 = vmatpush1.bf16.xpose.msra.mxu0 %v597_v6  ;;  %v685_v26 = vld [vmem:[%s938_s0 + $0x4] ss:$8 sps:$4 sm:$0xff]  }
   0xc   :  { %454 = vmatpush1.bf16.xpose.msra.mxu1 %v598_v7  ;;  %412 = vmatprep.subr.bf16.mxu0 %v599_v8 }
   0xd   :  { %455 = vmatprep.subr.bf16.mxu1 %v601_v9 }
  0x13   :  { %413 = vmatpush1.bf16.xpose.msra.mxu0 %v603_v10 }
  0x14   :  { %456 = vmatpush1.bf16.xpose.msra.mxu1 %v604_v11  ;;  %414 = vmatprep.subr.bf16.mxu0 %v605_v12 }
  0x15   :  { %457 = vmatprep.subr.bf16.mxu1 %v607_v13 }
  0x1b   :  { %415 = vmatpush1.bf16.xpose.msra.mxu0 %v609_v14 }
  0x1c   :  { %458 = vmatpush1.bf16.xpose.msra.mxu1 %v610_v15  ;;  %416 = vmatprep.subr.bf16.mxu0 %v611_v16 }
  0x1d   :  { %459 = vmatprep.subr.bf16.mxu1 %v613_v17 }
  0x23   :  { %417 = vmatpush1.bf16.xpose.msra.mxu0 %v615_v18 }
  0x24   :  { %460 = vmatpush1.bf16.xpose.msra.mxu1 %v616_v19  ;;  %418 = vmatprep.subr.bf16.mxu0 %v617_v20 }
  0x25   :  { %461 = vmatprep.subr.bf16.mxu1 %v619_v21 }
  0x2b   :  { %419 = vmatpush1.bf16.xpose.msra.mxu0 %v621_v22 }
  0x2c   :  { %462 = vmatpush1.bf16.xpose.msra.mxu1 %v622_v23 }
  0x2d   :  { %7 = vsyncpa [#allocation3], 0  ;;  %420 = vmatprep.subr.bf16.mxu0 %v623_v24  ;;  %463 = vmatprep.subr.bf16.mxu1 %v625_v25  ;;  %v627_v27 = vld [vmem:[%s939_s1 + $0x60] ss:$8 sps:$4 sm:$0xff]   ;;  %v629_v29 = vld [vmem:[%s939_s1 + $0x74] ss:$8 sps:$4 sm:$0xff]  }
  0x2e   :  { %440 = vmatprep.mubr.bf16.mxu0 %v685_v26  ;;  %483 = vmatprep.mubr.bf16.mxu1 %v685_v26  ;;  %v628_v28 = vld [vmem:[%s939_s1 + $0x160] ss:$8 sps:$4 sm:$0xff]   ;;  %v631_v30 = vld [vmem:[%s939_s1 + $0x174] ss:$8 sps:$4 sm:$0xff]   ;;  %v633_v31 = vld [vmem:[%s939_s1 + $0x70] ss:$8 sps:$4 sm:$0xff]  }
  0x2f   :  { %v634_v32 = vld [vmem:[%s939_s1 + $0x170] ss:$8 sps:$4 sm:$0xff]   ;;  %v635_v33 = vld [vmem:[%s939_s1 + $0x84] ss:$8 sps:$4 sm:$0xff]   ;;  %v639_v35 = vld [vmem:[%s939_s1 + $0x80] ss:$8 sps:$4 sm:$0xff]  }
  0x30   :  { %v637_v34 = vld [vmem:[%s939_s1 + $0x184] ss:$8 sps:$4 sm:$0xff]   ;;  %v640_v36 = vld [vmem:[%s939_s1 + $0x180] ss:$8 sps:$4 sm:$0xff]   ;;  %v641_v37 = vld [vmem:[%s939_s1 + $0x94] ss:$8 sps:$4 sm:$0xff]  }
  0x31   :  { %v643_v38 = vld [vmem:[%s939_s1 + $0x194] ss:$8 sps:$4 sm:$0xff]   ;;  %v645_v39 = vld [vmem:[%s939_s1 + $0x90] ss:$8 sps:$4 sm:$0xff]   ;;  %v647_v41 = vld [vmem:[%s939_s1 + $0xa4] ss:$8 sps:$4 sm:$0xff]  }
  0x32   :  { %v646_v40 = vld [vmem:[%s939_s1 + $0x190] ss:$8 sps:$4 sm:$0xff]   ;;  %v649_v42 = vld [vmem:[%s939_s1 + $0x1a4] ss:$8 sps:$4 sm:$0xff]   ;;  %v651_v43 = vld [vmem:[%s939_s1 + $0xa0] ss:$8 sps:$4 sm:$0xff]  }
  0x33   :  { %421 = vmatpush1.bf16.xpose.msra.mxu0 %v627_v27  ;;  %v652_v44 = vld [vmem:[%s939_s1 + $0x1a0] ss:$8 sps:$4 sm:$0xff]   ;;  %v653_v45 = vld [vmem:[%s939_s1 + $0xb4] ss:$8 sps:$4 sm:$0xff]   ;;  %v657_v47 = vld [vmem:[%s939_s1 + $0xb0] ss:$8 sps:$4 sm:$0xff]  }
  0x34   :  { %464 = vmatpush1.bf16.xpose.msra.mxu1 %v628_v28  ;;  %422 = vmatprep.subr.bf16.mxu0 %v629_v29  ;;  %v655_v46 = vld [vmem:[%s939_s1 + $0x1b4] ss:$8 sps:$4 sm:$0xff]   ;;  %v658_v48 = vld [vmem:[%s939_s1 + $0x1b0] ss:$8 sps:$4 sm:$0xff]   ;;  %v659_v49 = vld [vmem:[%s939_s1 + $0xc4] ss:$8 sps:$4 sm:$0xff]  }
  0x35   :  { %465 = vmatprep.subr.bf16.mxu1 %v631_v30  ;;  %v661_v50 = vld [vmem:[%s939_s1 + $0x1c4] ss:$8 sps:$4 sm:$0xff]   ;;  %v663_v51 = vld [vmem:[%s939_s1 + $0xc0] ss:$8 sps:$4 sm:$0xff]   ;;  %v665_v53 = vld [vmem:[%s939_s1 + $0xd4] ss:$8 sps:$4 sm:$0xff]  }
  0x36   :  { %v664_v52 = vld [vmem:[%s939_s1 + $0x1c0] ss:$8 sps:$4 sm:$0xff]   ;;  %v667_v54 = vld [vmem:[%s939_s1 + $0x1d4] ss:$8 sps:$4 sm:$0xff]   ;;  %v669_v55 = vld [vmem:[%s939_s1 + $0xd0] ss:$8 sps:$4 sm:$0xff]  }
  0x37   :  { %v670_v56 = vld [vmem:[%s939_s1 + $0x1d0] ss:$8 sps:$4 sm:$0xff]   ;;  %v671_v57 = vld [vmem:[%s939_s1 + $0xe4] ss:$8 sps:$4 sm:$0xff]   ;;  %v675_v59 = vld [vmem:[%s939_s1 + $0xe0] ss:$8 sps:$4 sm:$0xff]  }
  0x38   :  { %v673_v58 = vld [vmem:[%s939_s1 + $0x1e4] ss:$8 sps:$4 sm:$0xff]   ;;  %v676_v60 = vld [vmem:[%s939_s1 + $0x1e0] ss:$8 sps:$4 sm:$0xff]   ;;  %v677_v61 = vld [vmem:[%s939_s1 + $0xf4] ss:$8 sps:$4 sm:$0xff]  }
  0x39   :  { %v679_v62 = vld [vmem:[%s939_s1 + $0x1f4] ss:$8 sps:$4 sm:$0xff]   ;;  %v681_v63 = vld [vmem:[%s939_s1 + $0xf0] ss:$8 sps:$4 sm:$0xff]   ;;  %v683_v1 = vld [vmem:[%s938_s0] ss:$8 sps:$4 sm:$0xff]  }
  0x3a   :  { %v682_v0 = vld [vmem:[%s939_s1 + $0x1f0] ss:$8 sps:$4 sm:$0xff]   ;;  %s710_s29 = smov [#allocation2]  }
  0x3b   :  { %423 = vmatpush1.bf16.xpose.msra.mxu0 %v633_v31  ;;  %s507_s30 = sshll.u32 %s710_s29, 4  ;;  %s508_s30 = int_to_ptr.vmem [resolvable:$true] %s507_s30 }
  0x3c   :  { %466 = vmatpush1.bf16.xpose.msra.mxu1 %v634_v32  ;;  %424 = vmatprep.subr.bf16.mxu0 %v635_v33  ;;  %s686_s0 = scalar_lea.vmem %s508_s30, 1024  ;;  %p691_p1 = scmp.lt.s32.totalorder %s508_s30, %s508_s30 }
  0x3d   :  { %467 = vmatprep.subr.bf16.mxu1 %v637_v34  ;;  %p687_p0 = scmp.ne.s32.totalorder %s508_s30, %s686_s0  ;;  %p692_p2 = scmp.lt.s32.totalorder %s686_s0, %s686_s0 }
  0x3f   :  { %p693_p3 = por %p692_p2, %p691_p1 }
  0x41   :  { %p694_p4 = pnand %p693_p3, %p687_p0 }
  0x43   :  { %425 = vmatpush1.bf16.xpose.msra.mxu0 %v639_v35 }
  0x44   :  { %468 = vmatpush1.bf16.xpose.msra.mxu1 %v640_v36  ;;  %426 = vmatprep.subr.bf16.mxu0 %v641_v37 }
  0x45   :  { %469 = vmatprep.subr.bf16.mxu1 %v643_v38 }
  0x4b   :  { %427 = vmatpush1.bf16.xpose.msra.mxu0 %v645_v39 }
  0x4c   :  { %470 = vmatpush1.bf16.xpose.msra.mxu1 %v646_v40  ;;  %428 = vmatprep.subr.bf16.mxu0 %v647_v41 }
  0x4d   :  { %471 = vmatprep.subr.bf16.mxu1 %v649_v42 }
  0x53   :  { %429 = vmatpush1.bf16.xpose.msra.mxu0 %v651_v43 }
  0x54   :  { %472 = vmatpush1.bf16.xpose.msra.mxu1 %v652_v44  ;;  %430 = vmatprep.subr.bf16.mxu0 %v653_v45 }
  0x55   :  { %473 = vmatprep.subr.bf16.mxu1 %v655_v46 }
  0x5b   :  { %431 = vmatpush1.bf16.xpose.msra.mxu0 %v657_v47 }
  0x5c   :  { %474 = vmatpush1.bf16.xpose.msra.mxu1 %v658_v48  ;;  %432 = vmatprep.subr.bf16.mxu0 %v659_v49 }
  0x5d   :  { %475 = vmatprep.subr.bf16.mxu1 %v661_v50 }
  0x63   :  { %433 = vmatpush1.bf16.xpose.msra.mxu0 %v663_v51 }
  0x64   :  { %476 = vmatpush1.bf16.xpose.msra.mxu1 %v664_v52  ;;  %434 = vmatprep.subr.bf16.mxu0 %v665_v53 }
  0x65   :  { %477 = vmatprep.subr.bf16.mxu1 %v667_v54 }
  0x6b   :  { %435 = vmatpush1.bf16.xpose.msra.mxu0 %v669_v55 }
  0x6c   :  { %478 = vmatpush1.bf16.xpose.msra.mxu1 %v670_v56  ;;  %436 = vmatprep.subr.bf16.mxu0 %v671_v57 }
  0x6d   :  { %479 = vmatprep.subr.bf16.mxu1 %v673_v58 }
  0x73   :  { %437 = vmatpush1.bf16.xpose.msra.mxu0 %v675_v59 }
  0x74   :  { %480 = vmatpush1.bf16.xpose.msra.mxu1 %v676_v60  ;;  %438 = vmatprep.subr.bf16.mxu0 %v677_v61 }
  0x75   :  { %481 = vmatprep.subr.bf16.mxu1 %v679_v62 }
  0x7b   :  { %439 = vmatpush1.bf16.xpose.msra.mxu0 %v681_v63 }
  0x7c   :  { %482 = vmatpush1.bf16.xpose.msra.mxu1 %v682_v0 }
  0x82   :  { %441 = vmatmul.mubr.bf16.vlgmr.msra.gmra.mrb[0].mxu0 %v683_v1 }
  0x83   :  { %484 = vmatmul.mubr.bf16.vlgmr.msra.gmra.mrb[0].mxu1 %v683_v1 }
 0x155   :  { %v442_v2 = vpop.f32.mrb[0].mxu0 }
 0x156   :  { %v485_v3 = vpop.f32.mrb[0].mxu1  ;;  %494 = vst [vmem:[#allocation2] sm:$0xff] %v442_v2  ;;  %v444_v4 = vpop.f32.mrb[1].mxu0 }
 0x157   :  { %496 = vst [vmem:[#allocation2 + $0x10] sm:$0xff] %v485_v3  ;;  %v487_v5 = vpop.f32.mrb[1].mxu1  ;;  %495 = vst [vmem:[#allocation2 + $0x8] sm:$0xff] %v444_v4  ;;  %v446_v6 = vpop.f32.mrb[2].mxu0 }
 0x158   :  { %497 = vst [vmem:[#allocation2 + $0x18] sm:$0xff] %v487_v5  ;;  %v489_v7 = vpop.f32.mrb[2].mxu1  ;;  %498 = vst [vmem:[#allocation2 + $0x20] sm:$0xff] %v446_v6  ;;  %v448_v8 = vpop.f32.mrb[3].mxu0 }
 0x159   :  { %500 = vst [vmem:[#allocation2 + $0x30] sm:$0xff] %v489_v7  ;;  %v491_v9 = vpop.f32.mrb[3].mxu1  ;;  %499 = vst [vmem:[#allocation2 + $0x28] sm:$0xff] %v448_v8 }
 0x15a   :  { %501 = vst [vmem:[#allocation2 + $0x38] sm:$0xff] %v491_v9 }
 0x15b   :  { %697 = shalt.err (!%p694_p4)
}
 0x15c   :  { %s698_s4 = scalar_lea.hbm %s940_s2, 1024 }
 0x15d   :  { %p699_p5 = scmp.ne.s32.totalorder %s940_s2, %s698_s4  ;;  %p702_p6 = scmp.lt.u32.totalorder %s698_s4, %s940_s2 }
 0x15f   :  { %p704_p7 = pnand %p702_p6, %p699_p5 }
 0x161   :  { %707 = shalt.err (!%p704_p7)
}
 0x162   :  { %s711_s9 = smov 512   ;;  %s712_s10 = smov 32  }
 0x163   :  { %513 = dma.vmem_to_hbm [thread:$0]  %s508_s30, 1024, %s940_s2, [#allocation3], %s711_s9, %s711_s9, %s712_s10  }
 0x164   :  { %708 = dma.done.wait [#allocation3], 1024  }
 0x165   :  { %709 = vsyncadd [#allocation3], 4294966272 }
 0x166   :  { %517 = vsyncpa [#allocation3], 1 }

// kernel: paligemma_forward.17
= control target key start
LH: loop header
LB: loop body
LE: loop exit
PB: predicated region body
PF: predicated region fallthrough
CT: control target
= control target key end

     0   :  { %s2008_s21 = smov 0   ;;  %s2451_s0 = inlined_call_operand.vmem [shape: bf16[2,8,256], index: 0, kind: input, shape index: {}]   ;;  %s2452_s1 = inlined_call_operand.vmem [shape: f32[1,256], index: 1, kind: input, shape index: {}]   ;;  %s2453_s2 = inlined_call_operand.vmem [shape: bf16[256,768], index: 2, kind: input, shape index: {}]   ;;  %s2454_s3 = inlined_call_operand.vmem [shape: bf16[256,256], index: 3, kind: input, shape index: {}]   ;;  %s2455_s4 = inlined_call_operand.vmem [shape: f32[2,8,128], index: 4, kind: input, shape index: {}]   ;;  %s2456_s5 = inlined_call_operand.vmem [shape: f32[2,8,128], index: 5, kind: input, shape index: {}]   ;;  %s2457_s6 = inlined_call_operand.vmem [shape: bf16[2,8,256], index: 6, kind: output, shape index: {}]  }
   0x1 LB: > { %s1570_s22 = sadd.s32 4294967295, %s1968_s21   ;;  %p1574_p0 = scmp.ge.s32.totalorder %s1968_s21, 1  ;;  %s1968_s21 = sphi %s2008_s21, %s16_s21  }
   0x2   : > { %p230_p1 = scmp.lt.s32.totalorder %s1968_s21, 3 }
   0x4   : > { %p231_p2 = pnand %p1574_p0, %p230_p1 }
   0x5   : > { %p268_p3 = scmp.lt.s32.totalorder (!%p231_p2), %s1570_s22, 1  ;;  %v1760_v0 = vld [vmem:[%s2453_s2 + $0x4] ss:$24 sps:$4 sm:$0xff] (!%p231_p2)   ;;  %v1762_v1 = vld [vmem:[%s2453_s2] ss:$24 sps:$4 sm:$0xff] (!%p231_p2)   ;;  %vm1972_vm0 = vmmov (!%p231_p2), 0  }
   0x6   : > { %234 = sbr.rel (%p231_p2) target bundleno = 1494 (0x5d6), region = 44  ;;  %894 = vmatprep.subr.bf16.mxu0 (!%p231_p2), %v1760_v0  ;;  %v1763_v2 = vld [vmem:[%s2453_s2 + $0xc] ss:$24 sps:$4 sm:$0xff] (!%p231_p2)   ;;  %v1765_v3 = vld [vmem:[%s2453_s2 + $0x8] ss:$24 sps:$4 sm:$0xff] (!%p231_p2)   ;;  %vm1089_vm1 = vcmask (!%p231_p2), 1043456  }
   0x7   : > { %895 = vmatpush1.bf16.msra.mxu0 (!%p231_p2), %v1762_v1  ;;  %v1766_v4 = vld [vmem:[%s2453_s2 + $0x34] ss:$24 sps:$4 sm:$0xff] (!%p231_p2)   ;;  %v1768_v5 = vld [vmem:[%s2453_s2 + $0x30] ss:$24 sps:$4 sm:$0xff] (!%p231_p2)   ;;  %935 = vmatprep.subr.bf16.mxu1 (!%p231_p2), %v1763_v2  ;;  %v1772_v9 = vld [vmem:[%s2453_s2 + $0x64] ss:$24 sps:$4 sm:$0xff] (!%p231_p2)  }
   0x8   : > { %v1769_v6 = vld [vmem:[%s2453_s2 + $0x3c] ss:$24 sps:$4 sm:$0xff] (!%p231_p2)   ;;  %936 = vmatpush1.bf16.msra.mxu1 (!%p231_p2), %v1765_v3  ;;  %896 = vmatprep.subr.bf16.mxu0 (!%p231_p2), %v1766_v4  ;;  %v1771_v7 = vld [vmem:[%s2453_s2 + $0x38] ss:$24 sps:$4 sm:$0xff] (!%p231_p2)   ;;  %v1775_v13 = vld [vmem:[%s2453_s2 + $0x6c] ss:$24 sps:$4 sm:$0xff] (!%p231_p2)  }
   0x9   : > { %937 = vmatprep.subr.bf16.mxu1 (!%p231_p2), %v1769_v6  ;;  %v1774_v10 = vld [vmem:[%s2453_s2 + $0x60] ss:$24 sps:$4 sm:$0xff] (!%p231_p2)   ;;  %v1778_v17 = vld [vmem:[%s2453_s2 + $0x94] ss:$24 sps:$4 sm:$0xff] (!%p231_p2)   ;;  %v1780_v20 = vld [vmem:[%s2453_s2 + $0x90] ss:$24 sps:$4 sm:$0xff] (!%p231_p2)  }
   0xa   : > { %v1777_v16 = vld [vmem:[%s2453_s2 + $0x68] ss:$24 sps:$4 sm:$0xff] (!%p231_p2)   ;;  %v1781_v18 = vld [vmem:[%s2453_s2 + $0x9c] ss:$24 sps:$4 sm:$0xff] (!%p231_p2)   ;;  %v1783_v22 = vld [vmem:[%s2453_s2 + $0x98] ss:$24 sps:$4 sm:$0xff] (!%p231_p2)  }
   0xb   : > { %897 = vmatpush1.bf16.msra.mxu0 (!%p231_p2), %v1768_v5  ;;  %v1784_v21 = vld [vmem:[%s2453_s2 + $0xc4] ss:$24 sps:$4 sm:$0xff] (!%p231_p2)   ;;  %v1786_v24 = vld [vmem:[%s2453_s2 + $0xc0] ss:$24 sps:$4 sm:$0xff] (!%p231_p2)   ;;  %v1790_v25 = vld [vmem:[%s2453_s2 + $0xf4] ss:$24 sps:$4 sm:$0xff] (!%p231_p2)  }
   0xc   : > { %898 = vmatprep.subr.bf16.mxu0 (!%p231_p2), %v1772_v9  ;;  %938 = vmatpush1.bf16.msra.mxu1 (!%p231_p2), %v1771_v7  ;;  %v1787_v23 = vld [vmem:[%s2453_s2 + $0xcc] ss:$24 sps:$4 sm:$0xff] (!%p231_p2)   ;;  %v1789_v26 = vld [vmem:[%s2453_s2 + $0xc8] ss:$24 sps:$4 sm:$0xff] (!%p231_p2)   ;;  %v1793_v27 = vld [vmem:[%s2453_s2 + $0xfc] ss:$24 sps:$4 sm:$0xff] (!%p231_p2)   ;;  %v304_v9 = vlaneseq (!%p231_p2) }
   0xd   : > { %s2459_s22 = smov (!%p268_p3, %s1570_s22), 1  ;;  %939 = vmatprep.subr.bf16.mxu1 %v1775_v13  ;;  %v1792_v28 = vld [vmem:[%s2453_s2 + $0xf0] ss:$24 sps:$4 sm:$0xff]   ;;  %v1796_v29 = vld [vmem:[%s2453_s2 + $0x124] ss:$24 sps:$4 sm:$0xff]   ;;  %vm1072_vm2 = vcmask 64512  }
   0xe   : > { %s2034_s11 = sshll.u32 %s2459_s22, 3  ;;  %v1795_v30 = vld [vmem:[%s2453_s2 + $0xf8] ss:$24 sps:$4 sm:$0xff]   ;;  %v1799_v31 = vld [vmem:[%s2453_s2 + $0x12c] ss:$24 sps:$4 sm:$0xff]   ;;  %v305_v13 = vshrl.u32 %v304_v9, 7 }
   0xf   : > { %s272_s16 = scalar_lea.vmem %s2451_s0, %s2034_s11  ;;  %899 = vmatpush1.bf16.msra.mxu0 %v1774_v10  ;;  %v1798_v32 = vld [vmem:[%s2453_s2 + $0x120] ss:$24 sps:$4 sm:$0xff]   ;;  %v1802_v33 = vld [vmem:[%s2453_s2 + $0x154] ss:$24 sps:$4 sm:$0xff]   ;;  %v1804_v36 = vld [vmem:[%s2453_s2 + $0x150] ss:$24 sps:$4 sm:$0xff]   ;;  %s276_s25 = scalar_lea.vmem %s2455_s4, %s2034_s11 }
  0x10   : > { %v287_v8 = vld [vmem:[%s272_s16] sm:$0xff]  ;;  %900 = vmatprep.subr.bf16.mxu0 %v1778_v17  ;;  %940 = vmatpush1.bf16.msra.mxu1 %v1777_v16  ;;  %v1805_v35 = vld [vmem:[%s2453_s2 + $0x15c] ss:$24 sps:$4 sm:$0xff]   ;;  %v1807_v38 = vld [vmem:[%s2453_s2 + $0x158] ss:$24 sps:$4 sm:$0xff]   ;;  %v310_v16 = vsub.s32 1, %v305_v13  ;;  %s280_s28 = scalar_lea.vmem %s2456_s5, %s2034_s11  ;;  %s285_s29 = scalar_lea.vmem %s2457_s6, %s2034_s11 }
  0x11   : > { %v2052_v11 = vunpack.c.l.bf16 %v287_v8  ;;  %v2054_v12 = vunpack.c.h.bf16 %v287_v8  ;;  %941 = vmatprep.subr.bf16.mxu1 %v1781_v18  ;;  %v1801_v34 = vld [vmem:[%s2453_s2 + $0x128] ss:$24 sps:$4 sm:$0xff]   ;;  %v1808_v37 = vld [vmem:[%s2453_s2 + $0x184] ss:$24 sps:$4 sm:$0xff]   ;;  %v1814_v41 = vld [vmem:[%s2453_s2 + $0x1b4] ss:$24 sps:$4 sm:$0xff]  }
  0x12   : > { %v1811_v39 = vld [vmem:[%s2453_s2 + $0x18c] ss:$24 sps:$4 sm:$0xff]   ;;  %v1810_v40 = vld [vmem:[%s2453_s2 + $0x180] ss:$24 sps:$4 sm:$0xff]   ;;  %v1817_v43 = vld [vmem:[%s2453_s2 + $0x1bc] ss:$24 sps:$4 sm:$0xff]  }
  0x13   : > { %v291_v14 = vmul.f32 %v2052_v11, %v2052_v11  ;;  %v292_v15 = vmul.f32 %v2054_v12, %v2054_v12  ;;  %901 = vmatpush1.bf16.msra.mxu0 %v1780_v20  ;;  %v1813_v42 = vld [vmem:[%s2453_s2 + $0x188] ss:$24 sps:$4 sm:$0xff]   ;;  %v1820_v45 = vld [vmem:[%s2453_s2 + $0x1e4] ss:$24 sps:$4 sm:$0xff]   ;;  %v1819_v46 = vld [vmem:[%s2453_s2 + $0x1b8] ss:$24 sps:$4 sm:$0xff]  }
  0x14   : > { %902 = vmatprep.subr.bf16.mxu0 %v1784_v21  ;;  %942 = vmatpush1.bf16.msra.mxu1 %v1783_v22  ;;  %v1816_v44 = vld [vmem:[%s2453_s2 + $0x1b0] ss:$24 sps:$4 sm:$0xff]   ;;  %v1823_v47 = vld [vmem:[%s2453_s2 + $0x1ec] ss:$24 sps:$4 sm:$0xff]   ;;  %v1822_v48 = vld [vmem:[%s2453_s2 + $0x1e0] ss:$24 sps:$4 sm:$0xff]  }
  0x15   : > { %v293_v19 = vadd.f32 %v292_v15, %v291_v14  ;;  %943 = vmatprep.subr.bf16.mxu1 %v1787_v23  ;;  %v1826_v49 = vld [vmem:[%s2453_s2 + $0x214] ss:$24 sps:$4 sm:$0xff]   ;;  %v1825_v50 = vld [vmem:[%s2453_s2 + $0x1e8] ss:$24 sps:$4 sm:$0xff]   ;;  %v1831_v53 = vld [vmem:[%s2453_s2 + $0x218] ss:$24 sps:$4 sm:$0xff]  }
  0x16   : > { %v1828_v51 = vld [vmem:[%s2453_s2 + $0x210] ss:$24 sps:$4 sm:$0xff]   ;;  %v1829_v52 = vld [vmem:[%s2453_s2 + $0x21c] ss:$24 sps:$4 sm:$0xff]   ;;  %v1834_v55 = vld [vmem:[%s2453_s2 + $0x240] ss:$24 sps:$4 sm:$0xff]  }
  0x17   : > { %294 = vadd.xlane.f32.xlu0 %v293_v19  ;;  %903 = vmatpush1.bf16.msra.mxu0 %v1786_v24  ;;  %v1832_v54 = vld [vmem:[%s2453_s2 + $0x244] ss:$24 sps:$4 sm:$0xff]   ;;  %v1837_v57 = vld [vmem:[%s2453_s2 + $0x248] ss:$24 sps:$4 sm:$0xff]   ;;  %v1838_v58 = vld [vmem:[%s2453_s2 + $0x274] ss:$24 sps:$4 sm:$0xff]  }
  0x18   : > { %904 = vmatprep.subr.bf16.mxu0 %v1790_v25  ;;  %944 = vmatpush1.bf16.msra.mxu1 %v1789_v26  ;;  %v1835_v56 = vld [vmem:[%s2453_s2 + $0x24c] ss:$24 sps:$4 sm:$0xff]   ;;  %v1840_v59 = vld [vmem:[%s2453_s2 + $0x270] ss:$24 sps:$4 sm:$0xff]   ;;  %v1841_v60 = vld [vmem:[%s2453_s2 + $0x27c] ss:$24 sps:$4 sm:$0xff]  }
  0x19   : > { %945 = vmatprep.subr.bf16.mxu1 %v1793_v27  ;;  %v1844_v61 = vld [vmem:[%s2453_s2 + $0x2a4] ss:$24 sps:$4 sm:$0xff]   ;;  %v1843_v62 = vld [vmem:[%s2453_s2 + $0x278] ss:$24 sps:$4 sm:$0xff]   ;;  %v1850_v1 = vld [vmem:[%s2453_s2 + $0x2d4] ss:$24 sps:$4 sm:$0xff]  }
  0x1a   : > { %v1846_v63 = vld [vmem:[%s2453_s2 + $0x2a0] ss:$24 sps:$4 sm:$0xff]   ;;  %v1847_v0 = vld [vmem:[%s2453_s2 + $0x2ac] ss:$24 sps:$4 sm:$0xff]   ;;  %v1852_v3 = vld [vmem:[%s2453_s2 + $0x2d0] ss:$24 sps:$4 sm:$0xff]  }
  0x1b   : > { %905 = vmatpush1.bf16.msra.mxu0 %v1792_v28  ;;  %v1849_v2 = vld [vmem:[%s2453_s2 + $0x2a8] ss:$24 sps:$4 sm:$0xff]   ;;  %v1853_v4 = vld [vmem:[%s2453_s2 + $0x2dc] ss:$24 sps:$4 sm:$0xff]   ;;  %v1855_v6 = vld [vmem:[%s2453_s2 + $0x2d8] ss:$24 sps:$4 sm:$0xff]  }
  0x1c   : > { %906 = vmatprep.subr.bf16.mxu0 %v1796_v29  ;;  %946 = vmatpush1.bf16.msra.mxu1 %v1795_v30  ;;  %v1858_v5 = vld [vmem:[%s2453_s2 + $0x14] ss:$24 sps:$4 sm:$0xff]   ;;  %v290_v14 = vld [vmem:[%s2452_s1] sm:$0x3]  ;;  %v306_v17 = vsub.s32 0, %v305_v13  ;;  %s1971_s22 = smov 64  }
  0x1d   : > { %947 = vmatprep.subr.bf16.mxu1 %v1799_v31  ;;  %v302_v15 = vadd.f32 1.0, %v290_v14  ;;  %v1856_v26 = vld [vmem:[%s2453_s2 + $0x10] ss:$24 sps:$4 sm:$0xff]   ;;  %v1861_v28 = vld [vmem:[%s2453_s2 + $0x44] ss:$24 sps:$4 sm:$0xff]  }
  0x1e   : > { %v1859_v29 = vld [vmem:[%s2453_s2 + $0x40] ss:$24 sps:$4 sm:$0xff]   ;;  %v1864_v30 = vld [vmem:[%s2453_s2 + $0x74] ss:$24 sps:$4 sm:$0xff]   ;;  %v1862_v31 = vld [vmem:[%s2453_s2 + $0x70] ss:$24 sps:$4 sm:$0xff]  }
  0x1f   : > { %907 = vmatpush1.bf16.msra.mxu0 %v1798_v32  ;;  %v311_v18 = vrot.slane %v302_v15, %v310_v16  ;;  %v307_v19 = vrot.slane %v302_v15, %v306_v17  ;;  %v1867_v32 = vld [vmem:[%s2453_s2 + $0xa4] ss:$24 sps:$4 sm:$0xff]  }
  0x20   : > { %908 = vmatprep.subr.bf16.mxu0 %v1802_v33  ;;  %948 = vmatpush1.bf16.msra.mxu1 %v1801_v34  ;;  %v1865_v33 = vld [vmem:[%s2453_s2 + $0xa0] ss:$24 sps:$4 sm:$0xff]   ;;  %v1870_v34 = vld [vmem:[%s2453_s2 + $0xd4] ss:$24 sps:$4 sm:$0xff]  }
  0x21   : > { %949 = vmatprep.subr.bf16.mxu1 %v1805_v35  ;;  %v1868_v35 = vld [vmem:[%s2453_s2 + $0xd0] ss:$24 sps:$4 sm:$0xff]  }
  0x23   : > { %909 = vmatpush1.bf16.msra.mxu0 %v1804_v36  ;;  %v1873_v36 = vld [vmem:[%s2453_s2 + $0x104] ss:$24 sps:$4 sm:$0xff]  }
  0x24   : > { %910 = vmatprep.subr.bf16.mxu0 %v1808_v37  ;;  %950 = vmatpush1.bf16.msra.mxu1 %v1807_v38  ;;  %v1871_v37 = vld [vmem:[%s2453_s2 + $0x100] ss:$24 sps:$4 sm:$0xff]   ;;  %v1876_v38 = vld [vmem:[%s2453_s2 + $0x134] ss:$24 sps:$4 sm:$0xff]  }
  0x25   : > { %951 = vmatprep.subr.bf16.mxu1 %v1811_v39  ;;  %v1874_v39 = vld [vmem:[%s2453_s2 + $0x130] ss:$24 sps:$4 sm:$0xff]  }
  0x27   : > { %911 = vmatpush1.bf16.msra.mxu0 %v1810_v40  ;;  %v1879_v40 = vld [vmem:[%s2453_s2 + $0x164] ss:$24 sps:$4 sm:$0xff]  }
  0x28   : > { %912 = vmatprep.subr.bf16.mxu0 %v1814_v41  ;;  %952 = vmatpush1.bf16.msra.mxu1 %v1813_v42  ;;  %v1877_v41 = vld [vmem:[%s2453_s2 + $0x160] ss:$24 sps:$4 sm:$0xff]   ;;  %v1882_v42 = vld [vmem:[%s2453_s2 + $0x194] ss:$24 sps:$4 sm:$0xff]  }
  0x29   : > { %953 = vmatprep.subr.bf16.mxu1 %v1817_v43  ;;  %v1880_v43 = vld [vmem:[%s2453_s2 + $0x190] ss:$24 sps:$4 sm:$0xff]  }
  0x2b   : > { %913 = vmatpush1.bf16.msra.mxu0 %v1816_v44  ;;  %v1885_v44 = vld [vmem:[%s2453_s2 + $0x1c4] ss:$24 sps:$4 sm:$0xff]  }
  0x2c   : > { %914 = vmatprep.subr.bf16.mxu0 %v1820_v45  ;;  %954 = vmatpush1.bf16.msra.mxu1 %v1819_v46  ;;  %v1883_v45 = vld [vmem:[%s2453_s2 + $0x1c0] ss:$24 sps:$4 sm:$0xff]   ;;  %v1888_v46 = vld [vmem:[%s2453_s2 + $0x1f4] ss:$24 sps:$4 sm:$0xff]  }
  0x2d   : > { %955 = vmatprep.subr.bf16.mxu1 %v1823_v47  ;;  %v1886_v47 = vld [vmem:[%s2453_s2 + $0x1f0] ss:$24 sps:$4 sm:$0xff]  }
  0x2f   : > { %915 = vmatpush1.bf16.msra.mxu0 %v1822_v48  ;;  %v1891_v48 = vld [vmem:[%s2453_s2 + $0x224] ss:$24 sps:$4 sm:$0xff]  }
  0x30   : > { %916 = vmatprep.subr.bf16.mxu0 %v1826_v49  ;;  %956 = vmatpush1.bf16.msra.mxu1 %v1825_v50  ;;  %v1889_v49 = vld [vmem:[%s2453_s2 + $0x220] ss:$24 sps:$4 sm:$0xff]   ;;  %v1894_v50 = vld [vmem:[%s2453_s2 + $0x254] ss:$24 sps:$4 sm:$0xff]  }
  0x31   : > { %957 = vmatprep.subr.bf16.mxu1 %v1829_v52  ;;  %v1897_v52 = vld [vmem:[%s2453_s2 + $0x284] ss:$24 sps:$4 sm:$0xff]  }
  0x33   : > { %917 = vmatpush1.bf16.msra.mxu0 %v1828_v51  ;;  %v1892_v51 = vld [vmem:[%s2453_s2 + $0x250] ss:$24 sps:$4 sm:$0xff]  }
  0x34   : > { %918 = vmatprep.subr.bf16.mxu0 %v1832_v54  ;;  %958 = vmatpush1.bf16.msra.mxu1 %v1831_v53  ;;  %v1895_v53 = vld [vmem:[%s2453_s2 + $0x280] ss:$24 sps:$4 sm:$0xff]   ;;  %v1900_v54 = vld [vmem:[%s2453_s2 + $0x2b4] ss:$24 sps:$4 sm:$0xff]  }
  0x35   : > { %959 = vmatprep.subr.bf16.mxu1 %v1835_v56  ;;  %v1903_v56 = vld [vmem:[%s2453_s2 + $0x2e4] ss:$24 sps:$4 sm:$0xff]  }
  0x37   : > { %919 = vmatpush1.bf16.msra.mxu0 %v1834_v55  ;;  %v1898_v55 = vld [vmem:[%s2453_s2 + $0x2b0] ss:$24 sps:$4 sm:$0xff]  }
  0x38   : > { %920 = vmatprep.subr.bf16.mxu0 %v1838_v58  ;;  %960 = vmatpush1.bf16.msra.mxu1 %v1837_v57  ;;  %v1901_v57 = vld [vmem:[%s2453_s2 + $0x2e0] ss:$24 sps:$4 sm:$0xff]   ;;  %v1970_v58 = vmov 0.0  }
  0x39   : > { %961 = vmatprep.subr.bf16.mxu1 %v1841_v60 }
  0x3b   : > { %921 = vmatpush1.bf16.msra.mxu0 %v1840_v59 }
  0x3c   : > { %922 = vmatprep.subr.bf16.mxu0 %v1844_v61  ;;  %962 = vmatpush1.bf16.msra.mxu1 %v1843_v62 }
  0x3d   : > { %963 = vmatprep.subr.bf16.mxu1 %v1847_v0 }
  0x3f   : > { %923 = vmatpush1.bf16.msra.mxu0 %v1846_v63 }
  0x40   : > { %924 = vmatprep.subr.bf16.mxu0 %v1850_v1  ;;  %964 = vmatpush1.bf16.msra.mxu1 %v1849_v2 }
  0x41   : > { %965 = vmatprep.subr.bf16.mxu1 %v1853_v4 }
  0x43   : > { %925 = vmatpush1.bf16.msra.mxu0 %v1852_v3 }
  0x44   : > { %976 = vmatprep.subr.bf16.mxu0 %v1858_v5  ;;  %966 = vmatpush1.bf16.msra.mxu1 %v1855_v6 }
  0x45   : > { %1737 = vmatprep.subr.bf16.mxu1 %v1970_v58 }
  0xa4   : > { %v295_v7 = vpop.xlane.xlu0 %294 }
  0xa5   : > { %v297_v8 = vmul.f32 0.00390625, %v295_v7  ;;  %v1017_v7 = vld [vmem:[%s276_s25] sm:$0xff] }
  0xa7   : > { %v298_v10 = vadd.f32 1e-06, %v297_v8  ;;  %v1018_v8 = vld [vmem:[%s280_s28] sm:$0xff] }
  0xa9   : > { %1952 = vrsqrt.f32 %v298_v10 }
  0xb3   : > { %v1953_v20 = vpop.eup %1952 }
  0xb4   : > { %v301_v21 = vmul.f32 %v1953_v20, %v2054_v12  ;;  %v300_v22 = vmul.f32 %v1953_v20, %v2052_v11 }
  0xb6   : > { %v315_v23 = vmul.f32 %v311_v18, %v301_v21  ;;  %v314_v24 = vmul.f32 %v307_v19, %v300_v22 }
  0xb8   : > { %v317_v25 = vpack.c.bf16 %v315_v23, %v315_v23  ;;  %v2233_v27 = vpack.c.bf16 %v314_v24, %v314_v24 }
  0xba   : > { %926 = vmatprep.mubr.bf16.mxu0 %v317_v25  ;;  %967 = vmatprep.mubr.bf16.mxu1 %v317_v25 }
  0xbb   : > { %927 = vmatmul.mubr.bf16.vlgmr.msra.gmra.mrb[0].mxu0 %v2233_v27  ;;  %968 = vmatmul.mubr.bf16.vlgmr.msra.gmra.mrb[0].mxu1 %v2233_v27 }
  0xbc   : > { %977 = vmatpush1.bf16.msra.mxu0 %v1856_v26  ;;  %1008 = vmatprep.mubr.bf16.mxu0 %v317_v25 }
  0xbd   : > { %978 = vmatprep.subr.bf16.mxu0 %v1861_v28  ;;  %1739 = vmatprep.mubr.msk.bf16.mxu1 %vm1972_vm0, %v1970_v58 }
  0xc0   : > { %979 = vmatpush1.bf16.msra.mxu0 %v1859_v29 }
  0xc1   : > { %980 = vmatprep.subr.bf16.mxu0 %v1864_v30 }
  0xc4   : > { %981 = vmatpush1.bf16.msra.mxu0 %v1862_v31 }
  0xc5   : > { %982 = vmatprep.subr.bf16.mxu0 %v1867_v32 }
  0xc8   : > { %983 = vmatpush1.bf16.msra.mxu0 %v1865_v33 }
  0xc9   : > { %984 = vmatprep.subr.bf16.mxu0 %v1870_v34 }
  0xcc   : > { %985 = vmatpush1.bf16.msra.mxu0 %v1868_v35 }
  0xcd   : > { %986 = vmatprep.subr.bf16.mxu0 %v1873_v36 }
  0xd0   : > { %987 = vmatpush1.bf16.msra.mxu0 %v1871_v37 }
  0xd1   : > { %988 = vmatprep.subr.bf16.mxu0 %v1876_v38 }
  0xd4   : > { %989 = vmatpush1.bf16.msra.mxu0 %v1874_v39 }
  0xd5   : > { %990 = vmatprep.subr.bf16.mxu0 %v1879_v40 }
  0xd8   : > { %991 = vmatpush1.bf16.msra.mxu0 %v1877_v41 }
  0xd9   : > { %992 = vmatprep.subr.bf16.mxu0 %v1882_v42 }
  0xdc   : > { %993 = vmatpush1.bf16.msra.mxu0 %v1880_v43 }
  0xdd   : > { %994 = vmatprep.subr.bf16.mxu0 %v1885_v44 }
  0xe0   : > { %995 = vmatpush1.bf16.msra.mxu0 %v1883_v45 }
  0xe1   : > { %996 = vmatprep.subr.bf16.mxu0 %v1888_v46 }
  0xe4   : > { %997 = vmatpush1.bf16.msra.mxu0 %v1886_v47 }
  0xe5   : > { %998 = vmatprep.subr.bf16.mxu0 %v1891_v48 }
  0xe8   : > { %999 = vmatpush1.bf16.msra.mxu0 %v1889_v49 }
  0xe9   : > { %1000 = vmatprep.subr.bf16.mxu0 %v1894_v50 }
  0xec   : > { %1001 = vmatpush1.bf16.msra.mxu0 %v1892_v51 }
  0xed   : > { %1002 = vmatprep.subr.bf16.mxu0 %v1897_v52 }
  0xf0   : > { %1003 = vmatpush1.bf16.msra.mxu0 %v1895_v53 }
  0xf1   : > { %1004 = vmatprep.subr.bf16.mxu0 %v1900_v54 }
  0xf4   : > { %1005 = vmatpush1.bf16.msra.mxu0 %v1898_v55 }
  0xf5   : > { %1006 = vmatprep.subr.bf16.mxu0 %v1903_v56 }
  0xf8   : > { %1007 = vmatpush1.bf16.msra.mxu0 %v1901_v57  ;;  %v1906_v57 = vld [vmem:[%s2454_s3 + $0x4] ss:$8 sps:$4 sm:$0xff]  }
  0xf9   : > { %1725 = vmatprep.subr.bf16.mxu0 %v1970_v58 }
  0xfb   : > { %1009 = vmatmul.mubr.bf16.vlgmr.msra.gmra.mrb[4].mxu0 %v2233_v27 }
  0xfc   : > { %1727 = vmatprep.mubr.msk.bf16.mxu0 %vm1972_vm0, %v1970_v58 }
 0x18e   : > { %v928_v59 = vpop.f32.mrb[0].mxu0  ;;  %v969_v60 = vpop.f32.mrb[0].mxu1 }
 0x18f   : > { %1025 = vrot.lane.b32.xlu1 %v969_v60, %s1971_s22  ;;  %v930_v61 = vpop.f32.mrb[1].mxu0  ;;  %v971_v62 = vpop.f32.mrb[1].mxu1  ;;  %v1024_v10 = vmul.f32 %v1017_v7, %v969_v60  ;;  %v1019_v25 = vmul.f32 %v1017_v7, %v928_v59 }
 0x190   : > { %1139 = vrot.lane.b32.xlu0 %v971_v62, %s1971_s22  ;;  %v932_v63 = vpop.f32.mrb[2].mxu0  ;;  %v973_v0 = vpop.f32.mrb[2].mxu1  ;;  %v1138_v15 = vmul.f32 %v1017_v7, %v971_v62  ;;  %v1133_v23 = vmul.f32 %v1017_v7, %v930_v61  ;;  %v1904_v62 = vld [vmem:[%s2454_s3] ss:$8 sps:$4 sm:$0xff]   ;;  %v1915_v7 = vld [vmem:[%s2454_s3 + $0x34] ss:$8 sps:$4 sm:$0xff]  }
 0x191   : > { %v933_v1 = vpop.f32.mrb[3].mxu0  ;;  %v974_v2 = vpop.f32.mrb[3].mxu1  ;;  %v1909_v0 = vld [vmem:[%s2454_s3 + $0x14] ss:$8 sps:$4 sm:$0xff]  }
 0x193   : > { %1134 = vrot.lane.b32.xlu1 %v930_v61, %s1971_s22 }
 0x197   : > { %1020 = vrot.lane.b32.xlu1 %v928_v59, %s1971_s22 }
 0x1ce   : > { %v1010_v3 = vpop.f32.mrb[4].mxu0 }
 0x1cf   : > { %v1012_v4 = vpop.f32.mrb[5].mxu0  ;;  %v1085_v28 = vpack.c.bf16 %v1010_v3, %v1010_v3  ;;  %v1907_v3 = vld [vmem:[%s2454_s3 + $0x10] ss:$8 sps:$4 sm:$0xff]  }
 0x1d0   : > { %v1014_v5 = vpop.f32.mrb[6].mxu0  ;;  %v1198_v29 = vpack.c.bf16 %v1012_v4, %v1012_v4 }
 0x1d1   : > { %v1015_v6 = vpop.f32.mrb[7].mxu0  ;;  %v1091_v33 = vsel %vm1089_vm1, %v1085_v28, 0  ;;  %v1912_v5 = vld [vmem:[%s2454_s3 + $0x24] ss:$8 sps:$4 sm:$0xff]   ;;  %v1940_v28 = vld [vmem:[%s2454_s3 + $0xc0] ss:$8 sps:$4 sm:$0xff]  }
 0x1d2   : > { %v1203_v34 = vsel %vm1089_vm1, %v1198_v29, 0  ;;  %v1910_v6 = vld [vmem:[%s2454_s3 + $0x20] ss:$8 sps:$4 sm:$0xff]   ;;  %v1945_v29 = vld [vmem:[%s2454_s3 + $0xd4] ss:$8 sps:$4 sm:$0xff]  }
 0x201   : > { %v1026_v9 = vpop.permute.xlu1 %1025 }
 0x202   : > { %v1027_v13 = vmul.f32 %v1026_v9, %v1018_v8  ;;  %v1140_v14 = vpop.permute.xlu0 %1139  ;;  %v1918_v9 = vld [vmem:[%s2454_s3 + $0x44] ss:$8 sps:$4 sm:$0xff]  }
 0x203   : > { %v1141_v16 = vmul.f32 %v1140_v14, %v1018_v8  ;;  %v1919_v14 = vld [vmem:[%s2454_s3 + $0x50] ss:$8 sps:$4 sm:$0xff]  }
 0x204   : > { %v1028_v17 = vadd.f32 %v1027_v13, %v1024_v10  ;;  %v1916_v10 = vld [vmem:[%s2454_s3 + $0x40] ss:$8 sps:$4 sm:$0xff]   ;;  %v1921_v13 = vld [vmem:[%s2454_s3 + $0x54] ss:$8 sps:$4 sm:$0xff]  }
 0x205   : > { %v1142_v18 = vadd.f32 %v1141_v16, %v1138_v15  ;;  %v1135_v19 = vpop.permute.xlu1 %1134  ;;  %v1924_v15 = vld [vmem:[%s2454_s3 + $0x64] ss:$8 sps:$4 sm:$0xff]   ;;  %v1922_v16 = vld [vmem:[%s2454_s3 + $0x60] ss:$8 sps:$4 sm:$0xff]  }
 0x206   : > { %v1030_v20 = vpack.c.bf16 %v1028_v17, %v1028_v17  ;;  %v1136_v21 = vmul.f32 %v1135_v19, %v1018_v8  ;;  %v1927_v17 = vld [vmem:[%s2454_s3 + $0x74] ss:$8 sps:$4 sm:$0xff]   ;;  %v1930_v19 = vld [vmem:[%s2454_s3 + $0x84] ss:$8 sps:$4 sm:$0xff]  }
 0x207   : > { %v1144_v22 = vpack.c.bf16 %v1142_v18, %v1142_v18  ;;  %v1925_v18 = vld [vmem:[%s2454_s3 + $0x70] ss:$8 sps:$4 sm:$0xff]  }
 0x208   : > { %1726 = vmatpush3.bf16.xpose.msra.mxu0 %v1030_v20  ;;  %v1137_v26 = vadd.f32 %v1136_v21, %v1133_v23  ;;  %v1928_v20 = vld [vmem:[%s2454_s3 + $0x80] ss:$8 sps:$4 sm:$0xff]   ;;  %v1933_v21 = vld [vmem:[%s2454_s3 + $0x94] ss:$8 sps:$4 sm:$0xff]   ;;  %v1936_v23 = vld [vmem:[%s2454_s3 + $0xa4] ss:$8 sps:$4 sm:$0xff]  }
 0x209   : > { %1738 = vmatpush3.bf16.xpose.msra.mxu1 %v1144_v22  ;;  %v1021_v24 = vpop.permute.xlu1 %1020  ;;  %1731 = vmatprep.subr.bf16.mxu0 %v1970_v58  ;;  %v1931_v22 = vld [vmem:[%s2454_s3 + $0x90] ss:$8 sps:$4 sm:$0xff]  }
 0x20a   : > { %v1022_v27 = vmul.f32 %v1021_v24, %v1018_v8  ;;  %1743 = vmatprep.subr.bf16.mxu1 %v1970_v58  ;;  %v1143_v31 = vpack.c.bf16 %v1137_v26, %v1137_v26  ;;  %v1913_v8 = vld [vmem:[%s2454_s3 + $0x30] ss:$8 sps:$4 sm:$0xff]   ;;  %v1934_v24 = vld [vmem:[%s2454_s3 + $0xa0] ss:$8 sps:$4 sm:$0xff]  }
 0x20b   : > { %v1937_v26 = vld [vmem:[%s2454_s3 + $0xb0] ss:$8 sps:$4 sm:$0xff]  }
 0x20c   : > { %v1023_v30 = vadd.f32 %v1022_v27, %v1019_v25  ;;  %v1939_v25 = vld [vmem:[%s2454_s3 + $0xb4] ss:$8 sps:$4 sm:$0xff]   ;;  %v1942_v27 = vld [vmem:[%s2454_s3 + $0xc4] ss:$8 sps:$4 sm:$0xff]  }
 0x20e   : > { %v1029_v32 = vpack.c.bf16 %v1023_v30, %v1023_v30  ;;  %v1943_v30 = vld [vmem:[%s2454_s3 + $0xd0] ss:$8 sps:$4 sm:$0xff]  }
 0x210   : > { %1728 = vmatmul.mubr.bf16.vlgmr.msra.gmra.mrb[8].mxu0 %v1029_v32  ;;  %1740 = vmatmul.mubr.bf16.vlgmr.msra.gmra.mrb[4].mxu1 %v1143_v31  ;;  %v1948_v31 = vld [vmem:[%s2454_s3 + $0xe4] ss:$8 sps:$4 sm:$0xff]   ;;  %v1946_v32 = vld [vmem:[%s2454_s3 + $0xe0] ss:$8 sps:$4 sm:$0xff]  }
 0x211   : > { %1732 = vmatpush3.bf16.msra.mxu0 %v1091_v33  ;;  %1744 = vmatpush3.bf16.msra.mxu1 %v1203_v34  ;;  %v1951_v33 = vld [vmem:[%s2454_s3 + $0xf4] ss:$8 sps:$4 sm:$0xff]   ;;  %v1949_v34 = vld [vmem:[%s2454_s3 + $0xf0] ss:$8 sps:$4 sm:$0xff]  }
 0x212   : > { %1745 = vmatprep.mubr.msk.bf16.mxu1 %vm1972_vm0, %v1970_v58  ;;  %1733 = vmatprep.mubr.msk.bf16.mxu0 %vm1972_vm0, %v1970_v58 }
 0x213   : > { %1439 = vmatprep.subr.bf16.mxu1 %v1906_v57 }
 0x2e3   : > { %v1065_v35 = vpop.f32.mrb[8].mxu0  ;;  %v1179_v36 = vpop.f32.mrb[4].mxu1 }
 0x2e4   : > { %v1071_v37 = vmul.f32 0.088388346, %v1065_v35  ;;  %v1185_v38 = vmul.f32 0.088388346, %v1179_v36  ;;  %v1729_v39 = vpop.f32.mrb[9].mxu0  ;;  %v1741_v40 = vpop.f32.mrb[5].mxu1 }
 0x2e5   : > { %v1068_v41 = vpop.f32.mrb[10].mxu0  ;;  %v1182_v42 = vpop.f32.mrb[6].mxu1 }
 0x2e6   : > { %v1730_v43 = vpop.f32.mrb[11].mxu0  ;;  %v1742_v44 = vpop.f32.mrb[7].mxu1  ;;  %v1186_v45 = vsel %vm1072_vm2, %v1185_v38, -inf  ;;  %v1073_v46 = vsel %vm1072_vm2, %v1071_v37, -inf }
 0x2e7   : > { %1187 = vmax.xlane.f32.xlu1 %v1186_v45  ;;  %1074 = vmax.xlane.f32.xlu0 %v1073_v46 }
 0x374   : > { %v1188_v47 = vpop.xlane.xlu1 %1187  ;;  %v1075_v48 = vpop.xlane.xlu0 %1074 }
 0x375   : > { %v1189_v49 = vsub.f32 %v1185_v38, %v1188_v47  ;;  %v1076_v50 = vsub.f32 %v1071_v37, %v1075_v48 }
 0x377   : > { %v1190_v51 = vmul.f32 1.442695, %v1189_v49  ;;  %v1077_v52 = vmul.f32 1.442695, %v1076_v50 }
 0x379   : > { %1954 = vpow2.f32 %v1190_v51 }
 0x37a   : > { %1956 = vpow2.f32 %v1077_v52 }
 0x383   : > { %v1955_v53 = vpop.eup %1954 }
 0x384   : > { %v1192_v54 = vsel %vm1072_vm2, %v1955_v53, 0.0  ;;  %v1957_v55 = vpop.eup %1956 }
 0x385   : > { %1193 = vadd.xlane.f32.xlu1 %v1192_v54  ;;  %v1079_v56 = vsel %vm1072_vm2, %v1957_v55, 0.0 }
 0x389   : > { %1080 = vadd.xlane.f32.xlu1 %v1079_v56 }
 0x412   : > { %v1194_v58 = vpop.xlane.xlu1 %1193 }
 0x413   : > { %1958 = vrcp.f32 %v1194_v58 }
 0x416   : > { %v1081_v59 = vpop.xlane.xlu1 %1080 }
 0x417   : > { %1960 = vrcp.f32 %v1081_v59 }
 0x41d   : > { %v1959_v60 = vpop.eup %1958 }
 0x41e   : > { %v1196_v61 = vmul.f32 %v1959_v60, %v1955_v53 }
 0x420   : > { %v1197_v63 = vpack.c.bf16 %v1196_v61, %v1196_v61 }
 0x421   : > { %v1961_v1 = vpop.eup %1960 }
 0x422   : > { %v1083_v2 = vmul.f32 %v1961_v1, %v1957_v55  ;;  %1746 = vmatmul.mubr.msk.bf16.vlgmr.msra.gmra.mrb[8].mxu1 %vm1072_vm2, %v1197_v63 }
 0x423   : > { %1440 = vmatpush1.bf16.msra.mxu1 %v1904_v62 }
 0x424   : > { %v1084_v4 = vpack.c.bf16 %v1083_v2, %v1083_v2  ;;  %1441 = vmatprep.subr.bf16.mxu1 %v1909_v0 }
 0x426   : > { %1734 = vmatmul.mubr.msk.bf16.vlgmr.msra.gmra.mrb[12].mxu0 %vm1072_vm2, %v1084_v4 }
 0x427   : > { %1442 = vmatpush1.bf16.msra.mxu1 %v1907_v3 }
 0x428   : > { %1443 = vmatprep.subr.bf16.mxu1 %v1912_v5 }
 0x42b   : > { %1444 = vmatpush1.bf16.msra.mxu1 %v1910_v6 }
 0x42c   : > { %1445 = vmatprep.subr.bf16.mxu1 %v1915_v7 }
 0x42f   : > { %1446 = vmatpush1.bf16.msra.mxu1 %v1913_v8 }
 0x430   : > { %1447 = vmatprep.subr.bf16.mxu1 %v1918_v9 }
 0x433   : > { %1448 = vmatpush1.bf16.msra.mxu1 %v1916_v10 }
 0x434   : > { %1449 = vmatprep.subr.bf16.mxu1 %v1921_v13 }
 0x437   : > { %1450 = vmatpush1.bf16.msra.mxu1 %v1919_v14 }
 0x438   : > { %1451 = vmatprep.subr.bf16.mxu1 %v1924_v15 }
 0x43b   : > { %1452 = vmatpush1.bf16.msra.mxu1 %v1922_v16 }
 0x43c   : > { %1453 = vmatprep.subr.bf16.mxu1 %v1927_v17 }
 0x43f   : > { %1454 = vmatpush1.bf16.msra.mxu1 %v1925_v18 }
 0x440   : > { %1455 = vmatprep.subr.bf16.mxu1 %v1930_v19 }
 0x443   : > { %1456 = vmatpush1.bf16.msra.mxu1 %v1928_v20 }
 0x444   : > { %1457 = vmatprep.subr.bf16.mxu1 %v1933_v21 }
 0x447   : > { %1458 = vmatpush1.bf16.msra.mxu1 %v1931_v22 }
 0x448   : > { %1459 = vmatprep.subr.bf16.mxu1 %v1936_v23 }
 0x44b   : > { %1460 = vmatpush1.bf16.msra.mxu1 %v1934_v24 }
 0x44c   : > { %1461 = vmatprep.subr.bf16.mxu1 %v1939_v25 }
 0x44f   : > { %1462 = vmatpush1.bf16.msra.mxu1 %v1937_v26 }
 0x450   : > { %1463 = vmatprep.subr.bf16.mxu1 %v1942_v27 }
 0x453   : > { %1464 = vmatpush1.bf16.msra.mxu1 %v1940_v28 }
 0x454   : > { %1465 = vmatprep.subr.bf16.mxu1 %v1945_v29 }
 0x457   : > { %1466 = vmatpush1.bf16.msra.mxu1 %v1943_v30 }
 0x458   : > { %1467 = vmatprep.subr.bf16.mxu1 %v1948_v31 }
 0x45b   : > { %1468 = vmatpush1.bf16.msra.mxu1 %v1946_v32 }
 0x45c   : > { %1469 = vmatprep.subr.bf16.mxu1 %v1951_v33 }
 0x45f   : > { %1470 = vmatpush1.bf16.msra.mxu1 %v1949_v34 }
 0x4f5   : > { %v1239_v35 = vpop.f32.mrb[8].mxu1 }
 0x4f6   : > { %v1246_v36 = vpack.c.bf16 %v1239_v35, %v1239_v35  ;;  %v1747_v37 = vpop.f32.mrb[9].mxu1 }
 0x4f7   : > { %v1242_v38 = vpop.f32.mrb[10].mxu1 }
 0x4f8   : > { %v1748_v39 = vpop.f32.mrb[11].mxu1  ;;  %1471 = vmatprep.mubr.bf16.mxu1 %v1246_v36 }
 0x4f9   : > { %v1127_v40 = vpop.f32.mrb[12].mxu0 }
 0x4fa   : > { %v1245_v41 = vpack.c.bf16 %v1127_v40, %v1127_v40  ;;  %v1735_v42 = vpop.f32.mrb[13].mxu0 }
 0x4fb   : > { %v1130_v43 = vpop.f32.mrb[14].mxu0 }
 0x4fc   : > { %v1736_v44 = vpop.f32.mrb[15].mxu0  ;;  %1472 = vmatmul.mubr.bf16.vlgmr.msra.gmra.mrb[12].mxu1 %v1245_v41 }
 0x5cf   : > { %v1473_v45 = vpop.f32.mrb[12].mxu1 }
 0x5d0   : > { %v1480_v46 = vadd.f32 %v1473_v45, %v2052_v11  ;;  %v1475_v47 = vpop.f32.mrb[13].mxu1 }
 0x5d1   : > { %v1481_v48 = vadd.f32 %v1475_v47, %v2054_v12  ;;  %v1477_v49 = vpop.f32.mrb[14].mxu1 }
 0x5d2   : > { %v1478_v50 = vpop.f32.mrb[15].mxu1 }
 0x5d3   : > { %v1716_v51 = vpack.c.bf16 %v1481_v48, %v1480_v46 }
 0x5d5   : > { %1490 = vst [vmem:[%s285_s29] sm:$0xff] %v1716_v51 }
 0x5d6 PF: > { %s16_s21 = sadd.s32 1, %s1968_s21  }
 0x5d7   : > { %p13_p4 = scmp.ge.s32.totalorder %s16_s21, 4  }
 0x5d9   :  { %15 = sbr.rel (!%p13_p4) target bundleno = 1 (0x1), region = 80 }

// kernel: paligemma_forward.20
= control target key start
LH: loop header
LB: loop body
LE: loop exit
PB: predicated region body
PF: predicated region fallthrough
CT: control target
= control target key end

     0   :  { %s2374_s21 = smov 0   ;;  %s3010_s0 = inlined_call_operand.vmem [shape: bf16[2,8,256], index: 0, kind: input, shape index: {}]   ;;  %s3011_s1 = inlined_call_operand.vmem [shape: f32[1,256], index: 1, kind: input, shape index: {}, may-alias: {1,5}]   ;;  %s3012_s2 = inlined_call_operand.vmem [shape: bf16[256,512], index: 2, kind: input, shape index: {}]   ;;  %s3013_s3 = inlined_call_operand.vmem [shape: bf16[256,512], index: 3, kind: input, shape index: {}]   ;;  %s3014_s4 = inlined_call_operand.vmem [shape: bf16[512,256], index: 4, kind: input, shape index: {}]   ;;  %s3015_s5 = inlined_call_operand.vmem [shape: f32[1,256], index: 5, kind: input, shape index: {}, may-alias: {1,5}]   ;;  %s3016_s6 = inlined_call_operand.vmem [shape: bf16[2,8,256], index: 6, kind: output, shape index: {}]  }
   0x1 LB: > { %s1816_s22 = sadd.s32 4294967295, %s2337_s21   ;;  %p1820_p0 = scmp.ge.s32.totalorder %s2337_s21, 1  ;;  %s2337_s21 = sphi %s2374_s21, %s16_s21  }
   0x2   : > { %p212_p1 = scmp.lt.s32.totalorder %s2337_s21, 3 }
   0x4   : > { %p213_p2 = pnand %p1820_p0, %p212_p1 }
   0x5   : > { %p242_p3 = scmp.lt.s32.totalorder (!%p213_p2), %s1816_s22, 1  ;;  %v2031_v0 = vld [vmem:[%s3012_s2 + $0x4] ss:$16 sps:$4 sm:$0xff] (!%p213_p2)   ;;  %v2033_v1 = vld [vmem:[%s3012_s2 + $0xc] ss:$16 sps:$4 sm:$0xff] (!%p213_p2)  }
   0x6   : > { %216 = sbr.rel (%p213_p2) target bundleno = 854 (0x356), region = 44  ;;  %667 = vmatprep.subr.bf16.mxu0 (!%p213_p2), %v2031_v0  ;;  %v2035_v2 = vld [vmem:[%s3012_s2] ss:$16 sps:$4 sm:$0xff] (!%p213_p2)   ;;  %v2036_v3 = vld [vmem:[%s3012_s2 + $0x8] ss:$16 sps:$4 sm:$0xff] (!%p213_p2)   ;;  %708 = vmatprep.subr.bf16.mxu1 (!%p213_p2), %v2033_v1 }
   0x7   : > { %v2037_v4 = vld [vmem:[%s3012_s2 + $0x24] ss:$16 sps:$4 sm:$0xff] (!%p213_p2)   ;;  %668 = vmatpush1.bf16.msra.mxu0 (!%p213_p2), %v2035_v2  ;;  %709 = vmatpush1.bf16.msra.mxu1 (!%p213_p2), %v2036_v3  ;;  %v2039_v5 = vld [vmem:[%s3012_s2 + $0x2c] ss:$16 sps:$4 sm:$0xff] (!%p213_p2)   ;;  %v2041_v6 = vld [vmem:[%s3012_s2 + $0x20] ss:$16 sps:$4 sm:$0xff] (!%p213_p2)  }
   0x8   : > { %669 = vmatprep.subr.bf16.mxu0 (!%p213_p2), %v2037_v4  ;;  %v2042_v7 = vld [vmem:[%s3012_s2 + $0x28] ss:$16 sps:$4 sm:$0xff] (!%p213_p2)   ;;  %710 = vmatprep.subr.bf16.mxu1 (!%p213_p2), %v2039_v5  ;;  %v2043_v9 = vld [vmem:[%s3012_s2 + $0x44] ss:$16 sps:$4 sm:$0xff] (!%p213_p2)   ;;  %v2045_v12 = vld [vmem:[%s3012_s2 + $0x4c] ss:$16 sps:$4 sm:$0xff] (!%p213_p2)  }
   0x9   : > { %v2047_v13 = vld [vmem:[%s3012_s2 + $0x40] ss:$16 sps:$4 sm:$0xff] (!%p213_p2)   ;;  %v2048_v14 = vld [vmem:[%s3012_s2 + $0x48] ss:$16 sps:$4 sm:$0xff] (!%p213_p2)   ;;  %v2049_v17 = vld [vmem:[%s3012_s2 + $0x64] ss:$16 sps:$4 sm:$0xff] (!%p213_p2)  }
   0xa   : > { %v2051_v18 = vld [vmem:[%s3012_s2 + $0x6c] ss:$16 sps:$4 sm:$0xff] (!%p213_p2)   ;;  %v2053_v20 = vld [vmem:[%s3012_s2 + $0x60] ss:$16 sps:$4 sm:$0xff] (!%p213_p2)   ;;  %v2054_v21 = vld [vmem:[%s3012_s2 + $0x68] ss:$16 sps:$4 sm:$0xff] (!%p213_p2)  }
   0xb   : > { %670 = vmatpush1.bf16.msra.mxu0 (!%p213_p2), %v2041_v6  ;;  %711 = vmatpush1.bf16.msra.mxu1 (!%p213_p2), %v2042_v7  ;;  %v2055_v22 = vld [vmem:[%s3012_s2 + $0x84] ss:$16 sps:$4 sm:$0xff] (!%p213_p2)   ;;  %v2057_v23 = vld [vmem:[%s3012_s2 + $0x8c] ss:$16 sps:$4 sm:$0xff] (!%p213_p2)   ;;  %v2059_v24 = vld [vmem:[%s3012_s2 + $0x80] ss:$16 sps:$4 sm:$0xff] (!%p213_p2)  }
   0xc   : > { %671 = vmatprep.subr.bf16.mxu0 (!%p213_p2), %v2043_v9  ;;  %712 = vmatprep.subr.bf16.mxu1 (!%p213_p2), %v2045_v12  ;;  %v2060_v25 = vld [vmem:[%s3012_s2 + $0x88] ss:$16 sps:$4 sm:$0xff] (!%p213_p2)   ;;  %v2061_v26 = vld [vmem:[%s3012_s2 + $0xa4] ss:$16 sps:$4 sm:$0xff] (!%p213_p2)   ;;  %v2063_v27 = vld [vmem:[%s3012_s2 + $0xac] ss:$16 sps:$4 sm:$0xff] (!%p213_p2)   ;;  %v269_v12 = vlaneseq (!%p213_p2) }
   0xd   : > { %s3018_s22 = smov (!%p242_p3, %s1816_s22), 1  ;;  %v2065_v28 = vld [vmem:[%s3012_s2 + $0xa0] ss:$16 sps:$4 sm:$0xff]   ;;  %v2066_v29 = vld [vmem:[%s3012_s2 + $0xa8] ss:$16 sps:$4 sm:$0xff]  }
   0xe   : > { %s2020_s9 = sshll.u32 %s3018_s22, 3  ;;  %v2067_v30 = vld [vmem:[%s3012_s2 + $0xc4] ss:$16 sps:$4 sm:$0xff]   ;;  %v2069_v31 = vld [vmem:[%s3012_s2 + $0xcc] ss:$16 sps:$4 sm:$0xff]  }
   0xf   : > { %s246_s16 = scalar_lea.vmem %s3010_s0, %s2020_s9  ;;  %672 = vmatpush1.bf16.msra.mxu0 %v2047_v13  ;;  %713 = vmatpush1.bf16.msra.mxu1 %v2048_v14  ;;  %v2071_v32 = vld [vmem:[%s3012_s2 + $0xc0] ss:$16 sps:$4 sm:$0xff]   ;;  %v2072_v33 = vld [vmem:[%s3012_s2 + $0xc8] ss:$16 sps:$4 sm:$0xff]   ;;  %v2073_v34 = vld [vmem:[%s3012_s2 + $0xe4] ss:$16 sps:$4 sm:$0xff]   ;;  %s251_s15 = scalar_lea.vmem %s3016_s6, %s2020_s9 }
  0x10   : > { %v252_v8 = vld [vmem:[%s246_s16] sm:$0xff]  ;;  %673 = vmatprep.subr.bf16.mxu0 %v2049_v17  ;;  %714 = vmatprep.subr.bf16.mxu1 %v2051_v18  ;;  %v2075_v35 = vld [vmem:[%s3012_s2 + $0xec] ss:$16 sps:$4 sm:$0xff]   ;;  %v2078_v37 = vld [vmem:[%s3012_s2 + $0xe8] ss:$16 sps:$4 sm:$0xff]   ;;  %v2596_v14 = vshrl.u32 %v269_v12, 7 }
  0x11   : > { %v2417_v10 = vunpack.c.l.bf16 %v252_v8  ;;  %v2419_v11 = vunpack.c.h.bf16 %v252_v8  ;;  %v2077_v36 = vld [vmem:[%s3012_s2 + $0xe0] ss:$16 sps:$4 sm:$0xff]   ;;  %v2079_v38 = vld [vmem:[%s3012_s2 + $0x104] ss:$16 sps:$4 sm:$0xff]   ;;  %v2081_v39 = vld [vmem:[%s3012_s2 + $0x10c] ss:$16 sps:$4 sm:$0xff]  }
  0x12   : > { %v2083_v40 = vld [vmem:[%s3012_s2 + $0x100] ss:$16 sps:$4 sm:$0xff]   ;;  %v2084_v41 = vld [vmem:[%s3012_s2 + $0x108] ss:$16 sps:$4 sm:$0xff]   ;;  %v2085_v42 = vld [vmem:[%s3012_s2 + $0x124] ss:$16 sps:$4 sm:$0xff]  }
  0x13   : > { %v256_v15 = vmul.f32 %v2417_v10, %v2417_v10  ;;  %v257_v16 = vmul.f32 %v2419_v11, %v2419_v11  ;;  %674 = vmatpush1.bf16.msra.mxu0 %v2053_v20  ;;  %715 = vmatpush1.bf16.msra.mxu1 %v2054_v21  ;;  %v2087_v43 = vld [vmem:[%s3012_s2 + $0x12c] ss:$16 sps:$4 sm:$0xff]   ;;  %v2089_v44 = vld [vmem:[%s3012_s2 + $0x120] ss:$16 sps:$4 sm:$0xff]   ;;  %v2090_v45 = vld [vmem:[%s3012_s2 + $0x128] ss:$16 sps:$4 sm:$0xff]  }
  0x14   : > { %675 = vmatprep.subr.bf16.mxu0 %v2055_v22  ;;  %716 = vmatprep.subr.bf16.mxu1 %v2057_v23  ;;  %v2091_v46 = vld [vmem:[%s3012_s2 + $0x144] ss:$16 sps:$4 sm:$0xff]   ;;  %v2093_v47 = vld [vmem:[%s3012_s2 + $0x14c] ss:$16 sps:$4 sm:$0xff]   ;;  %v2095_v48 = vld [vmem:[%s3012_s2 + $0x140] ss:$16 sps:$4 sm:$0xff]  }
  0x15   : > { %v258_v19 = vadd.f32 %v257_v16, %v256_v15  ;;  %v2096_v49 = vld [vmem:[%s3012_s2 + $0x148] ss:$16 sps:$4 sm:$0xff]   ;;  %v2097_v50 = vld [vmem:[%s3012_s2 + $0x164] ss:$16 sps:$4 sm:$0xff]   ;;  %v2099_v51 = vld [vmem:[%s3012_s2 + $0x16c] ss:$16 sps:$4 sm:$0xff]  }
  0x16   : > { %v2101_v52 = vld [vmem:[%s3012_s2 + $0x160] ss:$16 sps:$4 sm:$0xff]   ;;  %v2102_v53 = vld [vmem:[%s3012_s2 + $0x168] ss:$16 sps:$4 sm:$0xff]   ;;  %v2103_v54 = vld [vmem:[%s3012_s2 + $0x184] ss:$16 sps:$4 sm:$0xff]  }
  0x17   : > { %259 = vadd.xlane.f32.xlu0 %v258_v19  ;;  %676 = vmatpush1.bf16.msra.mxu0 %v2059_v24  ;;  %v2105_v55 = vld [vmem:[%s3012_s2 + $0x18c] ss:$16 sps:$4 sm:$0xff]   ;;  %v2107_v56 = vld [vmem:[%s3012_s2 + $0x180] ss:$16 sps:$4 sm:$0xff]   ;;  %v2108_v57 = vld [vmem:[%s3012_s2 + $0x188] ss:$16 sps:$4 sm:$0xff]  }
  0x18   : > { %717 = vmatpush1.bf16.msra.mxu1 %v2060_v25  ;;  %677 = vmatprep.subr.bf16.mxu0 %v2061_v26  ;;  %v2109_v58 = vld [vmem:[%s3012_s2 + $0x1a4] ss:$16 sps:$4 sm:$0xff]   ;;  %v2111_v59 = vld [vmem:[%s3012_s2 + $0x1ac] ss:$16 sps:$4 sm:$0xff]   ;;  %v2113_v60 = vld [vmem:[%s3012_s2 + $0x1a0] ss:$16 sps:$4 sm:$0xff]  }
  0x19   : > { %718 = vmatprep.subr.bf16.mxu1 %v2063_v27  ;;  %v2114_v61 = vld [vmem:[%s3012_s2 + $0x1a8] ss:$16 sps:$4 sm:$0xff]   ;;  %v2115_v62 = vld [vmem:[%s3012_s2 + $0x1c4] ss:$16 sps:$4 sm:$0xff]   ;;  %v2117_v63 = vld [vmem:[%s3012_s2 + $0x1cc] ss:$16 sps:$4 sm:$0xff]  }
  0x1a   : > { %v2119_v0 = vld [vmem:[%s3012_s2 + $0x1c0] ss:$16 sps:$4 sm:$0xff]   ;;  %v2120_v1 = vld [vmem:[%s3012_s2 + $0x1c8] ss:$16 sps:$4 sm:$0xff]   ;;  %v2121_v2 = vld [vmem:[%s3012_s2 + $0x1e4] ss:$16 sps:$4 sm:$0xff]  }
  0x1b   : > { %678 = vmatpush1.bf16.msra.mxu0 %v2065_v28  ;;  %v2123_v3 = vld [vmem:[%s3012_s2 + $0x1ec] ss:$16 sps:$4 sm:$0xff]   ;;  %v2125_v4 = vld [vmem:[%s3012_s2 + $0x1e0] ss:$16 sps:$4 sm:$0xff]   ;;  %v2126_v5 = vld [vmem:[%s3012_s2 + $0x1e8] ss:$16 sps:$4 sm:$0xff]  }
  0x1c   : > { %719 = vmatpush1.bf16.msra.mxu1 %v2066_v29  ;;  %679 = vmatprep.subr.bf16.mxu0 %v2067_v30  ;;  %v2129_v6 = vld [vmem:[%s3013_s3 + $0x4] ss:$16 sps:$4 sm:$0xff]   ;;  %v2132_v7 = vld [vmem:[%s3013_s3 + $0xc] ss:$16 sps:$4 sm:$0xff]   ;;  %v255_v15 = vld [vmem:[%s3011_s1] sm:$0x3] }
  0x1d   : > { %720 = vmatprep.subr.bf16.mxu1 %v2069_v31  ;;  %v267_v16 = vadd.f32 1.0, %v255_v15  ;;  %v275_v17 = vsub.s32 1, %v2596_v14  ;;  %v271_v18 = vsub.s32 0, %v2596_v14  ;;  %v2127_v27 = vld [vmem:[%s3013_s3] ss:$16 sps:$4 sm:$0xff]  }
  0x1e   : > { %v2130_v28 = vld [vmem:[%s3013_s3 + $0x8] ss:$16 sps:$4 sm:$0xff]   ;;  %v2135_v30 = vld [vmem:[%s3013_s3 + $0x24] ss:$16 sps:$4 sm:$0xff]   ;;  %v2138_v31 = vld [vmem:[%s3013_s3 + $0x2c] ss:$16 sps:$4 sm:$0xff]  }
  0x1f   : > { %680 = vmatpush1.bf16.msra.mxu0 %v2071_v32  ;;  %v276_v19 = vrot.slane %v267_v16, %v275_v17  ;;  %v272_v20 = vrot.slane %v267_v16, %v271_v18  ;;  %v2133_v32 = vld [vmem:[%s3013_s3 + $0x20] ss:$16 sps:$4 sm:$0xff]   ;;  %v2201_v12 = vld [vmem:[%s3013_s3 + $0x184] ss:$16 sps:$4 sm:$0xff]   ;;  %v2202_v16 = vld [vmem:[%s3013_s3 + $0x188] ss:$16 sps:$4 sm:$0xff]  }
  0x20   : > { %721 = vmatpush1.bf16.msra.mxu1 %v2072_v33  ;;  %681 = vmatprep.subr.bf16.mxu0 %v2073_v34  ;;  %v2136_v33 = vld [vmem:[%s3013_s3 + $0x28] ss:$16 sps:$4 sm:$0xff]   ;;  %v2141_v34 = vld [vmem:[%s3013_s3 + $0x44] ss:$16 sps:$4 sm:$0xff]   ;;  %v2199_v15 = vld [vmem:[%s3013_s3 + $0x180] ss:$16 sps:$4 sm:$0xff]  }
  0x21   : > { %722 = vmatprep.subr.bf16.mxu1 %v2075_v35  ;;  %v2144_v35 = vld [vmem:[%s3013_s3 + $0x4c] ss:$16 sps:$4 sm:$0xff]  }
  0x23   : > { %682 = vmatpush1.bf16.msra.mxu0 %v2077_v36  ;;  %v2139_v36 = vld [vmem:[%s3013_s3 + $0x40] ss:$16 sps:$4 sm:$0xff]  }
  0x24   : > { %723 = vmatpush1.bf16.msra.mxu1 %v2078_v37  ;;  %683 = vmatprep.subr.bf16.mxu0 %v2079_v38  ;;  %v2142_v37 = vld [vmem:[%s3013_s3 + $0x48] ss:$16 sps:$4 sm:$0xff]   ;;  %v2147_v38 = vld [vmem:[%s3013_s3 + $0x64] ss:$16 sps:$4 sm:$0xff]  }
  0x25   : > { %724 = vmatprep.subr.bf16.mxu1 %v2081_v39  ;;  %v2150_v39 = vld [vmem:[%s3013_s3 + $0x6c] ss:$16 sps:$4 sm:$0xff]  }
  0x27   : > { %684 = vmatpush1.bf16.msra.mxu0 %v2083_v40  ;;  %v2145_v40 = vld [vmem:[%s3013_s3 + $0x60] ss:$16 sps:$4 sm:$0xff]  }
  0x28   : > { %725 = vmatpush1.bf16.msra.mxu1 %v2084_v41  ;;  %685 = vmatprep.subr.bf16.mxu0 %v2085_v42  ;;  %v2148_v41 = vld [vmem:[%s3013_s3 + $0x68] ss:$16 sps:$4 sm:$0xff]   ;;  %v2153_v42 = vld [vmem:[%s3013_s3 + $0x84] ss:$16 sps:$4 sm:$0xff]  }
  0x29   : > { %726 = vmatprep.subr.bf16.mxu1 %v2087_v43  ;;  %v2156_v43 = vld [vmem:[%s3013_s3 + $0x8c] ss:$16 sps:$4 sm:$0xff]  }
  0x2b   : > { %686 = vmatpush1.bf16.msra.mxu0 %v2089_v44  ;;  %v2151_v44 = vld [vmem:[%s3013_s3 + $0x80] ss:$16 sps:$4 sm:$0xff]  }
  0x2c   : > { %727 = vmatpush1.bf16.msra.mxu1 %v2090_v45  ;;  %687 = vmatprep.subr.bf16.mxu0 %v2091_v46  ;;  %v2154_v45 = vld [vmem:[%s3013_s3 + $0x88] ss:$16 sps:$4 sm:$0xff]   ;;  %v2159_v46 = vld [vmem:[%s3013_s3 + $0xa4] ss:$16 sps:$4 sm:$0xff]  }
  0x2d   : > { %728 = vmatprep.subr.bf16.mxu1 %v2093_v47  ;;  %v2162_v47 = vld [vmem:[%s3013_s3 + $0xac] ss:$16 sps:$4 sm:$0xff]  }
  0x2f   : > { %688 = vmatpush1.bf16.msra.mxu0 %v2095_v48  ;;  %v2157_v48 = vld [vmem:[%s3013_s3 + $0xa0] ss:$16 sps:$4 sm:$0xff]  }
  0x30   : > { %729 = vmatpush1.bf16.msra.mxu1 %v2096_v49  ;;  %689 = vmatprep.subr.bf16.mxu0 %v2097_v50  ;;  %v2160_v49 = vld [vmem:[%s3013_s3 + $0xa8] ss:$16 sps:$4 sm:$0xff]   ;;  %v2165_v50 = vld [vmem:[%s3013_s3 + $0xc4] ss:$16 sps:$4 sm:$0xff]  }
  0x31   : > { %730 = vmatprep.subr.bf16.mxu1 %v2099_v51  ;;  %v2168_v51 = vld [vmem:[%s3013_s3 + $0xcc] ss:$16 sps:$4 sm:$0xff]  }
  0x33   : > { %690 = vmatpush1.bf16.msra.mxu0 %v2101_v52  ;;  %v2163_v52 = vld [vmem:[%s3013_s3 + $0xc0] ss:$16 sps:$4 sm:$0xff]  }
  0x34   : > { %731 = vmatpush1.bf16.msra.mxu1 %v2102_v53  ;;  %691 = vmatprep.subr.bf16.mxu0 %v2103_v54  ;;  %v2166_v53 = vld [vmem:[%s3013_s3 + $0xc8] ss:$16 sps:$4 sm:$0xff]   ;;  %v2171_v54 = vld [vmem:[%s3013_s3 + $0xe4] ss:$16 sps:$4 sm:$0xff]  }
  0x35   : > { %732 = vmatprep.subr.bf16.mxu1 %v2105_v55  ;;  %v2174_v55 = vld [vmem:[%s3013_s3 + $0xec] ss:$16 sps:$4 sm:$0xff]  }
  0x37   : > { %692 = vmatpush1.bf16.msra.mxu0 %v2107_v56  ;;  %v2169_v56 = vld [vmem:[%s3013_s3 + $0xe0] ss:$16 sps:$4 sm:$0xff]  }
  0x38   : > { %733 = vmatpush1.bf16.msra.mxu1 %v2108_v57  ;;  %693 = vmatprep.subr.bf16.mxu0 %v2109_v58  ;;  %v2172_v57 = vld [vmem:[%s3013_s3 + $0xe8] ss:$16 sps:$4 sm:$0xff]   ;;  %v2177_v58 = vld [vmem:[%s3013_s3 + $0x104] ss:$16 sps:$4 sm:$0xff]  }
  0x39   : > { %734 = vmatprep.subr.bf16.mxu1 %v2111_v59  ;;  %v2180_v59 = vld [vmem:[%s3013_s3 + $0x10c] ss:$16 sps:$4 sm:$0xff]  }
  0x3b   : > { %694 = vmatpush1.bf16.msra.mxu0 %v2113_v60  ;;  %v2175_v60 = vld [vmem:[%s3013_s3 + $0x100] ss:$16 sps:$4 sm:$0xff]  }
  0x3c   : > { %735 = vmatpush1.bf16.msra.mxu1 %v2114_v61  ;;  %695 = vmatprep.subr.bf16.mxu0 %v2115_v62  ;;  %v2178_v61 = vld [vmem:[%s3013_s3 + $0x108] ss:$16 sps:$4 sm:$0xff]   ;;  %v2183_v62 = vld [vmem:[%s3013_s3 + $0x124] ss:$16 sps:$4 sm:$0xff]  }
  0x3d   : > { %736 = vmatprep.subr.bf16.mxu1 %v2117_v63  ;;  %v2186_v63 = vld [vmem:[%s3013_s3 + $0x12c] ss:$16 sps:$4 sm:$0xff]  }
  0x3f   : > { %696 = vmatpush1.bf16.msra.mxu0 %v2119_v0  ;;  %v2181_v0 = vld [vmem:[%s3013_s3 + $0x120] ss:$16 sps:$4 sm:$0xff]  }
  0x40   : > { %737 = vmatpush1.bf16.msra.mxu1 %v2120_v1  ;;  %697 = vmatprep.subr.bf16.mxu0 %v2121_v2  ;;  %v2184_v1 = vld [vmem:[%s3013_s3 + $0x128] ss:$16 sps:$4 sm:$0xff]   ;;  %v2189_v2 = vld [vmem:[%s3013_s3 + $0x144] ss:$16 sps:$4 sm:$0xff]  }
  0x41   : > { %738 = vmatprep.subr.bf16.mxu1 %v2123_v3  ;;  %v2192_v3 = vld [vmem:[%s3013_s3 + $0x14c] ss:$16 sps:$4 sm:$0xff]  }
  0x43   : > { %698 = vmatpush1.bf16.msra.mxu0 %v2125_v4  ;;  %v2187_v4 = vld [vmem:[%s3013_s3 + $0x140] ss:$16 sps:$4 sm:$0xff]  }
  0x44   : > { %739 = vmatpush1.bf16.msra.mxu1 %v2126_v5  ;;  %1133 = vmatprep.subr.bf16.mxu0 %v2129_v6  ;;  %v2190_v5 = vld [vmem:[%s3013_s3 + $0x148] ss:$16 sps:$4 sm:$0xff]   ;;  %v2195_v6 = vld [vmem:[%s3013_s3 + $0x164] ss:$16 sps:$4 sm:$0xff]  }
  0x45   : > { %1174 = vmatprep.subr.bf16.mxu1 %v2132_v7  ;;  %v2198_v7 = vld [vmem:[%s3013_s3 + $0x16c] ss:$16 sps:$4 sm:$0xff]  }
  0xa4   : > { %v260_v8 = vpop.xlane.xlu0 %259 }
  0xa5   : > { %v262_v9 = vmul.f32 0.00390625, %v260_v8  ;;  %v2193_v8 = vld [vmem:[%s3013_s3 + $0x160] ss:$16 sps:$4 sm:$0xff]  }
  0xa7   : > { %v263_v13 = vadd.f32 1e-06, %v262_v9  ;;  %v2196_v9 = vld [vmem:[%s3013_s3 + $0x168] ss:$16 sps:$4 sm:$0xff]  }
  0xa9   : > { %2319 = vrsqrt.f32 %v263_v13  ;;  %v2204_v13 = vld [vmem:[%s3013_s3 + $0x18c] ss:$16 sps:$4 sm:$0xff]  }
  0xb3   : > { %v2320_v21 = vpop.eup %2319 }
  0xb4   : > { %v266_v22 = vmul.f32 %v2320_v21, %v2419_v11  ;;  %v265_v23 = vmul.f32 %v2320_v21, %v2417_v10  ;;  %v2205_v21 = vld [vmem:[%s3013_s3 + $0x1a0] ss:$16 sps:$4 sm:$0xff]  }
  0xb6   : > { %v280_v24 = vmul.f32 %v276_v19, %v266_v22  ;;  %v279_v25 = vmul.f32 %v272_v20, %v265_v23  ;;  %v2207_v19 = vld [vmem:[%s3013_s3 + $0x1a4] ss:$16 sps:$4 sm:$0xff]   ;;  %v2210_v20 = vld [vmem:[%s3013_s3 + $0x1ac] ss:$16 sps:$4 sm:$0xff]   ;;  %v2208_v22 = vld [vmem:[%s3013_s3 + $0x1a8] ss:$16 sps:$4 sm:$0xff]  }
  0xb7   : > { %v2213_v23 = vld [vmem:[%s3013_s3 + $0x1c4] ss:$16 sps:$4 sm:$0xff]  }
  0xb8   : > { %v282_v26 = vpack.c.bf16 %v280_v24, %v280_v24  ;;  %v2615_v29 = vpack.c.bf16 %v279_v25, %v279_v25  ;;  %v2216_v24 = vld [vmem:[%s3013_s3 + $0x1cc] ss:$16 sps:$4 sm:$0xff]   ;;  %v2211_v25 = vld [vmem:[%s3013_s3 + $0x1c0] ss:$16 sps:$4 sm:$0xff]  }
  0xba   : > { %699 = vmatprep.mubr.bf16.mxu0 %v282_v26  ;;  %740 = vmatprep.mubr.bf16.mxu1 %v282_v26 }
  0xbb   : > { %700 = vmatmul.mubr.bf16.vlgmr.msra.gmra.mrb[0].mxu0 %v2615_v29  ;;  %741 = vmatmul.mubr.bf16.vlgmr.msra.gmra.mrb[0].mxu1 %v2615_v29 }
  0xbc   : > { %1134 = vmatpush1.bf16.msra.mxu0 %v2127_v27  ;;  %1175 = vmatpush1.bf16.msra.mxu1 %v2130_v28  ;;  %v2219_v27 = vld [vmem:[%s3013_s3 + $0x1e4] ss:$16 sps:$4 sm:$0xff]   ;;  %v2222_v28 = vld [vmem:[%s3013_s3 + $0x1ec] ss:$16 sps:$4 sm:$0xff]  }
  0xbd   : > { %1165 = vmatprep.mubr.bf16.mxu0 %v282_v26  ;;  %1206 = vmatprep.mubr.bf16.mxu1 %v282_v26  ;;  %v2214_v26 = vld [vmem:[%s3013_s3 + $0x1c8] ss:$16 sps:$4 sm:$0xff]  }
  0xbe   : > { %1135 = vmatprep.subr.bf16.mxu0 %v2135_v30  ;;  %1176 = vmatprep.subr.bf16.mxu1 %v2138_v31  ;;  %v2217_v30 = vld [vmem:[%s3013_s3 + $0x1e0] ss:$16 sps:$4 sm:$0xff]   ;;  %v2220_v31 = vld [vmem:[%s3013_s3 + $0x1e8] ss:$16 sps:$4 sm:$0xff]  }
  0xc0   : > { %1136 = vmatpush1.bf16.msra.mxu0 %v2133_v32  ;;  %1177 = vmatpush1.bf16.msra.mxu1 %v2136_v33  ;;  %v2225_v32 = vld [vmem:[%s3014_s4 + $0x4] ss:$8 sps:$4 sm:$0xff]  }
  0xc1   : > { %1137 = vmatprep.subr.bf16.mxu0 %v2141_v34  ;;  %1178 = vmatprep.subr.bf16.mxu1 %v2144_v35  ;;  %v2228_v33 = vld [vmem:[%s3014_s4 + $0x104] ss:$8 sps:$4 sm:$0xff]   ;;  %v2223_v34 = vld [vmem:[%s3014_s4] ss:$8 sps:$4 sm:$0xff]  }
  0xc2   : > { %v2226_v35 = vld [vmem:[%s3014_s4 + $0x100] ss:$8 sps:$4 sm:$0xff]  }
  0xc4   : > { %1138 = vmatpush1.bf16.msra.mxu0 %v2139_v36  ;;  %1179 = vmatpush1.bf16.msra.mxu1 %v2142_v37  ;;  %v2234_v36 = vld [vmem:[%s3014_s4 + $0x114] ss:$8 sps:$4 sm:$0xff]   ;;  %v2229_v37 = vld [vmem:[%s3014_s4 + $0x10] ss:$8 sps:$4 sm:$0xff]  }
  0xc5   : > { %1139 = vmatprep.subr.bf16.mxu0 %v2147_v38  ;;  %1180 = vmatprep.subr.bf16.mxu1 %v2150_v39  ;;  %v2232_v38 = vld [vmem:[%s3014_s4 + $0x110] ss:$8 sps:$4 sm:$0xff]   ;;  %v2235_v39 = vld [vmem:[%s3014_s4 + $0x20] ss:$8 sps:$4 sm:$0xff]  }
  0xc8   : > { %1140 = vmatpush1.bf16.msra.mxu0 %v2145_v40  ;;  %1181 = vmatpush1.bf16.msra.mxu1 %v2148_v41  ;;  %v2237_v40 = vld [vmem:[%s3014_s4 + $0x24] ss:$8 sps:$4 sm:$0xff]   ;;  %v2238_v41 = vld [vmem:[%s3014_s4 + $0x120] ss:$8 sps:$4 sm:$0xff]  }
  0xc9   : > { %1141 = vmatprep.subr.bf16.mxu0 %v2153_v42  ;;  %1182 = vmatprep.subr.bf16.mxu1 %v2156_v43  ;;  %v2240_v42 = vld [vmem:[%s3014_s4 + $0x124] ss:$8 sps:$4 sm:$0xff]   ;;  %v2243_v43 = vld [vmem:[%s3014_s4 + $0x34] ss:$8 sps:$4 sm:$0xff]  }
  0xcc   : > { %1142 = vmatpush1.bf16.msra.mxu0 %v2151_v44  ;;  %1183 = vmatpush1.bf16.msra.mxu1 %v2154_v45  ;;  %v2246_v44 = vld [vmem:[%s3014_s4 + $0x134] ss:$8 sps:$4 sm:$0xff]   ;;  %v2241_v45 = vld [vmem:[%s3014_s4 + $0x30] ss:$8 sps:$4 sm:$0xff]  }
  0xcd   : > { %1143 = vmatprep.subr.bf16.mxu0 %v2159_v46  ;;  %1184 = vmatprep.subr.bf16.mxu1 %v2162_v47  ;;  %v2244_v46 = vld [vmem:[%s3014_s4 + $0x130] ss:$8 sps:$4 sm:$0xff]   ;;  %v2249_v47 = vld [vmem:[%s3014_s4 + $0x44] ss:$8 sps:$4 sm:$0xff]  }
  0xd0   : > { %1144 = vmatpush1.bf16.msra.mxu0 %v2157_v48  ;;  %1185 = vmatpush1.bf16.msra.mxu1 %v2160_v49  ;;  %v2252_v48 = vld [vmem:[%s3014_s4 + $0x144] ss:$8 sps:$4 sm:$0xff]   ;;  %v2247_v49 = vld [vmem:[%s3014_s4 + $0x40] ss:$8 sps:$4 sm:$0xff]  }
  0xd1   : > { %1145 = vmatprep.subr.bf16.mxu0 %v2165_v50  ;;  %1186 = vmatprep.subr.bf16.mxu1 %v2168_v51  ;;  %v2250_v50 = vld [vmem:[%s3014_s4 + $0x140] ss:$8 sps:$4 sm:$0xff]   ;;  %v2255_v51 = vld [vmem:[%s3014_s4 + $0x54] ss:$8 sps:$4 sm:$0xff]  }
  0xd4   : > { %1146 = vmatpush1.bf16.msra.mxu0 %v2163_v52  ;;  %1187 = vmatpush1.bf16.msra.mxu1 %v2166_v53  ;;  %v2258_v52 = vld [vmem:[%s3014_s4 + $0x154] ss:$8 sps:$4 sm:$0xff]   ;;  %v2253_v53 = vld [vmem:[%s3014_s4 + $0x50] ss:$8 sps:$4 sm:$0xff]  }
  0xd5   : > { %1147 = vmatprep.subr.bf16.mxu0 %v2171_v54  ;;  %1188 = vmatprep.subr.bf16.mxu1 %v2174_v55  ;;  %v2256_v54 = vld [vmem:[%s3014_s4 + $0x150] ss:$8 sps:$4 sm:$0xff]   ;;  %v2261_v55 = vld [vmem:[%s3014_s4 + $0x64] ss:$8 sps:$4 sm:$0xff]  }
  0xd8   : > { %1148 = vmatpush1.bf16.msra.mxu0 %v2169_v56  ;;  %1189 = vmatpush1.bf16.msra.mxu1 %v2172_v57  ;;  %v2264_v56 = vld [vmem:[%s3014_s4 + $0x164] ss:$8 sps:$4 sm:$0xff]   ;;  %v2259_v57 = vld [vmem:[%s3014_s4 + $0x60] ss:$8 sps:$4 sm:$0xff]  }
  0xd9   : > { %1149 = vmatprep.subr.bf16.mxu0 %v2177_v58  ;;  %1190 = vmatprep.subr.bf16.mxu1 %v2180_v59  ;;  %v2262_v58 = vld [vmem:[%s3014_s4 + $0x160] ss:$8 sps:$4 sm:$0xff]   ;;  %v2267_v59 = vld [vmem:[%s3014_s4 + $0x74] ss:$8 sps:$4 sm:$0xff]  }
  0xdc   : > { %1150 = vmatpush1.bf16.msra.mxu0 %v2175_v60  ;;  %1191 = vmatpush1.bf16.msra.mxu1 %v2178_v61  ;;  %v2270_v60 = vld [vmem:[%s3014_s4 + $0x174] ss:$8 sps:$4 sm:$0xff]   ;;  %v2265_v61 = vld [vmem:[%s3014_s4 + $0x70] ss:$8 sps:$4 sm:$0xff]  }
  0xdd   : > { %1151 = vmatprep.subr.bf16.mxu0 %v2183_v62  ;;  %1192 = vmatprep.subr.bf16.mxu1 %v2186_v63  ;;  %v2268_v62 = vld [vmem:[%s3014_s4 + $0x170] ss:$8 sps:$4 sm:$0xff]   ;;  %v2273_v63 = vld [vmem:[%s3014_s4 + $0x84] ss:$8 sps:$4 sm:$0xff]  }
  0xe0   : > { %1152 = vmatpush1.bf16.msra.mxu0 %v2181_v0  ;;  %1193 = vmatpush1.bf16.msra.mxu1 %v2184_v1  ;;  %v2276_v0 = vld [vmem:[%s3014_s4 + $0x184] ss:$8 sps:$4 sm:$0xff]   ;;  %v2271_v1 = vld [vmem:[%s3014_s4 + $0x80] ss:$8 sps:$4 sm:$0xff]  }
  0xe1   : > { %1153 = vmatprep.subr.bf16.mxu0 %v2189_v2  ;;  %1194 = vmatprep.subr.bf16.mxu1 %v2192_v3  ;;  %v2274_v2 = vld [vmem:[%s3014_s4 + $0x180] ss:$8 sps:$4 sm:$0xff]   ;;  %v2279_v3 = vld [vmem:[%s3014_s4 + $0x94] ss:$8 sps:$4 sm:$0xff]  }
  0xe4   : > { %1154 = vmatpush1.bf16.msra.mxu0 %v2187_v4  ;;  %1195 = vmatpush1.bf16.msra.mxu1 %v2190_v5  ;;  %v2282_v4 = vld [vmem:[%s3014_s4 + $0x194] ss:$8 sps:$4 sm:$0xff]   ;;  %v2277_v5 = vld [vmem:[%s3014_s4 + $0x90] ss:$8 sps:$4 sm:$0xff]  }
  0xe5   : > { %1155 = vmatprep.subr.bf16.mxu0 %v2195_v6  ;;  %1196 = vmatprep.subr.bf16.mxu1 %v2198_v7  ;;  %v2280_v6 = vld [vmem:[%s3014_s4 + $0x190] ss:$8 sps:$4 sm:$0xff]   ;;  %v2285_v7 = vld [vmem:[%s3014_s4 + $0xa4] ss:$8 sps:$4 sm:$0xff]  }
  0xe8   : > { %1156 = vmatpush1.bf16.msra.mxu0 %v2193_v8  ;;  %1197 = vmatpush1.bf16.msra.mxu1 %v2196_v9  ;;  %v2288_v8 = vld [vmem:[%s3014_s4 + $0x1a4] ss:$8 sps:$4 sm:$0xff]   ;;  %v2283_v9 = vld [vmem:[%s3014_s4 + $0xa0] ss:$8 sps:$4 sm:$0xff]  }
  0xe9   : > { %1157 = vmatprep.subr.bf16.mxu0 %v2201_v12  ;;  %1198 = vmatprep.subr.bf16.mxu1 %v2204_v13  ;;  %v2286_v12 = vld [vmem:[%s3014_s4 + $0x1a0] ss:$8 sps:$4 sm:$0xff]   ;;  %v2291_v13 = vld [vmem:[%s3014_s4 + $0xb4] ss:$8 sps:$4 sm:$0xff]  }
  0xec   : > { %1158 = vmatpush1.bf16.msra.mxu0 %v2199_v15  ;;  %1199 = vmatpush1.bf16.msra.mxu1 %v2202_v16  ;;  %v2294_v15 = vld [vmem:[%s3014_s4 + $0x1b4] ss:$8 sps:$4 sm:$0xff]   ;;  %v2289_v16 = vld [vmem:[%s3014_s4 + $0xb0] ss:$8 sps:$4 sm:$0xff]  }
  0xed   : > { %1159 = vmatprep.subr.bf16.mxu0 %v2207_v19  ;;  %1200 = vmatprep.subr.bf16.mxu1 %v2210_v20  ;;  %v2292_v19 = vld [vmem:[%s3014_s4 + $0x1b0] ss:$8 sps:$4 sm:$0xff]   ;;  %v2297_v20 = vld [vmem:[%s3014_s4 + $0xc4] ss:$8 sps:$4 sm:$0xff]  }
  0xf0   : > { %1160 = vmatpush1.bf16.msra.mxu0 %v2205_v21  ;;  %1201 = vmatpush1.bf16.msra.mxu1 %v2208_v22  ;;  %v2300_v21 = vld [vmem:[%s3014_s4 + $0x1c4] ss:$8 sps:$4 sm:$0xff]   ;;  %v2295_v22 = vld [vmem:[%s3014_s4 + $0xc0] ss:$8 sps:$4 sm:$0xff]  }
  0xf1   : > { %1161 = vmatprep.subr.bf16.mxu0 %v2213_v23  ;;  %1202 = vmatprep.subr.bf16.mxu1 %v2216_v24  ;;  %v2298_v23 = vld [vmem:[%s3014_s4 + $0x1c0] ss:$8 sps:$4 sm:$0xff]   ;;  %v2303_v24 = vld [vmem:[%s3014_s4 + $0xd4] ss:$8 sps:$4 sm:$0xff]  }
  0xf4   : > { %1162 = vmatpush1.bf16.msra.mxu0 %v2211_v25  ;;  %1203 = vmatpush1.bf16.msra.mxu1 %v2214_v26  ;;  %v2306_v25 = vld [vmem:[%s3014_s4 + $0x1d4] ss:$8 sps:$4 sm:$0xff]   ;;  %v2301_v26 = vld [vmem:[%s3014_s4 + $0xd0] ss:$8 sps:$4 sm:$0xff]  }
  0xf5   : > { %1163 = vmatprep.subr.bf16.mxu0 %v2219_v27  ;;  %1204 = vmatprep.subr.bf16.mxu1 %v2222_v28  ;;  %v2304_v27 = vld [vmem:[%s3014_s4 + $0x1d0] ss:$8 sps:$4 sm:$0xff]   ;;  %v2309_v28 = vld [vmem:[%s3014_s4 + $0xe4] ss:$8 sps:$4 sm:$0xff]  }
  0xf8   : > { %1164 = vmatpush1.bf16.msra.mxu0 %v2217_v30  ;;  %1205 = vmatpush1.bf16.msra.mxu1 %v2220_v31  ;;  %v2312_v30 = vld [vmem:[%s3014_s4 + $0x1e4] ss:$8 sps:$4 sm:$0xff]   ;;  %v2307_v31 = vld [vmem:[%s3014_s4 + $0xe0] ss:$8 sps:$4 sm:$0xff]  }
  0xf9   : > { %1643 = vmatprep.subr.bf16.mxu0 %v2225_v32  ;;  %1684 = vmatprep.subr.bf16.mxu1 %v2228_v33  ;;  %v2310_v32 = vld [vmem:[%s3014_s4 + $0x1e0] ss:$8 sps:$4 sm:$0xff]   ;;  %v2315_v33 = vld [vmem:[%s3014_s4 + $0xf4] ss:$8 sps:$4 sm:$0xff]  }
  0xfb   : > { %1166 = vmatmul.mubr.bf16.vlgmr.msra.gmra.mrb[4].mxu0 %v2615_v29  ;;  %1207 = vmatmul.mubr.bf16.vlgmr.msra.gmra.mrb[4].mxu1 %v2615_v29  ;;  %v2231_v29 = vld [vmem:[%s3014_s4 + $0x14] ss:$8 sps:$4 sm:$0xff]  }
  0xfc   : > { %1644 = vmatpush1.bf16.msra.mxu0 %v2223_v34  ;;  %1685 = vmatpush1.bf16.msra.mxu1 %v2226_v35  ;;  %v2318_v34 = vld [vmem:[%s3014_s4 + $0x1f4] ss:$8 sps:$4 sm:$0xff]   ;;  %v2313_v35 = vld [vmem:[%s3014_s4 + $0xf0] ss:$8 sps:$4 sm:$0xff]  }
  0xfd   : > { %1645 = vmatprep.subr.bf16.mxu0 %v2231_v29  ;;  %1686 = vmatprep.subr.bf16.mxu1 %v2234_v36  ;;  %v2316_v29 = vld [vmem:[%s3014_s4 + $0x1f0] ss:$8 sps:$4 sm:$0xff]  }
 0x100   : > { %1646 = vmatpush1.bf16.msra.mxu0 %v2229_v37  ;;  %1687 = vmatpush1.bf16.msra.mxu1 %v2232_v38 }
 0x101   : > { %1647 = vmatprep.subr.bf16.mxu0 %v2237_v40  ;;  %1688 = vmatprep.subr.bf16.mxu1 %v2240_v42 }
 0x104   : > { %1648 = vmatpush1.bf16.msra.mxu0 %v2235_v39  ;;  %1689 = vmatpush1.bf16.msra.mxu1 %v2238_v41 }
 0x105   : > { %1649 = vmatprep.subr.bf16.mxu0 %v2243_v43  ;;  %1690 = vmatprep.subr.bf16.mxu1 %v2246_v44 }
 0x108   : > { %1650 = vmatpush1.bf16.msra.mxu0 %v2241_v45  ;;  %1691 = vmatpush1.bf16.msra.mxu1 %v2244_v46 }
 0x109   : > { %1651 = vmatprep.subr.bf16.mxu0 %v2249_v47  ;;  %1692 = vmatprep.subr.bf16.mxu1 %v2252_v48 }
 0x10c   : > { %1652 = vmatpush1.bf16.msra.mxu0 %v2247_v49  ;;  %1693 = vmatpush1.bf16.msra.mxu1 %v2250_v50 }
 0x10d   : > { %1653 = vmatprep.subr.bf16.mxu0 %v2255_v51  ;;  %1694 = vmatprep.subr.bf16.mxu1 %v2258_v52 }
 0x110   : > { %1654 = vmatpush1.bf16.msra.mxu0 %v2253_v53  ;;  %1695 = vmatpush1.bf16.msra.mxu1 %v2256_v54 }
 0x111   : > { %1655 = vmatprep.subr.bf16.mxu0 %v2261_v55  ;;  %1696 = vmatprep.subr.bf16.mxu1 %v2264_v56 }
 0x114   : > { %1656 = vmatpush1.bf16.msra.mxu0 %v2259_v57  ;;  %1697 = vmatpush1.bf16.msra.mxu1 %v2262_v58 }
 0x115   : > { %1657 = vmatprep.subr.bf16.mxu0 %v2267_v59  ;;  %1698 = vmatprep.subr.bf16.mxu1 %v2270_v60 }
 0x118   : > { %1658 = vmatpush1.bf16.msra.mxu0 %v2265_v61  ;;  %1699 = vmatpush1.bf16.msra.mxu1 %v2268_v62 }
 0x119   : > { %1659 = vmatprep.subr.bf16.mxu0 %v2273_v63  ;;  %1700 = vmatprep.subr.bf16.mxu1 %v2276_v0 }
 0x11c   : > { %1660 = vmatpush1.bf16.msra.mxu0 %v2271_v1  ;;  %1701 = vmatpush1.bf16.msra.mxu1 %v2274_v2 }
 0x11d   : > { %1661 = vmatprep.subr.bf16.mxu0 %v2279_v3  ;;  %1702 = vmatprep.subr.bf16.mxu1 %v2282_v4 }
 0x120   : > { %1662 = vmatpush1.bf16.msra.mxu0 %v2277_v5  ;;  %1703 = vmatpush1.bf16.msra.mxu1 %v2280_v6 }
 0x121   : > { %1663 = vmatprep.subr.bf16.mxu0 %v2285_v7  ;;  %1704 = vmatprep.subr.bf16.mxu1 %v2288_v8 }
 0x124   : > { %1664 = vmatpush1.bf16.msra.mxu0 %v2283_v9  ;;  %1705 = vmatpush1.bf16.msra.mxu1 %v2286_v12 }
 0x125   : > { %1665 = vmatprep.subr.bf16.mxu0 %v2291_v13  ;;  %1706 = vmatprep.subr.bf16.mxu1 %v2294_v15 }
 0x128   : > { %1666 = vmatpush1.bf16.msra.mxu0 %v2289_v16  ;;  %1707 = vmatpush1.bf16.msra.mxu1 %v2292_v19 }
 0x129   : > { %1667 = vmatprep.subr.bf16.mxu0 %v2297_v20  ;;  %1708 = vmatprep.subr.bf16.mxu1 %v2300_v21 }
 0x12c   : > { %1668 = vmatpush1.bf16.msra.mxu0 %v2295_v22  ;;  %1709 = vmatpush1.bf16.msra.mxu1 %v2298_v23 }
 0x12d   : > { %1669 = vmatprep.subr.bf16.mxu0 %v2303_v24  ;;  %1710 = vmatprep.subr.bf16.mxu1 %v2306_v25 }
 0x130   : > { %1670 = vmatpush1.bf16.msra.mxu0 %v2301_v26  ;;  %1711 = vmatpush1.bf16.msra.mxu1 %v2304_v27 }
 0x131   : > { %1671 = vmatprep.subr.bf16.mxu0 %v2309_v28  ;;  %1712 = vmatprep.subr.bf16.mxu1 %v2312_v30 }
 0x134   : > { %1672 = vmatpush1.bf16.msra.mxu0 %v2307_v31  ;;  %1713 = vmatpush1.bf16.msra.mxu1 %v2310_v32 }
 0x135   : > { %1673 = vmatprep.subr.bf16.mxu0 %v2315_v33  ;;  %1714 = vmatprep.subr.bf16.mxu1 %v2318_v34 }
 0x138   : > { %1674 = vmatpush1.bf16.msra.mxu0 %v2313_v35  ;;  %1715 = vmatpush1.bf16.msra.mxu1 %v2316_v29 }
 0x18e   : > { %v701_v36 = vpop.f32.mrb[0].mxu0  ;;  %v742_v37 = vpop.f32.mrb[0].mxu1 }
 0x18f   : > { %v703_v38 = vpop.f32.mrb[1].mxu0  ;;  %v744_v39 = vpop.f32.mrb[1].mxu1  ;;  %v1215_v44 = vmul.f32 %v701_v36, %v701_v36  ;;  %v1217_v45 = vmul.f32 %v742_v37, %v742_v37 }
 0x190   : > { %v705_v40 = vpop.f32.mrb[2].mxu0  ;;  %v746_v41 = vpop.f32.mrb[2].mxu1  ;;  %v1216_v46 = vmul.f32 %v703_v38, %v703_v38  ;;  %v1218_v47 = vmul.f32 %v744_v39, %v744_v39 }
 0x191   : > { %v706_v42 = vpop.f32.mrb[3].mxu0  ;;  %v747_v43 = vpop.f32.mrb[3].mxu1  ;;  %v1219_v48 = vmul.f32 %v1215_v44, %v701_v36  ;;  %v1221_v49 = vmul.f32 %v1217_v45, %v742_v37 }
 0x192   : > { %v1220_v50 = vmul.f32 %v1216_v46, %v703_v38  ;;  %v1222_v51 = vmul.f32 %v1218_v47, %v744_v39 }
 0x193   : > { %v1223_v52 = vmul.f32 0.044715, %v1219_v48  ;;  %v1225_v53 = vmul.f32 0.044715, %v1221_v49 }
 0x194   : > { %v1224_v54 = vmul.f32 0.044715, %v1220_v50  ;;  %v1226_v55 = vmul.f32 0.044715, %v1222_v51 }
 0x195   : > { %v1227_v56 = vadd.f32 %v1223_v52, %v701_v36  ;;  %v1229_v57 = vadd.f32 %v1225_v53, %v742_v37 }
 0x196   : > { %v1228_v58 = vadd.f32 %v1224_v54, %v703_v38  ;;  %v1230_v59 = vadd.f32 %v1226_v55, %v744_v39  ;;  %v1727_v55 = vld [vmem:[%s3015_s5] sm:$0x3] }
 0x197   : > { %v1231_v60 = vmul.f32 0.7978846, %v1227_v56  ;;  %v1233_v61 = vmul.f32 0.7978846, %v1229_v57  ;;  %v1738_v56 = vadd.f32 1.0, %v1727_v55 }
 0x198   : > { %v1232_v62 = vmul.f32 0.7978846, %v1228_v58  ;;  %v1234_v63 = vmul.f32 0.7978846, %v1230_v59 }
 0x199   : > { %2321 = vtanh.f32 %v1231_v60 }
 0x19a   : > { %2323 = vtanh.f32 %v1233_v61 }
 0x19b   : > { %2325 = vtanh.f32 %v1232_v62 }
 0x19c   : > { %2327 = vtanh.f32 %v1234_v63 }
 0x1a3   : > { %v2322_v0 = vpop.eup %2321 }
 0x1a4   : > { %v2324_v1 = vpop.eup %2323  ;;  %v1239_v4 = vadd.f32 1.0, %v2322_v0 }
 0x1a5   : > { %v2326_v2 = vpop.eup %2325  ;;  %v1241_v5 = vadd.f32 1.0, %v2324_v1 }
 0x1a6   : > { %v2328_v3 = vpop.eup %2327  ;;  %v1240_v6 = vadd.f32 1.0, %v2326_v2  ;;  %v1243_v8 = vmul.f32 0.5, %v1239_v4 }
 0x1a7   : > { %v1242_v7 = vadd.f32 1.0, %v2328_v3  ;;  %v1245_v9 = vmul.f32 0.5, %v1241_v5 }
 0x1a8   : > { %v1244_v12 = vmul.f32 0.5, %v1240_v6  ;;  %v1247_v15 = vmul.f32 %v1243_v8, %v701_v36 }
 0x1a9   : > { %v1246_v13 = vmul.f32 0.5, %v1242_v7  ;;  %v1249_v16 = vmul.f32 %v1245_v9, %v742_v37 }
 0x1aa   : > { %v1248_v21 = vmul.f32 %v1244_v12, %v703_v38 }
 0x1ab   : > { %v1250_v22 = vmul.f32 %v1246_v13, %v744_v39 }
 0x1ce   : > { %v1167_v19 = vpop.f32.mrb[4].mxu0  ;;  %v1208_v20 = vpop.f32.mrb[4].mxu1 }
 0x1cf   : > { %v1251_v23 = vmul.f32 %v1247_v15, %v1167_v19  ;;  %v1253_v24 = vmul.f32 %v1249_v16, %v1208_v20  ;;  %v1169_v25 = vpop.f32.mrb[5].mxu0  ;;  %v1210_v26 = vpop.f32.mrb[5].mxu1 }
 0x1d0   : > { %v1252_v27 = vmul.f32 %v1248_v21, %v1169_v25  ;;  %v1254_v28 = vmul.f32 %v1250_v22, %v1210_v26  ;;  %v1171_v30 = vpop.f32.mrb[6].mxu0  ;;  %v1212_v31 = vpop.f32.mrb[6].mxu1 }
 0x1d1   : > { %v1172_v32 = vpop.f32.mrb[7].mxu0  ;;  %v1213_v33 = vpop.f32.mrb[7].mxu1  ;;  %v1255_v29 = vpack.c.bf16 %v1251_v23, %v1251_v23  ;;  %v1257_v40 = vpack.c.bf16 %v1253_v24, %v1253_v24 }
 0x1d2   : > { %v1256_v34 = vpack.c.bf16 %v1252_v27, %v1252_v27  ;;  %v1258_v35 = vpack.c.bf16 %v1254_v28, %v1254_v28 }
 0x1d4   : > { %1675 = vmatprep.mubr.bf16.mxu0 %v1256_v34  ;;  %1716 = vmatprep.mubr.bf16.mxu1 %v1258_v35 }
 0x1d5   : > { %1676 = vmatmul.mubr.bf16.vlgmr.msra.gmra.mrb[8].mxu0 %v1255_v29  ;;  %1717 = vmatmul.mubr.bf16.vlgmr.msra.gmra.mrb[8].mxu1 %v1257_v40 }
 0x2a8   : > { %v1677_v36 = vpop.f32.mrb[8].mxu0  ;;  %v1718_v37 = vpop.f32.mrb[8].mxu1 }
 0x2a9   : > { %v1719_v38 = vadd.f32 %v1718_v37, %v1677_v36  ;;  %v1679_v39 = vpop.f32.mrb[9].mxu0  ;;  %v1720_v41 = vpop.f32.mrb[9].mxu1 }
 0x2aa   : > { %v1721_v42 = vadd.f32 %v1720_v41, %v1679_v39  ;;  %v1681_v43 = vpop.f32.mrb[10].mxu0  ;;  %v1722_v44 = vpop.f32.mrb[10].mxu1 }
 0x2ab   : > { %v1725_v45 = vadd.f32 %v1719_v38, %v2417_v10  ;;  %v1682_v46 = vpop.f32.mrb[11].mxu0  ;;  %v1723_v47 = vpop.f32.mrb[11].mxu1  ;;  %v1747_v10 = vrot.slane %v1738_v56, %v275_v17 }
 0x2ac   : > { %v1726_v48 = vadd.f32 %v1721_v42, %v2419_v11  ;;  %v1743_v11 = vrot.slane %v1738_v56, %v271_v18 }
 0x2ad   : > { %v1728_v49 = vmul.f32 %v1725_v45, %v1725_v45 }
 0x2ae   : > { %v1729_v50 = vmul.f32 %v1726_v48, %v1726_v48 }
 0x2b0   : > { %v1730_v51 = vadd.f32 %v1729_v50, %v1728_v49 }
 0x2b2   : > { %1731 = vadd.xlane.f32.xlu0 %v1730_v51 }
 0x33f   : > { %v1732_v52 = vpop.xlane.xlu0 %1731 }
 0x340   : > { %v1733_v53 = vmul.f32 0.00390625, %v1732_v52 }
 0x342   : > { %v1734_v54 = vadd.f32 1e-06, %v1733_v53 }
 0x344   : > { %2329 = vrsqrt.f32 %v1734_v54 }
 0x34e   : > { %v2330_v57 = vpop.eup %2329 }
 0x34f   : > { %v1736_v58 = vmul.f32 %v2330_v57, %v1725_v45  ;;  %v1737_v59 = vmul.f32 %v2330_v57, %v1726_v48 }
 0x351   : > { %v1750_v60 = vmul.f32 %v1743_v11, %v1736_v58  ;;  %v1751_v61 = vmul.f32 %v1747_v10, %v1737_v59 }
 0x353   : > { %v2022_v62 = vpack.c.bf16 %v1751_v61, %v1750_v60 }
 0x355   : > { %1760 = vst [vmem:[%s251_s15] sm:$0xff] %v2022_v62 }
 0x356 PF: > { %s16_s21 = sadd.s32 1, %s2337_s21  }
 0x357   : > { %p13_p4 = scmp.ge.s32.totalorder %s16_s21, 4  }
 0x359   :  { %15 = sbr.rel (!%p13_p4) target bundleno = 1 (0x1), region = 74 }

// kernel: paligemma_forward.18
= control target key start
LH: loop header
LB: loop body
LE: loop exit
PB: predicated region body
PF: predicated region fallthrough
CT: control target
= control target key end

     0   :  { %s2347_s21 = smov 0   ;;  %s2968_s0 = inlined_call_operand.vmem [shape: bf16[2,8,256], index: 0, kind: input, shape index: {}]   ;;  %s2969_s1 = inlined_call_operand.vmem [shape: f32[1,256], index: 1, kind: input, shape index: {}, may-alias: {1,5}]   ;;  %s2970_s2 = inlined_call_operand.vmem [shape: bf16[256,512], index: 2, kind: input, shape index: {}]   ;;  %s2971_s3 = inlined_call_operand.vmem [shape: bf16[256,512], index: 3, kind: input, shape index: {}]   ;;  %s2972_s4 = inlined_call_operand.vmem [shape: bf16[512,256], index: 4, kind: input, shape index: {}]   ;;  %s2973_s5 = inlined_call_operand.vmem [shape: f32[1,256], index: 5, kind: input, shape index: {}, may-alias: {1,5}]   ;;  %s2974_s6 = inlined_call_operand.vmem [shape: bf16[2,8,256], index: 6, kind: output, shape index: {}]  }
   0x1 LB: > { %s1791_s22 = sadd.s32 4294967295, %s2310_s21   ;;  %p1795_p0 = scmp.ge.s32.totalorder %s2310_s21, 1  ;;  %s2310_s21 = sphi %s2347_s21, %s16_s21  }
   0x2   : > { %p212_p1 = scmp.lt.s32.totalorder %s2310_s21, 3 }
   0x4   : > { %p213_p2 = pnand %p1795_p0, %p212_p1 }
   0x5   : > { %p242_p3 = scmp.lt.s32.totalorder (!%p213_p2), %s1791_s22, 1  ;;  %v2006_v0 = vld [vmem:[%s2970_s2 + $0x4] ss:$16 sps:$4 sm:$0xff] (!%p213_p2)   ;;  %v2008_v1 = vld [vmem:[%s2970_s2 + $0xc] ss:$16 sps:$4 sm:$0xff] (!%p213_p2)  }
   0x6   : > { %216 = sbr.rel (%p213_p2) target bundleno = 689 (0x2b1), region = 44  ;;  %667 = vmatprep.subr.bf16.mxu0 (!%p213_p2), %v2006_v0  ;;  %v2010_v2 = vld [vmem:[%s2970_s2] ss:$16 sps:$4 sm:$0xff] (!%p213_p2)   ;;  %v2011_v3 = vld [vmem:[%s2970_s2 + $0x8] ss:$16 sps:$4 sm:$0xff] (!%p213_p2)   ;;  %708 = vmatprep.subr.bf16.mxu1 (!%p213_p2), %v2008_v1 }
   0x7   : > { %v2012_v4 = vld [vmem:[%s2970_s2 + $0x24] ss:$16 sps:$4 sm:$0xff] (!%p213_p2)   ;;  %668 = vmatpush1.bf16.msra.mxu0 (!%p213_p2), %v2010_v2  ;;  %709 = vmatpush1.bf16.msra.mxu1 (!%p213_p2), %v2011_v3  ;;  %v2014_v5 = vld [vmem:[%s2970_s2 + $0x2c] ss:$16 sps:$4 sm:$0xff] (!%p213_p2)   ;;  %v2016_v6 = vld [vmem:[%s2970_s2 + $0x20] ss:$16 sps:$4 sm:$0xff] (!%p213_p2)  }
   0x8   : > { %669 = vmatprep.subr.bf16.mxu0 (!%p213_p2), %v2012_v4  ;;  %v2017_v7 = vld [vmem:[%s2970_s2 + $0x28] ss:$16 sps:$4 sm:$0xff] (!%p213_p2)   ;;  %710 = vmatprep.subr.bf16.mxu1 (!%p213_p2), %v2014_v5  ;;  %v2018_v9 = vld [vmem:[%s2970_s2 + $0x44] ss:$16 sps:$4 sm:$0xff] (!%p213_p2)   ;;  %v2020_v12 = vld [vmem:[%s2970_s2 + $0x4c] ss:$16 sps:$4 sm:$0xff] (!%p213_p2)  }
   0x9   : > { %v2022_v13 = vld [vmem:[%s2970_s2 + $0x40] ss:$16 sps:$4 sm:$0xff] (!%p213_p2)   ;;  %v2023_v14 = vld [vmem:[%s2970_s2 + $0x48] ss:$16 sps:$4 sm:$0xff] (!%p213_p2)   ;;  %v2024_v17 = vld [vmem:[%s2970_s2 + $0x64] ss:$16 sps:$4 sm:$0xff] (!%p213_p2)  }
   0xa   : > { %v2026_v18 = vld [vmem:[%s2970_s2 + $0x6c] ss:$16 sps:$4 sm:$0xff] (!%p213_p2)   ;;  %v2028_v20 = vld [vmem:[%s2970_s2 + $0x60] ss:$16 sps:$4 sm:$0xff] (!%p213_p2)   ;;  %v2029_v21 = vld [vmem:[%s2970_s2 + $0x68] ss:$16 sps:$4 sm:$0xff] (!%p213_p2)  }
   0xb   : > { %670 = vmatpush1.bf16.msra.mxu0 (!%p213_p2), %v2016_v6  ;;  %711 = vmatpush1.bf16.msra.mxu1 (!%p213_p2), %v2017_v7  ;;  %v2030_v22 = vld [vmem:[%s2970_s2 + $0x84] ss:$16 sps:$4 sm:$0xff] (!%p213_p2)   ;;  %v2032_v23 = vld [vmem:[%s2970_s2 + $0x8c] ss:$16 sps:$4 sm:$0xff] (!%p213_p2)   ;;  %v2034_v24 = vld [vmem:[%s2970_s2 + $0x80] ss:$16 sps:$4 sm:$0xff] (!%p213_p2)  }
   0xc   : > { %671 = vmatprep.subr.bf16.mxu0 (!%p213_p2), %v2018_v9  ;;  %712 = vmatprep.subr.bf16.mxu1 (!%p213_p2), %v2020_v12  ;;  %v2035_v25 = vld [vmem:[%s2970_s2 + $0x88] ss:$16 sps:$4 sm:$0xff] (!%p213_p2)   ;;  %v2036_v26 = vld [vmem:[%s2970_s2 + $0xa4] ss:$16 sps:$4 sm:$0xff] (!%p213_p2)   ;;  %v2038_v27 = vld [vmem:[%s2970_s2 + $0xac] ss:$16 sps:$4 sm:$0xff] (!%p213_p2)   ;;  %v269_v12 = vlaneseq (!%p213_p2) }
   0xd   : > { %s2976_s22 = smov (!%p242_p3, %s1791_s22), 1  ;;  %v2040_v28 = vld [vmem:[%s2970_s2 + $0xa0] ss:$16 sps:$4 sm:$0xff]   ;;  %v2041_v29 = vld [vmem:[%s2970_s2 + $0xa8] ss:$16 sps:$4 sm:$0xff]  }
   0xe   : > { %s1995_s8 = sshll.u32 %s2976_s22, 3  ;;  %v2042_v30 = vld [vmem:[%s2970_s2 + $0xc4] ss:$16 sps:$4 sm:$0xff]   ;;  %v2044_v31 = vld [vmem:[%s2970_s2 + $0xcc] ss:$16 sps:$4 sm:$0xff]  }
   0xf   : > { %s246_s15 = scalar_lea.vmem %s2968_s0, %s1995_s8  ;;  %672 = vmatpush1.bf16.msra.mxu0 %v2022_v13  ;;  %713 = vmatpush1.bf16.msra.mxu1 %v2023_v14  ;;  %v2046_v32 = vld [vmem:[%s2970_s2 + $0xc0] ss:$16 sps:$4 sm:$0xff]   ;;  %v2047_v33 = vld [vmem:[%s2970_s2 + $0xc8] ss:$16 sps:$4 sm:$0xff]   ;;  %v2048_v34 = vld [vmem:[%s2970_s2 + $0xe4] ss:$16 sps:$4 sm:$0xff]   ;;  %s251_s16 = scalar_lea.vmem %s2974_s6, %s1995_s8 }
  0x10   : > { %v252_v8 = vld [vmem:[%s246_s15] sm:$0xff]  ;;  %673 = vmatprep.subr.bf16.mxu0 %v2024_v17  ;;  %714 = vmatprep.subr.bf16.mxu1 %v2026_v18  ;;  %v2050_v35 = vld [vmem:[%s2970_s2 + $0xec] ss:$16 sps:$4 sm:$0xff]   ;;  %v2053_v37 = vld [vmem:[%s2970_s2 + $0xe8] ss:$16 sps:$4 sm:$0xff]   ;;  %v270_v14 = vshrl.u32 %v269_v12, 7 }
  0x11   : > { %v2390_v10 = vunpack.c.l.bf16 %v252_v8  ;;  %v2392_v11 = vunpack.c.h.bf16 %v252_v8  ;;  %v2052_v36 = vld [vmem:[%s2970_s2 + $0xe0] ss:$16 sps:$4 sm:$0xff]   ;;  %v2054_v38 = vld [vmem:[%s2970_s2 + $0x104] ss:$16 sps:$4 sm:$0xff]   ;;  %v2056_v39 = vld [vmem:[%s2970_s2 + $0x10c] ss:$16 sps:$4 sm:$0xff]  }
  0x12   : > { %v2058_v40 = vld [vmem:[%s2970_s2 + $0x100] ss:$16 sps:$4 sm:$0xff]   ;;  %v2059_v41 = vld [vmem:[%s2970_s2 + $0x108] ss:$16 sps:$4 sm:$0xff]   ;;  %v2060_v42 = vld [vmem:[%s2970_s2 + $0x124] ss:$16 sps:$4 sm:$0xff]  }
  0x13   : > { %v256_v15 = vmul.f32 %v2390_v10, %v2390_v10  ;;  %v257_v16 = vmul.f32 %v2392_v11, %v2392_v11  ;;  %674 = vmatpush1.bf16.msra.mxu0 %v2028_v20  ;;  %715 = vmatpush1.bf16.msra.mxu1 %v2029_v21  ;;  %v2062_v43 = vld [vmem:[%s2970_s2 + $0x12c] ss:$16 sps:$4 sm:$0xff]   ;;  %v2064_v44 = vld [vmem:[%s2970_s2 + $0x120] ss:$16 sps:$4 sm:$0xff]   ;;  %v2065_v45 = vld [vmem:[%s2970_s2 + $0x128] ss:$16 sps:$4 sm:$0xff]  }
  0x14   : > { %675 = vmatprep.subr.bf16.mxu0 %v2030_v22  ;;  %716 = vmatprep.subr.bf16.mxu1 %v2032_v23  ;;  %v2066_v46 = vld [vmem:[%s2970_s2 + $0x144] ss:$16 sps:$4 sm:$0xff]   ;;  %v2068_v47 = vld [vmem:[%s2970_s2 + $0x14c] ss:$16 sps:$4 sm:$0xff]   ;;  %v2070_v48 = vld [vmem:[%s2970_s2 + $0x140] ss:$16 sps:$4 sm:$0xff]  }
  0x15   : > { %v258_v19 = vadd.f32 %v257_v16, %v256_v15  ;;  %v2071_v49 = vld [vmem:[%s2970_s2 + $0x148] ss:$16 sps:$4 sm:$0xff]   ;;  %v2072_v50 = vld [vmem:[%s2970_s2 + $0x164] ss:$16 sps:$4 sm:$0xff]   ;;  %v2074_v51 = vld [vmem:[%s2970_s2 + $0x16c] ss:$16 sps:$4 sm:$0xff]  }
  0x16   : > { %v2076_v52 = vld [vmem:[%s2970_s2 + $0x160] ss:$16 sps:$4 sm:$0xff]   ;;  %v2077_v53 = vld [vmem:[%s2970_s2 + $0x168] ss:$16 sps:$4 sm:$0xff]   ;;  %v2078_v54 = vld [vmem:[%s2970_s2 + $0x184] ss:$16 sps:$4 sm:$0xff]  }
  0x17   : > { %259 = vadd.xlane.f32.xlu0 %v258_v19  ;;  %676 = vmatpush1.bf16.msra.mxu0 %v2034_v24  ;;  %v2080_v55 = vld [vmem:[%s2970_s2 + $0x18c] ss:$16 sps:$4 sm:$0xff]   ;;  %v2082_v56 = vld [vmem:[%s2970_s2 + $0x180] ss:$16 sps:$4 sm:$0xff]   ;;  %v2083_v57 = vld [vmem:[%s2970_s2 + $0x188] ss:$16 sps:$4 sm:$0xff]  }
  0x18   : > { %717 = vmatpush1.bf16.msra.mxu1 %v2035_v25  ;;  %677 = vmatprep.subr.bf16.mxu0 %v2036_v26  ;;  %v2084_v58 = vld [vmem:[%s2970_s2 + $0x1a4] ss:$16 sps:$4 sm:$0xff]   ;;  %v2086_v59 = vld [vmem:[%s2970_s2 + $0x1ac] ss:$16 sps:$4 sm:$0xff]   ;;  %v2088_v60 = vld [vmem:[%s2970_s2 + $0x1a0] ss:$16 sps:$4 sm:$0xff]  }
  0x19   : > { %718 = vmatprep.subr.bf16.mxu1 %v2038_v27  ;;  %v2089_v61 = vld [vmem:[%s2970_s2 + $0x1a8] ss:$16 sps:$4 sm:$0xff]   ;;  %v2090_v62 = vld [vmem:[%s2970_s2 + $0x1c4] ss:$16 sps:$4 sm:$0xff]   ;;  %v2092_v63 = vld [vmem:[%s2970_s2 + $0x1cc] ss:$16 sps:$4 sm:$0xff]  }
  0x1a   : > { %v2094_v0 = vld [vmem:[%s2970_s2 + $0x1c0] ss:$16 sps:$4 sm:$0xff]   ;;  %v2095_v1 = vld [vmem:[%s2970_s2 + $0x1c8] ss:$16 sps:$4 sm:$0xff]   ;;  %v2096_v2 = vld [vmem:[%s2970_s2 + $0x1e4] ss:$16 sps:$4 sm:$0xff]  }
  0x1b   : > { %678 = vmatpush1.bf16.msra.mxu0 %v2040_v28  ;;  %v2098_v3 = vld [vmem:[%s2970_s2 + $0x1ec] ss:$16 sps:$4 sm:$0xff]   ;;  %v2100_v4 = vld [vmem:[%s2970_s2 + $0x1e0] ss:$16 sps:$4 sm:$0xff]   ;;  %v2101_v5 = vld [vmem:[%s2970_s2 + $0x1e8] ss:$16 sps:$4 sm:$0xff]  }
  0x1c   : > { %719 = vmatpush1.bf16.msra.mxu1 %v2041_v29  ;;  %679 = vmatprep.subr.bf16.mxu0 %v2042_v30  ;;  %v2104_v6 = vld [vmem:[%s2971_s3 + $0x4] ss:$16 sps:$4 sm:$0xff]   ;;  %v2107_v7 = vld [vmem:[%s2971_s3 + $0xc] ss:$16 sps:$4 sm:$0xff]   ;;  %v255_v15 = vld [vmem:[%s2969_s1] sm:$0x3] }
  0x1d   : > { %720 = vmatprep.subr.bf16.mxu1 %v2044_v31  ;;  %v267_v16 = vadd.f32 1.0, %v255_v15  ;;  %v275_v17 = vsub.s32 1, %v270_v14  ;;  %v271_v18 = vsub.s32 0, %v270_v14  ;;  %v2102_v27 = vld [vmem:[%s2971_s3] ss:$16 sps:$4 sm:$0xff]  }
  0x1e   : > { %v2105_v28 = vld [vmem:[%s2971_s3 + $0x8] ss:$16 sps:$4 sm:$0xff]   ;;  %v2110_v30 = vld [vmem:[%s2971_s3 + $0x24] ss:$16 sps:$4 sm:$0xff]   ;;  %v2113_v31 = vld [vmem:[%s2971_s3 + $0x2c] ss:$16 sps:$4 sm:$0xff]  }
  0x1f   : > { %680 = vmatpush1.bf16.msra.mxu0 %v2046_v32  ;;  %v276_v19 = vrot.slane %v267_v16, %v275_v17  ;;  %v272_v20 = vrot.slane %v267_v16, %v271_v18  ;;  %v2108_v32 = vld [vmem:[%s2971_s3 + $0x20] ss:$16 sps:$4 sm:$0xff]   ;;  %v2176_v12 = vld [vmem:[%s2971_s3 + $0x184] ss:$16 sps:$4 sm:$0xff]   ;;  %v2177_v15 = vld [vmem:[%s2971_s3 + $0x188] ss:$16 sps:$4 sm:$0xff]  }
  0x20   : > { %721 = vmatpush1.bf16.msra.mxu1 %v2047_v33  ;;  %681 = vmatprep.subr.bf16.mxu0 %v2048_v34  ;;  %v2111_v33 = vld [vmem:[%s2971_s3 + $0x28] ss:$16 sps:$4 sm:$0xff]   ;;  %v2116_v34 = vld [vmem:[%s2971_s3 + $0x44] ss:$16 sps:$4 sm:$0xff]   ;;  %v2174_v14 = vld [vmem:[%s2971_s3 + $0x180] ss:$16 sps:$4 sm:$0xff]  }
  0x21   : > { %722 = vmatprep.subr.bf16.mxu1 %v2050_v35  ;;  %v2119_v35 = vld [vmem:[%s2971_s3 + $0x4c] ss:$16 sps:$4 sm:$0xff]   ;;  %v2182_v16 = vld [vmem:[%s2971_s3 + $0x1a4] ss:$16 sps:$4 sm:$0xff]   ;;  %v2180_v18 = vld [vmem:[%s2971_s3 + $0x1a0] ss:$16 sps:$4 sm:$0xff]  }
  0x22   : > { %v2185_v17 = vld [vmem:[%s2971_s3 + $0x1ac] ss:$16 sps:$4 sm:$0xff]  }
  0x23   : > { %682 = vmatpush1.bf16.msra.mxu0 %v2052_v36  ;;  %v2114_v36 = vld [vmem:[%s2971_s3 + $0x40] ss:$16 sps:$4 sm:$0xff]  }
  0x24   : > { %723 = vmatpush1.bf16.msra.mxu1 %v2053_v37  ;;  %683 = vmatprep.subr.bf16.mxu0 %v2054_v38  ;;  %v2117_v37 = vld [vmem:[%s2971_s3 + $0x48] ss:$16 sps:$4 sm:$0xff]   ;;  %v2122_v38 = vld [vmem:[%s2971_s3 + $0x64] ss:$16 sps:$4 sm:$0xff]  }
  0x25   : > { %724 = vmatprep.subr.bf16.mxu1 %v2056_v39  ;;  %v2125_v39 = vld [vmem:[%s2971_s3 + $0x6c] ss:$16 sps:$4 sm:$0xff]  }
  0x27   : > { %684 = vmatpush1.bf16.msra.mxu0 %v2058_v40  ;;  %v2120_v40 = vld [vmem:[%s2971_s3 + $0x60] ss:$16 sps:$4 sm:$0xff]  }
  0x28   : > { %725 = vmatpush1.bf16.msra.mxu1 %v2059_v41  ;;  %685 = vmatprep.subr.bf16.mxu0 %v2060_v42  ;;  %v2123_v41 = vld [vmem:[%s2971_s3 + $0x68] ss:$16 sps:$4 sm:$0xff]   ;;  %v2128_v42 = vld [vmem:[%s2971_s3 + $0x84] ss:$16 sps:$4 sm:$0xff]  }
  0x29   : > { %726 = vmatprep.subr.bf16.mxu1 %v2062_v43  ;;  %v2131_v43 = vld [vmem:[%s2971_s3 + $0x8c] ss:$16 sps:$4 sm:$0xff]  }
  0x2b   : > { %686 = vmatpush1.bf16.msra.mxu0 %v2064_v44  ;;  %v2126_v44 = vld [vmem:[%s2971_s3 + $0x80] ss:$16 sps:$4 sm:$0xff]  }
  0x2c   : > { %727 = vmatpush1.bf16.msra.mxu1 %v2065_v45  ;;  %687 = vmatprep.subr.bf16.mxu0 %v2066_v46  ;;  %v2129_v45 = vld [vmem:[%s2971_s3 + $0x88] ss:$16 sps:$4 sm:$0xff]   ;;  %v2134_v46 = vld [vmem:[%s2971_s3 + $0xa4] ss:$16 sps:$4 sm:$0xff]  }
  0x2d   : > { %728 = vmatprep.subr.bf16.mxu1 %v2068_v47  ;;  %v2137_v47 = vld [vmem:[%s2971_s3 + $0xac] ss:$16 sps:$4 sm:$0xff]  }
  0x2f   : > { %688 = vmatpush1.bf16.msra.mxu0 %v2070_v48  ;;  %v2132_v48 = vld [vmem:[%s2971_s3 + $0xa0] ss:$16 sps:$4 sm:$0xff]  }
  0x30   : > { %729 = vmatpush1.bf16.msra.mxu1 %v2071_v49  ;;  %689 = vmatprep.subr.bf16.mxu0 %v2072_v50  ;;  %v2135_v49 = vld [vmem:[%s2971_s3 + $0xa8] ss:$16 sps:$4 sm:$0xff]   ;;  %v2140_v50 = vld [vmem:[%s2971_s3 + $0xc4] ss:$16 sps:$4 sm:$0xff]  }
  0x31   : > { %730 = vmatprep.subr.bf16.mxu1 %v2074_v51  ;;  %v2143_v51 = vld [vmem:[%s2971_s3 + $0xcc] ss:$16 sps:$4 sm:$0xff]  }
  0x33   : > { %690 = vmatpush1.bf16.msra.mxu0 %v2076_v52  ;;  %v2138_v52 = vld [vmem:[%s2971_s3 + $0xc0] ss:$16 sps:$4 sm:$0xff]  }
  0x34   : > { %731 = vmatpush1.bf16.msra.mxu1 %v2077_v53  ;;  %691 = vmatprep.subr.bf16.mxu0 %v2078_v54  ;;  %v2141_v53 = vld [vmem:[%s2971_s3 + $0xc8] ss:$16 sps:$4 sm:$0xff]   ;;  %v2146_v54 = vld [vmem:[%s2971_s3 + $0xe4] ss:$16 sps:$4 sm:$0xff]  }
  0x35   : > { %732 = vmatprep.subr.bf16.mxu1 %v2080_v55  ;;  %v2149_v55 = vld [vmem:[%s2971_s3 + $0xec] ss:$16 sps:$4 sm:$0xff]  }
  0x37   : > { %692 = vmatpush1.bf16.msra.mxu0 %v2082_v56  ;;  %v2144_v56 = vld [vmem:[%s2971_s3 + $0xe0] ss:$16 sps:$4 sm:$0xff]  }
  0x38   : > { %733 = vmatpush1.bf16.msra.mxu1 %v2083_v57  ;;  %693 = vmatprep.subr.bf16.mxu0 %v2084_v58  ;;  %v2147_v57 = vld [vmem:[%s2971_s3 + $0xe8] ss:$16 sps:$4 sm:$0xff]   ;;  %v2152_v58 = vld [vmem:[%s2971_s3 + $0x104] ss:$16 sps:$4 sm:$0xff]  }
  0x39   : > { %734 = vmatprep.subr.bf16.mxu1 %v2086_v59  ;;  %v2155_v59 = vld [vmem:[%s2971_s3 + $0x10c] ss:$16 sps:$4 sm:$0xff]  }
  0x3b   : > { %694 = vmatpush1.bf16.msra.mxu0 %v2088_v60  ;;  %v2150_v60 = vld [vmem:[%s2971_s3 + $0x100] ss:$16 sps:$4 sm:$0xff]  }
  0x3c   : > { %735 = vmatpush1.bf16.msra.mxu1 %v2089_v61  ;;  %695 = vmatprep.subr.bf16.mxu0 %v2090_v62  ;;  %v2153_v61 = vld [vmem:[%s2971_s3 + $0x108] ss:$16 sps:$4 sm:$0xff]   ;;  %v2158_v62 = vld [vmem:[%s2971_s3 + $0x124] ss:$16 sps:$4 sm:$0xff]  }
  0x3d   : > { %736 = vmatprep.subr.bf16.mxu1 %v2092_v63  ;;  %v2161_v63 = vld [vmem:[%s2971_s3 + $0x12c] ss:$16 sps:$4 sm:$0xff]  }
  0x3f   : > { %696 = vmatpush1.bf16.msra.mxu0 %v2094_v0  ;;  %v2156_v0 = vld [vmem:[%s2971_s3 + $0x120] ss:$16 sps:$4 sm:$0xff]  }
  0x40   : > { %737 = vmatpush1.bf16.msra.mxu1 %v2095_v1  ;;  %697 = vmatprep.subr.bf16.mxu0 %v2096_v2  ;;  %v2159_v1 = vld [vmem:[%s2971_s3 + $0x128] ss:$16 sps:$4 sm:$0xff]   ;;  %v2164_v2 = vld [vmem:[%s2971_s3 + $0x144] ss:$16 sps:$4 sm:$0xff]  }
  0x41   : > { %738 = vmatprep.subr.bf16.mxu1 %v2098_v3  ;;  %v2167_v3 = vld [vmem:[%s2971_s3 + $0x14c] ss:$16 sps:$4 sm:$0xff]  }
  0x43   : > { %698 = vmatpush1.bf16.msra.mxu0 %v2100_v4  ;;  %v2162_v4 = vld [vmem:[%s2971_s3 + $0x140] ss:$16 sps:$4 sm:$0xff]  }
  0x44   : > { %739 = vmatpush1.bf16.msra.mxu1 %v2101_v5  ;;  %1133 = vmatprep.subr.bf16.mxu0 %v2104_v6  ;;  %v2165_v5 = vld [vmem:[%s2971_s3 + $0x148] ss:$16 sps:$4 sm:$0xff]   ;;  %v2170_v6 = vld [vmem:[%s2971_s3 + $0x164] ss:$16 sps:$4 sm:$0xff]  }
  0x45   : > { %1174 = vmatprep.subr.bf16.mxu1 %v2107_v7  ;;  %v2173_v7 = vld [vmem:[%s2971_s3 + $0x16c] ss:$16 sps:$4 sm:$0xff]  }
  0xa4   : > { %v260_v8 = vpop.xlane.xlu0 %259 }
  0xa5   : > { %v262_v9 = vmul.f32 0.00390625, %v260_v8  ;;  %v2168_v8 = vld [vmem:[%s2971_s3 + $0x160] ss:$16 sps:$4 sm:$0xff]  }
  0xa7   : > { %v263_v13 = vadd.f32 1e-06, %v262_v9  ;;  %v2171_v9 = vld [vmem:[%s2971_s3 + $0x168] ss:$16 sps:$4 sm:$0xff]  }
  0xa9   : > { %2294 = vrsqrt.f32 %v263_v13  ;;  %v2179_v13 = vld [vmem:[%s2971_s3 + $0x18c] ss:$16 sps:$4 sm:$0xff]  }
  0xb3   : > { %v2295_v21 = vpop.eup %2294 }
  0xb4   : > { %v266_v22 = vmul.f32 %v2295_v21, %v2392_v11  ;;  %v265_v23 = vmul.f32 %v2295_v21, %v2390_v10  ;;  %v2191_v21 = vld [vmem:[%s2971_s3 + $0x1cc] ss:$16 sps:$4 sm:$0xff]  }
  0xb6   : > { %v280_v24 = vmul.f32 %v276_v19, %v266_v22  ;;  %v279_v25 = vmul.f32 %v272_v20, %v265_v23  ;;  %v2183_v19 = vld [vmem:[%s2971_s3 + $0x1a8] ss:$16 sps:$4 sm:$0xff]   ;;  %v2188_v20 = vld [vmem:[%s2971_s3 + $0x1c4] ss:$16 sps:$4 sm:$0xff]   ;;  %v2186_v22 = vld [vmem:[%s2971_s3 + $0x1c0] ss:$16 sps:$4 sm:$0xff]  }
  0xb7   : > { %v2189_v23 = vld [vmem:[%s2971_s3 + $0x1c8] ss:$16 sps:$4 sm:$0xff]  }
  0xb8   : > { %v282_v26 = vpack.c.bf16 %v280_v24, %v280_v24  ;;  %v2580_v29 = vpack.c.bf16 %v279_v25, %v279_v25  ;;  %v2194_v24 = vld [vmem:[%s2971_s3 + $0x1e4] ss:$16 sps:$4 sm:$0xff]   ;;  %v2197_v25 = vld [vmem:[%s2971_s3 + $0x1ec] ss:$16 sps:$4 sm:$0xff]  }
  0xba   : > { %699 = vmatprep.mubr.bf16.mxu0 %v282_v26  ;;  %740 = vmatprep.mubr.bf16.mxu1 %v282_v26 }
  0xbb   : > { %700 = vmatmul.mubr.bf16.vlgmr.msra.gmra.mrb[0].mxu0 %v2580_v29  ;;  %741 = vmatmul.mubr.bf16.vlgmr.msra.gmra.mrb[0].mxu1 %v2580_v29 }
  0xbc   : > { %1134 = vmatpush1.bf16.msra.mxu0 %v2102_v27  ;;  %1175 = vmatpush1.bf16.msra.mxu1 %v2105_v28  ;;  %v2195_v27 = vld [vmem:[%s2971_s3 + $0x1e8] ss:$16 sps:$4 sm:$0xff]   ;;  %v2200_v28 = vld [vmem:[%s2972_s4 + $0x4] ss:$8 sps:$4 sm:$0xff]  }
  0xbd   : > { %1165 = vmatprep.mubr.bf16.mxu0 %v282_v26  ;;  %1206 = vmatprep.mubr.bf16.mxu1 %v282_v26  ;;  %v2192_v26 = vld [vmem:[%s2971_s3 + $0x1e0] ss:$16 sps:$4 sm:$0xff]  }
  0xbe   : > { %1135 = vmatprep.subr.bf16.mxu0 %v2110_v30  ;;  %1176 = vmatprep.subr.bf16.mxu1 %v2113_v31  ;;  %v2203_v30 = vld [vmem:[%s2972_s4 + $0x104] ss:$8 sps:$4 sm:$0xff]   ;;  %v2198_v31 = vld [vmem:[%s2972_s4] ss:$8 sps:$4 sm:$0xff]  }
  0xc0   : > { %1136 = vmatpush1.bf16.msra.mxu0 %v2108_v32  ;;  %1177 = vmatpush1.bf16.msra.mxu1 %v2111_v33  ;;  %v2201_v32 = vld [vmem:[%s2972_s4 + $0x100] ss:$8 sps:$4 sm:$0xff]   ;;  %v2209_v33 = vld [vmem:[%s2972_s4 + $0x114] ss:$8 sps:$4 sm:$0xff]  }
  0xc1   : > { %1137 = vmatprep.subr.bf16.mxu0 %v2116_v34  ;;  %1178 = vmatprep.subr.bf16.mxu1 %v2119_v35  ;;  %v2204_v34 = vld [vmem:[%s2972_s4 + $0x10] ss:$8 sps:$4 sm:$0xff]  }
  0xc2   : > { %v2207_v35 = vld [vmem:[%s2972_s4 + $0x110] ss:$8 sps:$4 sm:$0xff]  }
  0xc4   : > { %1138 = vmatpush1.bf16.msra.mxu0 %v2114_v36  ;;  %1179 = vmatpush1.bf16.msra.mxu1 %v2117_v37  ;;  %v2210_v36 = vld [vmem:[%s2972_s4 + $0x20] ss:$8 sps:$4 sm:$0xff]   ;;  %v2212_v37 = vld [vmem:[%s2972_s4 + $0x24] ss:$8 sps:$4 sm:$0xff]  }
  0xc5   : > { %1139 = vmatprep.subr.bf16.mxu0 %v2122_v38  ;;  %1180 = vmatprep.subr.bf16.mxu1 %v2125_v39  ;;  %v2213_v38 = vld [vmem:[%s2972_s4 + $0x120] ss:$8 sps:$4 sm:$0xff]   ;;  %v2215_v39 = vld [vmem:[%s2972_s4 + $0x124] ss:$8 sps:$4 sm:$0xff]  }
  0xc8   : > { %1140 = vmatpush1.bf16.msra.mxu0 %v2120_v40  ;;  %1181 = vmatpush1.bf16.msra.mxu1 %v2123_v41  ;;  %v2218_v40 = vld [vmem:[%s2972_s4 + $0x34] ss:$8 sps:$4 sm:$0xff]  }
  0xc9   : > { %1141 = vmatprep.subr.bf16.mxu0 %v2128_v42  ;;  %1182 = vmatprep.subr.bf16.mxu1 %v2131_v43  ;;  %v2221_v41 = vld [vmem:[%s2972_s4 + $0x134] ss:$8 sps:$4 sm:$0xff]   ;;  %v2216_v42 = vld [vmem:[%s2972_s4 + $0x30] ss:$8 sps:$4 sm:$0xff]  }
  0xca   : > { %v2219_v43 = vld [vmem:[%s2972_s4 + $0x130] ss:$8 sps:$4 sm:$0xff]  }
  0xcc   : > { %1142 = vmatpush1.bf16.msra.mxu0 %v2126_v44  ;;  %1183 = vmatpush1.bf16.msra.mxu1 %v2129_v45  ;;  %v2224_v44 = vld [vmem:[%s2972_s4 + $0x44] ss:$8 sps:$4 sm:$0xff]  }
  0xcd   : > { %1143 = vmatprep.subr.bf16.mxu0 %v2134_v46  ;;  %1184 = vmatprep.subr.bf16.mxu1 %v2137_v47  ;;  %v2227_v45 = vld [vmem:[%s2972_s4 + $0x144] ss:$8 sps:$4 sm:$0xff]   ;;  %v2222_v46 = vld [vmem:[%s2972_s4 + $0x40] ss:$8 sps:$4 sm:$0xff]  }
  0xce   : > { %v2225_v47 = vld [vmem:[%s2972_s4 + $0x140] ss:$8 sps:$4 sm:$0xff]  }
  0xd0   : > { %1144 = vmatpush1.bf16.msra.mxu0 %v2132_v48  ;;  %1185 = vmatpush1.bf16.msra.mxu1 %v2135_v49  ;;  %v2230_v48 = vld [vmem:[%s2972_s4 + $0x54] ss:$8 sps:$4 sm:$0xff]  }
  0xd1   : > { %1145 = vmatprep.subr.bf16.mxu0 %v2140_v50  ;;  %1186 = vmatprep.subr.bf16.mxu1 %v2143_v51  ;;  %v2233_v49 = vld [vmem:[%s2972_s4 + $0x154] ss:$8 sps:$4 sm:$0xff]   ;;  %v2228_v50 = vld [vmem:[%s2972_s4 + $0x50] ss:$8 sps:$4 sm:$0xff]  }
  0xd2   : > { %v2231_v51 = vld [vmem:[%s2972_s4 + $0x150] ss:$8 sps:$4 sm:$0xff]  }
  0xd4   : > { %1146 = vmatpush1.bf16.msra.mxu0 %v2138_v52  ;;  %1187 = vmatpush1.bf16.msra.mxu1 %v2141_v53  ;;  %v2236_v52 = vld [vmem:[%s2972_s4 + $0x64] ss:$8 sps:$4 sm:$0xff]  }
  0xd5   : > { %1147 = vmatprep.subr.bf16.mxu0 %v2146_v54  ;;  %1188 = vmatprep.subr.bf16.mxu1 %v2149_v55  ;;  %v2239_v53 = vld [vmem:[%s2972_s4 + $0x164] ss:$8 sps:$4 sm:$0xff]   ;;  %v2234_v54 = vld [vmem:[%s2972_s4 + $0x60] ss:$8 sps:$4 sm:$0xff]  }
  0xd6   : > { %v2237_v55 = vld [vmem:[%s2972_s4 + $0x160] ss:$8 sps:$4 sm:$0xff]  }
  0xd8   : > { %1148 = vmatpush1.bf16.msra.mxu0 %v2144_v56  ;;  %1189 = vmatpush1.bf16.msra.mxu1 %v2147_v57  ;;  %v2242_v56 = vld [vmem:[%s2972_s4 + $0x74] ss:$8 sps:$4 sm:$0xff]  }
  0xd9   : > { %1149 = vmatprep.subr.bf16.mxu0 %v2152_v58  ;;  %1190 = vmatprep.subr.bf16.mxu1 %v2155_v59  ;;  %v2245_v57 = vld [vmem:[%s2972_s4 + $0x174] ss:$8 sps:$4 sm:$0xff]   ;;  %v2240_v58 = vld [vmem:[%s2972_s4 + $0x70] ss:$8 sps:$4 sm:$0xff]  }
  0xda   : > { %v2243_v59 = vld [vmem:[%s2972_s4 + $0x170] ss:$8 sps:$4 sm:$0xff]  }
  0xdc   : > { %1150 = vmatpush1.bf16.msra.mxu0 %v2150_v60  ;;  %1191 = vmatpush1.bf16.msra.mxu1 %v2153_v61  ;;  %v2248_v60 = vld [vmem:[%s2972_s4 + $0x84] ss:$8 sps:$4 sm:$0xff]  }
  0xdd   : > { %1151 = vmatprep.subr.bf16.mxu0 %v2158_v62  ;;  %1192 = vmatprep.subr.bf16.mxu1 %v2161_v63  ;;  %v2251_v61 = vld [vmem:[%s2972_s4 + $0x184] ss:$8 sps:$4 sm:$0xff]   ;;  %v2246_v62 = vld [vmem:[%s2972_s4 + $0x80] ss:$8 sps:$4 sm:$0xff]  }
  0xde   : > { %v2249_v63 = vld [vmem:[%s2972_s4 + $0x180] ss:$8 sps:$4 sm:$0xff]  }
  0xe0   : > { %1152 = vmatpush1.bf16.msra.mxu0 %v2156_v0  ;;  %1193 = vmatpush1.bf16.msra.mxu1 %v2159_v1  ;;  %v2254_v0 = vld [vmem:[%s2972_s4 + $0x94] ss:$8 sps:$4 sm:$0xff]  }
  0xe1   : > { %1153 = vmatprep.subr.bf16.mxu0 %v2164_v2  ;;  %1194 = vmatprep.subr.bf16.mxu1 %v2167_v3  ;;  %v2257_v1 = vld [vmem:[%s2972_s4 + $0x194] ss:$8 sps:$4 sm:$0xff]   ;;  %v2252_v2 = vld [vmem:[%s2972_s4 + $0x90] ss:$8 sps:$4 sm:$0xff]  }
  0xe2   : > { %v2255_v3 = vld [vmem:[%s2972_s4 + $0x190] ss:$8 sps:$4 sm:$0xff]  }
  0xe4   : > { %1154 = vmatpush1.bf16.msra.mxu0 %v2162_v4  ;;  %1195 = vmatpush1.bf16.msra.mxu1 %v2165_v5  ;;  %v2260_v4 = vld [vmem:[%s2972_s4 + $0xa4] ss:$8 sps:$4 sm:$0xff]  }
  0xe5   : > { %1155 = vmatprep.subr.bf16.mxu0 %v2170_v6  ;;  %1196 = vmatprep.subr.bf16.mxu1 %v2173_v7  ;;  %v2263_v5 = vld [vmem:[%s2972_s4 + $0x1a4] ss:$8 sps:$4 sm:$0xff]   ;;  %v2258_v6 = vld [vmem:[%s2972_s4 + $0xa0] ss:$8 sps:$4 sm:$0xff]  }
  0xe6   : > { %v2261_v7 = vld [vmem:[%s2972_s4 + $0x1a0] ss:$8 sps:$4 sm:$0xff]  }
  0xe8   : > { %1156 = vmatpush1.bf16.msra.mxu0 %v2168_v8  ;;  %1197 = vmatpush1.bf16.msra.mxu1 %v2171_v9  ;;  %v2266_v8 = vld [vmem:[%s2972_s4 + $0xb4] ss:$8 sps:$4 sm:$0xff]  }
  0xe9   : > { %1157 = vmatprep.subr.bf16.mxu0 %v2176_v12  ;;  %1198 = vmatprep.subr.bf16.mxu1 %v2179_v13  ;;  %v2269_v9 = vld [vmem:[%s2972_s4 + $0x1b4] ss:$8 sps:$4 sm:$0xff]   ;;  %v2264_v12 = vld [vmem:[%s2972_s4 + $0xb0] ss:$8 sps:$4 sm:$0xff]  }
  0xea   : > { %v2267_v13 = vld [vmem:[%s2972_s4 + $0x1b0] ss:$8 sps:$4 sm:$0xff]  }
  0xec   : > { %1158 = vmatpush1.bf16.msra.mxu0 %v2174_v14  ;;  %1199 = vmatpush1.bf16.msra.mxu1 %v2177_v15  ;;  %v2272_v14 = vld [vmem:[%s2972_s4 + $0xc4] ss:$8 sps:$4 sm:$0xff]  }
  0xed   : > { %1159 = vmatprep.subr.bf16.mxu0 %v2182_v16  ;;  %1200 = vmatprep.subr.bf16.mxu1 %v2185_v17  ;;  %v2275_v15 = vld [vmem:[%s2972_s4 + $0x1c4] ss:$8 sps:$4 sm:$0xff]   ;;  %v2270_v16 = vld [vmem:[%s2972_s4 + $0xc0] ss:$8 sps:$4 sm:$0xff]  }
  0xee   : > { %v2273_v17 = vld [vmem:[%s2972_s4 + $0x1c0] ss:$8 sps:$4 sm:$0xff]  }
  0xf0   : > { %1160 = vmatpush1.bf16.msra.mxu0 %v2180_v18  ;;  %1201 = vmatpush1.bf16.msra.mxu1 %v2183_v19  ;;  %v2278_v18 = vld [vmem:[%s2972_s4 + $0xd4] ss:$8 sps:$4 sm:$0xff]  }
  0xf1   : > { %1161 = vmatprep.subr.bf16.mxu0 %v2188_v20  ;;  %1202 = vmatprep.subr.bf16.mxu1 %v2191_v21  ;;  %v2281_v19 = vld [vmem:[%s2972_s4 + $0x1d4] ss:$8 sps:$4 sm:$0xff]   ;;  %v2276_v20 = vld [vmem:[%s2972_s4 + $0xd0] ss:$8 sps:$4 sm:$0xff]  }
  0xf2   : > { %v2279_v21 = vld [vmem:[%s2972_s4 + $0x1d0] ss:$8 sps:$4 sm:$0xff]  }
  0xf4   : > { %1162 = vmatpush1.bf16.msra.mxu0 %v2186_v22  ;;  %1203 = vmatpush1.bf16.msra.mxu1 %v2189_v23  ;;  %v2284_v22 = vld [vmem:[%s2972_s4 + $0xe4] ss:$8 sps:$4 sm:$0xff]  }
  0xf5   : > { %1163 = vmatprep.subr.bf16.mxu0 %v2194_v24  ;;  %1204 = vmatprep.subr.bf16.mxu1 %v2197_v25  ;;  %v2287_v23 = vld [vmem:[%s2972_s4 + $0x1e4] ss:$8 sps:$4 sm:$0xff]   ;;  %v2282_v24 = vld [vmem:[%s2972_s4 + $0xe0] ss:$8 sps:$4 sm:$0xff]  }
  0xf6   : > { %v2285_v25 = vld [vmem:[%s2972_s4 + $0x1e0] ss:$8 sps:$4 sm:$0xff]  }
  0xf8   : > { %1164 = vmatpush1.bf16.msra.mxu0 %v2192_v26  ;;  %1205 = vmatpush1.bf16.msra.mxu1 %v2195_v27  ;;  %v2290_v26 = vld [vmem:[%s2972_s4 + $0xf4] ss:$8 sps:$4 sm:$0xff]  }
  0xf9   : > { %1643 = vmatprep.subr.bf16.mxu0 %v2200_v28  ;;  %1684 = vmatprep.subr.bf16.mxu1 %v2203_v30  ;;  %v2293_v27 = vld [vmem:[%s2972_s4 + $0x1f4] ss:$8 sps:$4 sm:$0xff]   ;;  %v2288_v28 = vld [vmem:[%s2972_s4 + $0xf0] ss:$8 sps:$4 sm:$0xff]  }
  0xfa   : > { %v2291_v30 = vld [vmem:[%s2972_s4 + $0x1f0] ss:$8 sps:$4 sm:$0xff]  }
  0xfb   : > { %1166 = vmatmul.mubr.bf16.vlgmr.msra.gmra.mrb[4].mxu0 %v2580_v29  ;;  %1207 = vmatmul.mubr.bf16.vlgmr.msra.gmra.mrb[4].mxu1 %v2580_v29  ;;  %v2206_v29 = vld [vmem:[%s2972_s4 + $0x14] ss:$8 sps:$4 sm:$0xff]  }
  0xfc   : > { %1644 = vmatpush1.bf16.msra.mxu0 %v2198_v31  ;;  %1685 = vmatpush1.bf16.msra.mxu1 %v2201_v32 }
  0xfd   : > { %1645 = vmatprep.subr.bf16.mxu0 %v2206_v29  ;;  %1686 = vmatprep.subr.bf16.mxu1 %v2209_v33 }
 0x100   : > { %1646 = vmatpush1.bf16.msra.mxu0 %v2204_v34  ;;  %1687 = vmatpush1.bf16.msra.mxu1 %v2207_v35 }
 0x101   : > { %1647 = vmatprep.subr.bf16.mxu0 %v2212_v37  ;;  %1688 = vmatprep.subr.bf16.mxu1 %v2215_v39 }
 0x104   : > { %1648 = vmatpush1.bf16.msra.mxu0 %v2210_v36  ;;  %1689 = vmatpush1.bf16.msra.mxu1 %v2213_v38 }
 0x105   : > { %1649 = vmatprep.subr.bf16.mxu0 %v2218_v40  ;;  %1690 = vmatprep.subr.bf16.mxu1 %v2221_v41 }
 0x108   : > { %1650 = vmatpush1.bf16.msra.mxu0 %v2216_v42  ;;  %1691 = vmatpush1.bf16.msra.mxu1 %v2219_v43 }
 0x109   : > { %1651 = vmatprep.subr.bf16.mxu0 %v2224_v44  ;;  %1692 = vmatprep.subr.bf16.mxu1 %v2227_v45 }
 0x10c   : > { %1652 = vmatpush1.bf16.msra.mxu0 %v2222_v46  ;;  %1693 = vmatpush1.bf16.msra.mxu1 %v2225_v47 }
 0x10d   : > { %1653 = vmatprep.subr.bf16.mxu0 %v2230_v48  ;;  %1694 = vmatprep.subr.bf16.mxu1 %v2233_v49 }
 0x110   : > { %1654 = vmatpush1.bf16.msra.mxu0 %v2228_v50  ;;  %1695 = vmatpush1.bf16.msra.mxu1 %v2231_v51 }
 0x111   : > { %1655 = vmatprep.subr.bf16.mxu0 %v2236_v52  ;;  %1696 = vmatprep.subr.bf16.mxu1 %v2239_v53 }
 0x114   : > { %1656 = vmatpush1.bf16.msra.mxu0 %v2234_v54  ;;  %1697 = vmatpush1.bf16.msra.mxu1 %v2237_v55 }
 0x115   : > { %1657 = vmatprep.subr.bf16.mxu0 %v2242_v56  ;;  %1698 = vmatprep.subr.bf16.mxu1 %v2245_v57 }
 0x118   : > { %1658 = vmatpush1.bf16.msra.mxu0 %v2240_v58  ;;  %1699 = vmatpush1.bf16.msra.mxu1 %v2243_v59 }
 0x119   : > { %1659 = vmatprep.subr.bf16.mxu0 %v2248_v60  ;;  %1700 = vmatprep.subr.bf16.mxu1 %v2251_v61 }
 0x11c   : > { %1660 = vmatpush1.bf16.msra.mxu0 %v2246_v62  ;;  %1701 = vmatpush1.bf16.msra.mxu1 %v2249_v63 }
 0x11d   : > { %1661 = vmatprep.subr.bf16.mxu0 %v2254_v0  ;;  %1702 = vmatprep.subr.bf16.mxu1 %v2257_v1 }
 0x120   : > { %1662 = vmatpush1.bf16.msra.mxu0 %v2252_v2  ;;  %1703 = vmatpush1.bf16.msra.mxu1 %v2255_v3 }
 0x121   : > { %1663 = vmatprep.subr.bf16.mxu0 %v2260_v4  ;;  %1704 = vmatprep.subr.bf16.mxu1 %v2263_v5 }
 0x124   : > { %1664 = vmatpush1.bf16.msra.mxu0 %v2258_v6  ;;  %1705 = vmatpush1.bf16.msra.mxu1 %v2261_v7 }
 0x125   : > { %1665 = vmatprep.subr.bf16.mxu0 %v2266_v8  ;;  %1706 = vmatprep.subr.bf16.mxu1 %v2269_v9 }
 0x128   : > { %1666 = vmatpush1.bf16.msra.mxu0 %v2264_v12  ;;  %1707 = vmatpush1.bf16.msra.mxu1 %v2267_v13 }
 0x129   : > { %1667 = vmatprep.subr.bf16.mxu0 %v2272_v14  ;;  %1708 = vmatprep.subr.bf16.mxu1 %v2275_v15 }
 0x12c   : > { %1668 = vmatpush1.bf16.msra.mxu0 %v2270_v16  ;;  %1709 = vmatpush1.bf16.msra.mxu1 %v2273_v17 }
 0x12d   : > { %1669 = vmatprep.subr.bf16.mxu0 %v2278_v18  ;;  %1710 = vmatprep.subr.bf16.mxu1 %v2281_v19 }
 0x130   : > { %1670 = vmatpush1.bf16.msra.mxu0 %v2276_v20  ;;  %1711 = vmatpush1.bf16.msra.mxu1 %v2279_v21 }
 0x131   : > { %1671 = vmatprep.subr.bf16.mxu0 %v2284_v22  ;;  %1712 = vmatprep.subr.bf16.mxu1 %v2287_v23 }
 0x134   : > { %1672 = vmatpush1.bf16.msra.mxu0 %v2282_v24  ;;  %1713 = vmatpush1.bf16.msra.mxu1 %v2285_v25 }
 0x135   : > { %1673 = vmatprep.subr.bf16.mxu0 %v2290_v26  ;;  %1714 = vmatprep.subr.bf16.mxu1 %v2293_v27 }
 0x138   : > { %1674 = vmatpush1.bf16.msra.mxu0 %v2288_v28  ;;  %1715 = vmatpush1.bf16.msra.mxu1 %v2291_v30 }
 0x18e   : > { %v701_v31 = vpop.f32.mrb[0].mxu0  ;;  %v742_v32 = vpop.f32.mrb[0].mxu1 }
 0x18f   : > { %v703_v29 = vpop.f32.mrb[1].mxu0  ;;  %v744_v33 = vpop.f32.mrb[1].mxu1  ;;  %v1215_v38 = vmul.f32 %v701_v31, %v701_v31  ;;  %v1217_v39 = vmul.f32 %v742_v32, %v742_v32 }
 0x190   : > { %v705_v34 = vpop.f32.mrb[2].mxu0  ;;  %v746_v35 = vpop.f32.mrb[2].mxu1  ;;  %v1216_v40 = vmul.f32 %v703_v29, %v703_v29  ;;  %v1218_v41 = vmul.f32 %v744_v33, %v744_v33 }
 0x191   : > { %v706_v36 = vpop.f32.mrb[3].mxu0  ;;  %v747_v37 = vpop.f32.mrb[3].mxu1  ;;  %v1219_v42 = vmul.f32 %v1215_v38, %v701_v31  ;;  %v1221_v43 = vmul.f32 %v1217_v39, %v742_v32 }
 0x192   : > { %v1220_v44 = vmul.f32 %v1216_v40, %v703_v29  ;;  %v1222_v45 = vmul.f32 %v1218_v41, %v744_v33 }
 0x193   : > { %v1223_v46 = vmul.f32 0.044715, %v1219_v42  ;;  %v1225_v47 = vmul.f32 0.044715, %v1221_v43 }
 0x194   : > { %v1224_v48 = vmul.f32 0.044715, %v1220_v44  ;;  %v1226_v49 = vmul.f32 0.044715, %v1222_v45 }
 0x195   : > { %v1227_v50 = vadd.f32 %v1223_v46, %v701_v31  ;;  %v1229_v51 = vadd.f32 %v1225_v47, %v742_v32 }
 0x196   : > { %v1228_v52 = vadd.f32 %v1224_v48, %v703_v29  ;;  %v1230_v53 = vadd.f32 %v1226_v49, %v744_v33 }
 0x197   : > { %v1231_v54 = vmul.f32 0.7978846, %v1227_v50  ;;  %v1233_v55 = vmul.f32 0.7978846, %v1229_v51 }
 0x198   : > { %v1232_v56 = vmul.f32 0.7978846, %v1228_v52  ;;  %v1234_v57 = vmul.f32 0.7978846, %v1230_v53 }
 0x199   : > { %2296 = vtanh.f32 %v1231_v54 }
 0x19a   : > { %2298 = vtanh.f32 %v1233_v55 }
 0x19b   : > { %2300 = vtanh.f32 %v1232_v56 }
 0x19c   : > { %2302 = vtanh.f32 %v1234_v57 }
 0x1a3   : > { %v2297_v58 = vpop.eup %2296 }
 0x1a4   : > { %v2299_v59 = vpop.eup %2298  ;;  %v1239_v62 = vadd.f32 1.0, %v2297_v58 }
 0x1a5   : > { %v2301_v60 = vpop.eup %2300  ;;  %v1241_v63 = vadd.f32 1.0, %v2299_v59 }
 0x1a6   : > { %v2303_v61 = vpop.eup %2302  ;;  %v1240_v0 = vadd.f32 1.0, %v2301_v60  ;;  %v1243_v2 = vmul.f32 0.5, %v1239_v62 }
 0x1a7   : > { %v1242_v1 = vadd.f32 1.0, %v2303_v61  ;;  %v1245_v3 = vmul.f32 0.5, %v1241_v63 }
 0x1a8   : > { %v1244_v4 = vmul.f32 0.5, %v1240_v0  ;;  %v1247_v6 = vmul.f32 %v1243_v2, %v701_v31 }
 0x1a9   : > { %v1246_v5 = vmul.f32 0.5, %v1242_v1  ;;  %v1249_v7 = vmul.f32 %v1245_v3, %v742_v32 }
 0x1aa   : > { %v1248_v12 = vmul.f32 %v1244_v4, %v703_v29 }
 0x1ab   : > { %v1250_v13 = vmul.f32 %v1246_v5, %v744_v33 }
 0x1ce   : > { %v1167_v8 = vpop.f32.mrb[4].mxu0  ;;  %v1208_v9 = vpop.f32.mrb[4].mxu1 }
 0x1cf   : > { %v1251_v14 = vmul.f32 %v1247_v6, %v1167_v8  ;;  %v1253_v15 = vmul.f32 %v1249_v7, %v1208_v9  ;;  %v1169_v16 = vpop.f32.mrb[5].mxu0  ;;  %v1210_v17 = vpop.f32.mrb[5].mxu1 }
 0x1d0   : > { %v1252_v18 = vmul.f32 %v1248_v12, %v1169_v16  ;;  %v1254_v19 = vmul.f32 %v1250_v13, %v1210_v17  ;;  %v1171_v20 = vpop.f32.mrb[6].mxu0  ;;  %v1212_v21 = vpop.f32.mrb[6].mxu1 }
 0x1d1   : > { %v1172_v22 = vpop.f32.mrb[7].mxu0  ;;  %v1213_v23 = vpop.f32.mrb[7].mxu1  ;;  %v1255_v26 = vpack.c.bf16 %v1251_v14, %v1251_v14  ;;  %v1257_v27 = vpack.c.bf16 %v1253_v15, %v1253_v15 }
 0x1d2   : > { %v1256_v24 = vpack.c.bf16 %v1252_v18, %v1252_v18  ;;  %v1258_v25 = vpack.c.bf16 %v1254_v19, %v1254_v19 }
 0x1d4   : > { %1675 = vmatprep.mubr.bf16.mxu0 %v1256_v24  ;;  %1716 = vmatprep.mubr.bf16.mxu1 %v1258_v25 }
 0x1d5   : > { %1676 = vmatmul.mubr.bf16.vlgmr.msra.gmra.mrb[8].mxu0 %v1255_v26  ;;  %1717 = vmatmul.mubr.bf16.vlgmr.msra.gmra.mrb[8].mxu1 %v1257_v27 }
 0x2a8   : > { %v1677_v28 = vpop.f32.mrb[8].mxu0  ;;  %v1718_v30 = vpop.f32.mrb[8].mxu1 }
 0x2a9   : > { %v1719_v31 = vadd.f32 %v1718_v30, %v1677_v28  ;;  %v1679_v32 = vpop.f32.mrb[9].mxu0  ;;  %v1720_v29 = vpop.f32.mrb[9].mxu1 }
 0x2aa   : > { %v1721_v33 = vadd.f32 %v1720_v29, %v1679_v32  ;;  %v1681_v34 = vpop.f32.mrb[10].mxu0  ;;  %v1722_v35 = vpop.f32.mrb[10].mxu1 }
 0x2ab   : > { %v1725_v36 = vadd.f32 %v1719_v31, %v2390_v10  ;;  %v1682_v37 = vpop.f32.mrb[11].mxu0  ;;  %v1723_v38 = vpop.f32.mrb[11].mxu1 }
 0x2ac   : > { %v1726_v39 = vadd.f32 %v1721_v33, %v2392_v11 }
 0x2ae   : > { %v1997_v40 = vpack.c.bf16 %v1726_v39, %v1725_v36 }
 0x2b0   : > { %1735 = vst [vmem:[%s251_s16] sm:$0xff] %v1997_v40 }
 0x2b1 PF: > { %s16_s21 = sadd.s32 1, %s2310_s21  }
 0x2b2   : > { %p13_p4 = scmp.ge.s32.totalorder %s16_s21, 4  }
 0x2b4   :  { %15 = sbr.rel (!%p13_p4) target bundleno = 1 (0x1), region = 74 }

</bundles_post_ra>
